<compile_context>
chip_gen: v7x
topology: tpu7x:2x2x1
jax: 0.10.0
libtpu: 0.0.40
codegen_flags: <defaults>
</compile_context>

<pallas_src>
import functools

import numpy as np

import jax
import jax.numpy as jnp
from jax import lax
from jax.experimental import pallas as pl
from jax.experimental.pallas import tpu as pltpu


def _choose_tb(batch):
    """Batch-tile: up to 128 MXU rows per step, >=2 grid steps when the batch is
    large enough (v7x megacore), minimal padding for tiny batches."""
    bp8 = max(8, ((batch + 7) // 8) * 8)
    if bp8 >= 256:
        return 128                       # many 128-row tiles, grid >= 2
    if bp8 > 64:
        return ((bp8 + 15) // 16) * 8    # exactly 2 grid steps
    return bp8                           # tiny batch: one step


# ----------------------------------------------------------------------------
# Fused LeNet kernel. Internal layout: rows = (spatial_row, batch),
# lanes = (spatial_col, channel) interleaved.
# ----------------------------------------------------------------------------
def _lenet_kernel(x_ref, band1_ref, b1_ref, band2_ref, b2_ref,
                  se1_ref, se2_ref,
                  wf1_ref, bf1_ref, wf2_ref, bf2_ref, wf3_ref, bf3_ref,
                  o_ref, *, tb):
    f32, bf16 = jnp.float32, jnp.bfloat16
    x = x_ref[...]                                            # (32, TB, 32) [h, b, w] f32

    # ---- conv1 (5x5, IC=1, OC=6, pad=2): ONE wide-K banded matmul, K = 5*32 = 160.
    lhs1 = jnp.concatenate(
        [x[ki:ki + 28].reshape(28 * tb, 32) for ki in range(5)], axis=-1)   # (28*TB, 160)
    a1 = jnp.dot(lhs1.astype(bf16), band1_ref[...], preferred_element_type=f32)
    a1 = jnp.maximum(a1 + b1_ref[...], 0.0)                   # (28*TB, 168) rows=(oh,b)

    # ---- maxpool1 (2x2): pairwise max over rows, shifted-lane max + one select matmul.
    a1 = a1.reshape(14, 2, tb, 168)
    a1 = jnp.maximum(a1[:, 0], a1[:, 1]).reshape(14 * tb, 168)
    m1 = jnp.maximum(a1[:, :162], a1[:, 6:])                  # max over width pairs
    p1 = jnp.dot(m1.astype(bf16), se1_ref[...], preferred_element_type=f32)  # (14*TB, 84)

    # ---- conv2 (5x5, IC=6, OC=16, valid): ONE wide-K banded matmul, K = 5*84 = 420.
    p1 = p1.reshape(14, tb, 84)
    lhs2 = jnp.concatenate(
        [p1[ki:ki + 10].reshape(10 * tb, 84) for ki in range(5)], axis=-1)  # (10*TB, 420)
    a2 = jnp.dot(lhs2.astype(bf16), band2_ref[...], preferred_element_type=f32)
    a2 = jnp.maximum(a2 + b2_ref[...], 0.0)                   # (10*TB, 160) rows=(oh,b)

    # ---- maxpool2 (2x2)
    a2 = a2.reshape(5, 2, tb, 160)
    a2 = jnp.maximum(a2[:, 0], a2[:, 1]).reshape(5 * tb, 160)
    m2 = jnp.maximum(a2[:, :144], a2[:, 16:])
    p2 = jnp.dot(m2.astype(bf16), se2_ref[...], preferred_element_type=f32)  # (5*TB, 80)

    # ---- fc1 + ReLU: one (TB, 400) x (400, 120) matmul (h taps concatenated on lanes).
    p2 = p2.reshape(5, tb, 80)
    lhs3 = jnp.concatenate([p2[h] for h in range(5)], axis=-1)               # (TB, 400)
    y = jnp.dot(lhs3.astype(bf16), wf1_ref[...], preferred_element_type=f32)
    y = jnp.maximum(y + bf1_ref[...], 0.0)                    # (TB, 120)

    # ---- fc2 + ReLU
    y = jnp.dot(y.astype(bf16), wf2_ref[...], preferred_element_type=f32)
    y = jnp.maximum(y + bf2_ref[...], 0.0)                    # (TB, 84)

    # ---- fc3 (output padded to 128 lanes for a lane-dense store)
    o_ref[...] = jnp.dot(y.astype(bf16), wf3_ref[...],
                         preferred_element_type=f32) + bf3_ref[...]


# ----------------------------------------------------------------------------
# Host-side, one-time parameter preparation: PyTorch-shaped params ->
# stacked banded conv matrices, pooling selection matrices, transposed FC
# weights (all bf16 for the MXU), lane-replicated f32 biases, 128-lane fc3 pad.
# ----------------------------------------------------------------------------
def prepare_constants(params):
    w1 = np.asarray(params["conv1_w"], np.float32)    # (6, 1, 5, 5)
    b1 = np.asarray(params["conv1_b"], np.float32)    # (6,)
    w2 = np.asarray(params["conv2_w"], np.float32)    # (16, 6, 5, 5)
    b2 = np.asarray(params["conv2_b"], np.float32)    # (16,)
    f1w = np.asarray(params["fc1_w"], np.float32)     # (120, 400)
    f1b = np.asarray(params["fc1_b"], np.float32)
    f2w = np.asarray(params["fc2_w"], np.float32)     # (84, 120)
    f2b = np.asarray(params["fc2_b"], np.float32)
    f3w = np.asarray(params["fc3_w"], np.float32)     # (10, 84)
    f3b = np.asarray(params["fc3_b"], np.float32)

    # conv1 banded weights, taps stacked along K: band1[ki*32 + w, ow*6+oc] = w1[oc,0,ki,w-ow]
    band1 = np.zeros((5, 32, 28 * 6), np.float32)
    for ki in range(5):
        for kj in range(5):
            for ow in range(28):
                band1[ki, ow + kj, ow * 6:(ow + 1) * 6] = w1[:, 0, ki, kj]
    band1 = band1.reshape(5 * 32, 28 * 6)                       # (160, 168)

    # conv2 banded weights: band2[ki*84 + w*6+ic, ow*16+oc] = w2[oc,ic,ki,w-ow]
    band2 = np.zeros((5, 14 * 6, 10 * 16), np.float32)
    for ki in range(5):
        for kj in range(5):
            for ow in range(10):
                band2[ki, (ow + kj) * 6:(ow + kj + 1) * 6,
                      ow * 16:(ow + 1) * 16] = w2[:, :, ki, kj].T
    band2 = band2.reshape(5 * 84, 10 * 16)                      # (420, 160)

    # pool lane-selection matrices (pick even-window lanes of the shifted max).
    se1 = np.zeros((162, 14 * 6), np.float32)
    for wo in range(14):
        for c in range(6):
            se1[(2 * wo) * 6 + c, wo * 6 + c] = 1.0
    se2 = np.zeros((144, 5 * 16), np.float32)
    for wo in range(5):
        for c in range(16):
            se2[(2 * wo) * 16 + c, wo * 16 + c] = 1.0

    # fc1: wf1[h*80 + w*16 + c, n] = fc1_w[n, c*25 + h*5 + w]  (torch .view order)
    wf1 = f1w.reshape(120, 16, 5, 5).transpose(2, 3, 1, 0).reshape(400, 120)

    # fc3 padded to 128 output lanes (sliced back to 10 in the wrapper).
    wf3 = np.zeros((84, 128), np.float32)
    wf3[:, :10] = f3w.T
    bf3 = np.zeros((1, 128), np.float32)
    bf3[0, :10] = f3b

    bf16 = jnp.bfloat16
    consts = {
        # MXU operands -> bf16
        "band1": jnp.asarray(band1, bf16), "band2": jnp.asarray(band2, bf16),
        "se1": jnp.asarray(se1, bf16), "se2": jnp.asarray(se2, bf16),
        "wf1": jnp.asarray(wf1, bf16),
        "wf2": jnp.asarray(np.ascontiguousarray(f2w.T), bf16),
        "wf3": jnp.asarray(wf3, bf16),
        # biases stay f32 (added post-matmul on the VPU)
        "b1": jnp.asarray(np.tile(b1, 28)[None, :]),            # (1, 168)
        "b2": jnp.asarray(np.tile(b2, 10)[None, :]),            # (1, 160)
        "bf1": jnp.asarray(f1b[None, :]),
        "bf2": jnp.asarray(f2b[None, :]),
        "bf3": jnp.asarray(bf3),
    }
    return consts


# ----------------------------------------------------------------------------
# Forward pass (mirrors CNN.forward), one fused pallas_call.
# ----------------------------------------------------------------------------
@jax.jit
def cnn_forward(consts, x_nchw):
    B = x_nchw.shape[0]
    TB = _choose_tb(B)
    Bp = ((B + TB - 1) // TB) * TB
    # batch pad + spatial pad(2) + (b,h,w)->(h,b,w) relayout, fused by XLA in this jit.
    xk = jnp.transpose(
        jnp.pad(x_nchw[:, 0, :, :], ((0, Bp - B), (2, 2), (2, 2))), (1, 0, 2))  # (32, Bp, 32)

    kernel = functools.partial(_lenet_kernel, tb=TB)

    out = pl.pallas_call(
        kernel,
        out_shape=jax.ShapeDtypeStruct((Bp, 128), jnp.float32),
        grid_spec=pltpu.PrefetchScalarGridSpec(
            num_scalar_prefetch=0,
            grid=(Bp // TB,),
            in_specs=[
                pl.BlockSpec((32, TB, 32), lambda i: (0, i, 0)),   # x tile [h, b, w]
                pl.BlockSpec((160, 168), lambda i: (0, 0)),        # conv1 banded weights
                pl.BlockSpec((1, 168), lambda i: (0, 0)),          # conv1 bias (lane-replicated)
                pl.BlockSpec((420, 160), lambda i: (0, 0)),        # conv2 banded weights
                pl.BlockSpec((1, 160), lambda i: (0, 0)),          # conv2 bias
                pl.BlockSpec((162, 84), lambda i: (0, 0)),         # pool1 select
                pl.BlockSpec((144, 80), lambda i: (0, 0)),         # pool2 select
                pl.BlockSpec((400, 120), lambda i: (0, 0)),        # fc1 weights
                pl.BlockSpec((1, 120), lambda i: (0, 0)),          # fc1 bias
                pl.BlockSpec((120, 84), lambda i: (0, 0)),         # fc2 weights
                pl.BlockSpec((1, 84), lambda i: (0, 0)),           # fc2 bias
                pl.BlockSpec((84, 128), lambda i: (0, 0)),         # fc3 weights (padded)
                pl.BlockSpec((1, 128), lambda i: (0, 0)),          # fc3 bias (padded)
            ],
            out_specs=pl.BlockSpec((TB, 128), lambda i: (i, 0)),
        ),
        compiler_params=pltpu.CompilerParams(
            dimension_semantics=("parallel",),
            vmem_limit_bytes=48 * 1024 * 1024,
        ),
    )(xk, consts["band1"], consts["b1"], consts["band2"], consts["b2"],
      consts["se1"], consts["se2"],
      consts["wf1"], consts["bf1"], consts["wf2"], consts["bf2"],
      consts["wf3"], consts["bf3"])

    return out[:B, :10]


# ----------------------------------------------------------------------------
# Pure-JAX reference (numerical self-check) and synthetic init.
# ----------------------------------------------------------------------------
@jax.jit
def cnn_reference(params, x):
    y = lax.conv_general_dilated(x, params["conv1_w"], (1, 1), ((2, 2), (2, 2)),
                                 dimension_numbers=("NCHW", "OIHW", "NCHW"))
    y = jax.nn.relu(y + params["conv1_b"][None, :, None, None])
    y = lax.reduce_window(y, -jnp.inf, lax.max, (1, 1, 2, 2), (1, 1, 2, 2), "VALID")
    y = lax.conv_general_dilated(y, params["conv2_w"], (1, 1), "VALID",
                                 dimension_numbers=("NCHW", "OIHW", "NCHW"))
    y = jax.nn.relu(y + params["conv2_b"][None, :, None, None])
    y = lax.reduce_window(y, -jnp.inf, lax.max, (1, 1, 2, 2), (1, 1, 2, 2), "VALID")
    y = y.reshape(y.shape[0], -1)
    y = jax.nn.relu(y @ params["fc1_w"].T + params["fc1_b"])
    y = jax.nn.relu(y @ params["fc2_w"].T + params["fc2_b"])
    return y @ params["fc3_w"].T + params["fc3_b"]


def init_params(key):
    ks = jax.random.split(key, 10)
    s = 0.05
    return {
        "conv1_w": jax.random.normal(ks[0], (6, 1, 5, 5), jnp.float32) * s,
        "conv1_b": jax.random.normal(ks[1], (6,), jnp.float32) * s,
        "conv2_w": jax.random.normal(ks[2], (16, 6, 5, 5), jnp.float32) * s,
        "conv2_b": jax.random.normal(ks[3], (16,), jnp.float32) * s,
        "fc1_w": jax.random.normal(ks[4], (120, 400), jnp.float32) * s,
        "fc1_b": jax.random.normal(ks[5], (120,), jnp.float32) * s,
        "fc2_w": jax.random.normal(ks[6], (84, 120), jnp.float32) * s,
        "fc2_b": jax.random.normal(ks[7], (84,), jnp.float32) * s,
        "fc3_w": jax.random.normal(ks[8], (10, 84), jnp.float32) * s,
        "fc3_b": jax.random.normal(ks[9], (10,), jnp.float32) * s,
    }


if __name__ == "__main__":
    key = jax.random.PRNGKey(0)
    pkey, xkey = jax.random.split(key)
    params = init_params(pkey)
    consts = prepare_constants(params)

    # Forward pass implies 28x28 single-channel input (LeNet / MNIST), small batch.
    x = jax.random.normal(xkey, (16, 1, 28, 28), jnp.float32)

    out = cnn_forward(consts, x)
    jax.block_until_ready(out)
    assert out.shape == (16, 10), out.shape

    ref = cnn_reference(params, x)
    np.testing.assert_allclose(np.asarray(out), np.asarray(ref),
                               atol=2e-2, rtol=2e-2)
    print("KERNEL_OK")
</pallas_src>

<mosaic_0001>
module attributes {stable_mosaic.version = 11 : i64} {
  func.func @_lenet_kernel(%arg0: i32, %arg1: memref<32x16x32xf32, #tpu.memory_space<vmem>>, %arg2: memref<160x168xbf16, #tpu.memory_space<vmem>>, %arg3: memref<1x168xf32, #tpu.memory_space<vmem>>, %arg4: memref<420x160xbf16, #tpu.memory_space<vmem>>, %arg5: memref<1x160xf32, #tpu.memory_space<vmem>>, %arg6: memref<162x84xbf16, #tpu.memory_space<vmem>>, %arg7: memref<144x80xbf16, #tpu.memory_space<vmem>>, %arg8: memref<400x120xbf16, #tpu.memory_space<vmem>>, %arg9: memref<1x120xf32, #tpu.memory_space<vmem>>, %arg10: memref<120x84xbf16, #tpu.memory_space<vmem>>, %arg11: memref<1x84xf32, #tpu.memory_space<vmem>>, %arg12: memref<84x128xbf16, #tpu.memory_space<vmem>>, %arg13: memref<1x128xf32, #tpu.memory_space<vmem>>, %arg14: memref<16x128xf32, #tpu.memory_space<vmem>>) attributes {dimension_semantics = [#tpu.dimension_semantics<parallel>], iteration_bounds = array<i64: 1>, scalar_prefetch = 0 : i64, scratch_operands = 0 : i64, tpu.core_type = #tpu.core_type<tc>, window_params = [{transform_indices = @transform_0, window_bounds = array<i64: 32, 16, 32>}, {pipeline_mode = #tpu.pipeline_mode<synchronous>, transform_indices = @transform_1, window_bounds = array<i64: 160, 168>}, {pipeline_mode = #tpu.pipeline_mode<synchronous>, transform_indices = @transform_2, window_bounds = array<i64: 1, 168>}, {pipeline_mode = #tpu.pipeline_mode<synchronous>, transform_indices = @transform_3, window_bounds = array<i64: 420, 160>}, {pipeline_mode = #tpu.pipeline_mode<synchronous>, transform_indices = @transform_4, window_bounds = array<i64: 1, 160>}, {pipeline_mode = #tpu.pipeline_mode<synchronous>, transform_indices = @transform_5, window_bounds = array<i64: 162, 84>}, {pipeline_mode = #tpu.pipeline_mode<synchronous>, transform_indices = @transform_6, window_bounds = array<i64: 144, 80>}, {pipeline_mode = #tpu.pipeline_mode<synchronous>, transform_indices = @transform_7, window_bounds = array<i64: 400, 120>}, {pipeline_mode = #tpu.pipeline_mode<synchronous>, transform_indices = @transform_8, window_bounds = array<i64: 1, 120>}, {pipeline_mode = #tpu.pipeline_mode<synchronous>, transform_indices = @transform_9, window_bounds = array<i64: 120, 84>}, {pipeline_mode = #tpu.pipeline_mode<synchronous>, transform_indices = @transform_10, window_bounds = array<i64: 1, 84>}, {pipeline_mode = #tpu.pipeline_mode<synchronous>, transform_indices = @transform_11, window_bounds = array<i64: 84, 128>}, {pipeline_mode = #tpu.pipeline_mode<synchronous>, transform_indices = @transform_12, window_bounds = array<i64: 1, 128>}, {transform_indices = @transform_13, window_bounds = array<i64: 16, 128>}]} {
    %c0 = arith.constant 0 : index
    %c0_0 = arith.constant 0 : index
    %c0_1 = arith.constant 0 : index
    %0 = vector.load %arg1[%c0, %c0_0, %c0_1] : memref<32x16x32xf32, #tpu.memory_space<vmem>>, vector<32x16x32xf32>
    %1 = vector.extract_strided_slice %0 {offsets = [0, 0, 0], sizes = [28, 16, 32], strides = [1, 1, 1]} : vector<32x16x32xf32> to vector<28x16x32xf32>
    %2 = vector.shape_cast %1 : vector<28x16x32xf32> to vector<448x32xf32>
    %3 = vector.extract_strided_slice %0 {offsets = [1, 0, 0], sizes = [28, 16, 32], strides = [1, 1, 1]} : vector<32x16x32xf32> to vector<28x16x32xf32>
    %4 = vector.shape_cast %3 : vector<28x16x32xf32> to vector<448x32xf32>
    %5 = vector.extract_strided_slice %0 {offsets = [2, 0, 0], sizes = [28, 16, 32], strides = [1, 1, 1]} : vector<32x16x32xf32> to vector<28x16x32xf32>
    %6 = vector.shape_cast %5 : vector<28x16x32xf32> to vector<448x32xf32>
    %7 = vector.extract_strided_slice %0 {offsets = [3, 0, 0], sizes = [28, 16, 32], strides = [1, 1, 1]} : vector<32x16x32xf32> to vector<28x16x32xf32>
    %8 = vector.shape_cast %7 : vector<28x16x32xf32> to vector<448x32xf32>
    %9 = vector.extract_strided_slice %0 {offsets = [4, 0, 0], sizes = [28, 16, 32], strides = [1, 1, 1]} : vector<32x16x32xf32> to vector<28x16x32xf32>
    %10 = vector.shape_cast %9 : vector<28x16x32xf32> to vector<448x32xf32>
    %11 = tpu.concatenate %2, %4, %6, %8, %10 in 1 : vector<448x32xf32>, vector<448x32xf32>, vector<448x32xf32>, vector<448x32xf32>, vector<448x32xf32> -> vector<448x160xf32>
    %12 = arith.truncf %11 : vector<448x160xf32> to vector<448x160xbf16>
    %c0_2 = arith.constant 0 : index
    %c0_3 = arith.constant 0 : index
    %13 = vector.load %arg2[%c0_2, %c0_3] : memref<160x168xbf16, #tpu.memory_space<vmem>>, vector<160x168xbf16>
    %cst = arith.constant dense<0.000000e+00> : vector<448x168xf32>
    %14 = tpu.matmul %12, %13, %cst {dimension_numbers = #tpu.dot_dimension_numbers<[1], [0], [0], [1], [0, 0, 1, 1], [], []>} : vector<448x160xbf16>, vector<160x168xbf16>, vector<448x168xf32> -> vector<448x168xf32>
    %c0_4 = arith.constant 0 : index
    %c0_5 = arith.constant 0 : index
    %15 = vector.load %arg3[%c0_4, %c0_5] : memref<1x168xf32, #tpu.memory_space<vmem>>, vector<1x168xf32>
    %16 = vector.broadcast %15 : vector<1x168xf32> to vector<448x168xf32>
    %17 = arith.addf %14, %16 : vector<448x168xf32>
    %cst_6 = arith.constant 0.000000e+00 : f32
    %18 = vector.broadcast %cst_6 : f32 to vector<448x168xf32>
    %19 = arith.maximumf %17, %18 : vector<448x168xf32>
    %20 = vector.shape_cast %19 : vector<448x168xf32> to vector<14x2x16x168xf32>
    %21 = vector.extract_strided_slice %20 {offsets = [0, 0, 0, 0], sizes = [14, 1, 16, 168], strides = [1, 1, 1, 1]} : vector<14x2x16x168xf32> to vector<14x1x16x168xf32>
    %22 = vector.shape_cast %21 : vector<14x1x16x168xf32> to vector<14x16x168xf32>
    %23 = vector.extract_strided_slice %20 {offsets = [0, 1, 0, 0], sizes = [14, 1, 16, 168], strides = [1, 1, 1, 1]} : vector<14x2x16x168xf32> to vector<14x1x16x168xf32>
    %24 = vector.shape_cast %23 : vector<14x1x16x168xf32> to vector<14x16x168xf32>
    %25 = arith.maximumf %22, %24 : vector<14x16x168xf32>
    %26 = vector.shape_cast %25 : vector<14x16x168xf32> to vector<224x168xf32>
    %27 = vector.extract_strided_slice %26 {offsets = [0, 0], sizes = [224, 162], strides = [1, 1]} : vector<224x168xf32> to vector<224x162xf32>
    %28 = vector.extract_strided_slice %26 {offsets = [0, 6], sizes = [224, 162], strides = [1, 1]} : vector<224x168xf32> to vector<224x162xf32>
    %29 = arith.maximumf %27, %28 : vector<224x162xf32>
    %30 = arith.truncf %29 : vector<224x162xf32> to vector<224x162xbf16>
    %c0_7 = arith.constant 0 : index
    %c0_8 = arith.constant 0 : index
    %31 = vector.load %arg6[%c0_7, %c0_8] : memref<162x84xbf16, #tpu.memory_space<vmem>>, vector<162x84xbf16>
    %cst_9 = arith.constant dense<0.000000e+00> : vector<224x84xf32>
    %32 = tpu.matmul %30, %31, %cst_9 {dimension_numbers = #tpu.dot_dimension_numbers<[1], [0], [0], [1], [0, 0, 1, 1], [], []>} : vector<224x162xbf16>, vector<162x84xbf16>, vector<224x84xf32> -> vector<224x84xf32>
    %33 = vector.shape_cast %32 : vector<224x84xf32> to vector<14x16x84xf32>
    %34 = vector.extract_strided_slice %33 {offsets = [0, 0, 0], sizes = [10, 16, 84], strides = [1, 1, 1]} : vector<14x16x84xf32> to vector<10x16x84xf32>
    %35 = vector.shape_cast %34 : vector<10x16x84xf32> to vector<160x84xf32>
    %36 = vector.extract_strided_slice %33 {offsets = [1, 0, 0], sizes = [10, 16, 84], strides = [1, 1, 1]} : vector<14x16x84xf32> to vector<10x16x84xf32>
    %37 = vector.shape_cast %36 : vector<10x16x84xf32> to vector<160x84xf32>
    %38 = vector.extract_strided_slice %33 {offsets = [2, 0, 0], sizes = [10, 16, 84], strides = [1, 1, 1]} : vector<14x16x84xf32> to vector<10x16x84xf32>
    %39 = vector.shape_cast %38 : vector<10x16x84xf32> to vector<160x84xf32>
    %40 = vector.extract_strided_slice %33 {offsets = [3, 0, 0], sizes = [10, 16, 84], strides = [1, 1, 1]} : vector<14x16x84xf32> to vector<10x16x84xf32>
    %41 = vector.shape_cast %40 : vector<10x16x84xf32> to vector<160x84xf32>
    %42 = vector.extract_strided_slice %33 {offsets = [4, 0, 0], sizes = [10, 16, 84], strides = [1, 1, 1]} : vector<14x16x84xf32> to vector<10x16x84xf32>
    %43 = vector.shape_cast %42 : vector<10x16x84xf32> to vector<160x84xf32>
    %44 = tpu.concatenate %35, %37, %39, %41, %43 in 1 : vector<160x84xf32>, vector<160x84xf32>, vector<160x84xf32>, vector<160x84xf32>, vector<160x84xf32> -> vector<160x420xf32>
    %45 = arith.truncf %44 : vector<160x420xf32> to vector<160x420xbf16>
    %c0_10 = arith.constant 0 : index
    %c0_11 = arith.constant 0 : index
    %46 = vector.load %arg4[%c0_10, %c0_11] : memref<420x160xbf16, #tpu.memory_space<vmem>>, vector<420x160xbf16>
    %cst_12 = arith.constant dense<0.000000e+00> : vector<160x160xf32>
    %47 = tpu.matmul %45, %46, %cst_12 {dimension_numbers = #tpu.dot_dimension_numbers<[1], [0], [0], [1], [0, 0, 1, 1], [], []>} : vector<160x420xbf16>, vector<420x160xbf16>, vector<160x160xf32> -> vector<160x160xf32>
    %c0_13 = arith.constant 0 : index
    %c0_14 = arith.constant 0 : index
    %48 = vector.load %arg5[%c0_13, %c0_14] : memref<1x160xf32, #tpu.memory_space<vmem>>, vector<1x160xf32>
    %49 = vector.broadcast %48 : vector<1x160xf32> to vector<160x160xf32>
    %50 = arith.addf %47, %49 : vector<160x160xf32>
    %cst_15 = arith.constant 0.000000e+00 : f32
    %51 = vector.broadcast %cst_15 : f32 to vector<160x160xf32>
    %52 = arith.maximumf %50, %51 : vector<160x160xf32>
    %53 = vector.shape_cast %52 : vector<160x160xf32> to vector<5x2x16x160xf32>
    %54 = vector.extract_strided_slice %53 {offsets = [0, 0, 0, 0], sizes = [5, 1, 16, 160], strides = [1, 1, 1, 1]} : vector<5x2x16x160xf32> to vector<5x1x16x160xf32>
    %55 = vector.shape_cast %54 : vector<5x1x16x160xf32> to vector<5x16x160xf32>
    %56 = vector.extract_strided_slice %53 {offsets = [0, 1, 0, 0], sizes = [5, 1, 16, 160], strides = [1, 1, 1, 1]} : vector<5x2x16x160xf32> to vector<5x1x16x160xf32>
    %57 = vector.shape_cast %56 : vector<5x1x16x160xf32> to vector<5x16x160xf32>
    %58 = arith.maximumf %55, %57 : vector<5x16x160xf32>
    %59 = vector.shape_cast %58 : vector<5x16x160xf32> to vector<80x160xf32>
    %60 = vector.extract_strided_slice %59 {offsets = [0, 0], sizes = [80, 144], strides = [1, 1]} : vector<80x160xf32> to vector<80x144xf32>
    %61 = vector.extract_strided_slice %59 {offsets = [0, 16], sizes = [80, 144], strides = [1, 1]} : vector<80x160xf32> to vector<80x144xf32>
    %62 = arith.maximumf %60, %61 : vector<80x144xf32>
    %63 = arith.truncf %62 : vector<80x144xf32> to vector<80x144xbf16>
    %c0_16 = arith.constant 0 : index
    %c0_17 = arith.constant 0 : index
    %64 = vector.load %arg7[%c0_16, %c0_17] : memref<144x80xbf16, #tpu.memory_space<vmem>>, vector<144x80xbf16>
    %cst_18 = arith.constant dense<0.000000e+00> : vector<80x80xf32>
    %65 = tpu.matmul %63, %64, %cst_18 {dimension_numbers = #tpu.dot_dimension_numbers<[1], [0], [0], [1], [0, 0, 1, 1], [], []>} : vector<80x144xbf16>, vector<144x80xbf16>, vector<80x80xf32> -> vector<80x80xf32>
    %66 = vector.shape_cast %65 : vector<80x80xf32> to vector<5x16x80xf32>
    %67 = vector.extract_strided_slice %66 {offsets = [0, 0, 0], sizes = [1, 16, 80], strides = [1, 1, 1]} : vector<5x16x80xf32> to vector<1x16x80xf32>
    %68 = vector.shape_cast %67 : vector<1x16x80xf32> to vector<16x80xf32>
    %69 = vector.extract_strided_slice %66 {offsets = [1, 0, 0], sizes = [1, 16, 80], strides = [1, 1, 1]} : vector<5x16x80xf32> to vector<1x16x80xf32>
    %70 = vector.shape_cast %69 : vector<1x16x80xf32> to vector<16x80xf32>
    %71 = vector.extract_strided_slice %66 {offsets = [2, 0, 0], sizes = [1, 16, 80], strides = [1, 1, 1]} : vector<5x16x80xf32> to vector<1x16x80xf32>
    %72 = vector.shape_cast %71 : vector<1x16x80xf32> to vector<16x80xf32>
    %73 = vector.extract_strided_slice %66 {offsets = [3, 0, 0], sizes = [1, 16, 80], strides = [1, 1, 1]} : vector<5x16x80xf32> to vector<1x16x80xf32>
    %74 = vector.shape_cast %73 : vector<1x16x80xf32> to vector<16x80xf32>
    %75 = vector.extract_strided_slice %66 {offsets = [4, 0, 0], sizes = [1, 16, 80], strides = [1, 1, 1]} : vector<5x16x80xf32> to vector<1x16x80xf32>
    %76 = vector.shape_cast %75 : vector<1x16x80xf32> to vector<16x80xf32>
    %77 = tpu.concatenate %68, %70, %72, %74, %76 in 1 : vector<16x80xf32>, vector<16x80xf32>, vector<16x80xf32>, vector<16x80xf32>, vector<16x80xf32> -> vector<16x400xf32>
    %78 = arith.truncf %77 : vector<16x400xf32> to vector<16x400xbf16>
    %c0_19 = arith.constant 0 : index
    %c0_20 = arith.constant 0 : index
    %79 = vector.load %arg8[%c0_19, %c0_20] : memref<400x120xbf16, #tpu.memory_space<vmem>>, vector<400x120xbf16>
    %cst_21 = arith.constant dense<0.000000e+00> : vector<16x120xf32>
    %80 = tpu.matmul %78, %79, %cst_21 {dimension_numbers = #tpu.dot_dimension_numbers<[1], [0], [0], [1], [0, 0, 1, 1], [], []>} : vector<16x400xbf16>, vector<400x120xbf16>, vector<16x120xf32> -> vector<16x120xf32>
    %c0_22 = arith.constant 0 : index
    %c0_23 = arith.constant 0 : index
    %81 = vector.load %arg9[%c0_22, %c0_23] : memref<1x120xf32, #tpu.memory_space<vmem>>, vector<1x120xf32>
    %82 = vector.broadcast %81 : vector<1x120xf32> to vector<16x120xf32>
    %83 = arith.addf %80, %82 : vector<16x120xf32>
    %cst_24 = arith.constant 0.000000e+00 : f32
    %84 = vector.broadcast %cst_24 : f32 to vector<16x120xf32>
    %85 = arith.maximumf %83, %84 : vector<16x120xf32>
    %86 = arith.truncf %85 : vector<16x120xf32> to vector<16x120xbf16>
    %c0_25 = arith.constant 0 : index
    %c0_26 = arith.constant 0 : index
    %87 = vector.load %arg10[%c0_25, %c0_26] : memref<120x84xbf16, #tpu.memory_space<vmem>>, vector<120x84xbf16>
    %cst_27 = arith.constant dense<0.000000e+00> : vector<16x84xf32>
    %88 = tpu.matmul %86, %87, %cst_27 {dimension_numbers = #tpu.dot_dimension_numbers<[1], [0], [0], [1], [0, 0, 1, 1], [], []>} : vector<16x120xbf16>, vector<120x84xbf16>, vector<16x84xf32> -> vector<16x84xf32>
    %c0_28 = arith.constant 0 : index
    %c0_29 = arith.constant 0 : index
    %89 = vector.load %arg11[%c0_28, %c0_29] : memref<1x84xf32, #tpu.memory_space<vmem>>, vector<1x84xf32>
    %90 = vector.broadcast %89 : vector<1x84xf32> to vector<16x84xf32>
    %91 = arith.addf %88, %90 : vector<16x84xf32>
    %cst_30 = arith.constant 0.000000e+00 : f32
    %92 = vector.broadcast %cst_30 : f32 to vector<16x84xf32>
    %93 = arith.maximumf %91, %92 : vector<16x84xf32>
    %94 = arith.truncf %93 : vector<16x84xf32> to vector<16x84xbf16>
    %c0_31 = arith.constant 0 : index
    %c0_32 = arith.constant 0 : index
    %95 = vector.load %arg12[%c0_31, %c0_32] : memref<84x128xbf16, #tpu.memory_space<vmem>>, vector<84x128xbf16>
    %cst_33 = arith.constant dense<0.000000e+00> : vector<16x128xf32>
    %96 = tpu.matmul %94, %95, %cst_33 {dimension_numbers = #tpu.dot_dimension_numbers<[1], [0], [0], [1], [0, 0, 1, 1], [], []>} : vector<16x84xbf16>, vector<84x128xbf16>, vector<16x128xf32> -> vector<16x128xf32>
    %c0_34 = arith.constant 0 : index
    %c0_35 = arith.constant 0 : index
    %97 = vector.load %arg13[%c0_34, %c0_35] : memref<1x128xf32, #tpu.memory_space<vmem>>, vector<1x128xf32>
    %98 = vector.broadcast %97 : vector<1x128xf32> to vector<16x128xf32>
    %99 = arith.addf %96, %98 : vector<16x128xf32>
    %c0_36 = arith.constant 0 : index
    %c0_37 = arith.constant 0 : index
    %100 = vector.load %arg14[%c0_36, %c0_37] : memref<16x128xf32, #tpu.memory_space<vmem>>, vector<16x128xf32>
    tpu.vector_store %arg14[%c0_36, %c0_37], %99 {strides = array<i32>} : memref<16x128xf32, #tpu.memory_space<vmem>>, vector<16x128xf32>,
    return
  }
  func.func @transform_0(%arg0: i32) -> (i32, i32, i32) {
    %c0_i32 = arith.constant 0 : i32
    %c0_i32_0 = arith.constant 0 : i32
    %c0_i32_1 = arith.constant 0 : i32
    return %c0_i32, %arg0, %c0_i32_0 : i32, i32, i32
  }
  func.func @transform_1(%arg0: i32) -> (i32, i32) {
    %c0_i32 = arith.constant 0 : i32
    %c0_i32_0 = arith.constant 0 : i32
    %c0_i32_1 = arith.constant 0 : i32
    return %c0_i32, %c0_i32_0 : i32, i32
  }
  func.func @transform_2(%arg0: i32) -> (i32, i32) {
    %c0_i32 = arith.constant 0 : i32
    %c0_i32_0 = arith.constant 0 : i32
    %c0_i32_1 = arith.constant 0 : i32
    return %c0_i32, %c0_i32_0 : i32, i32
  }
  func.func @transform_3(%arg0: i32) -> (i32, i32) {
    %c0_i32 = arith.constant 0 : i32
    %c0_i32_0 = arith.constant 0 : i32
    %c0_i32_1 = arith.constant 0 : i32
    return %c0_i32, %c0_i32_0 : i32, i32
  }
  func.func @transform_4(%arg0: i32) -> (i32, i32) {
    %c0_i32 = arith.constant 0 : i32
    %c0_i32_0 = arith.constant 0 : i32
    %c0_i32_1 = arith.constant 0 : i32
    return %c0_i32, %c0_i32_0 : i32, i32
  }
  func.func @transform_5(%arg0: i32) -> (i32, i32) {
    %c0_i32 = arith.constant 0 : i32
    %c0_i32_0 = arith.constant 0 : i32
    %c0_i32_1 = arith.constant 0 : i32
    return %c0_i32, %c0_i32_0 : i32, i32
  }
  func.func @transform_6(%arg0: i32) -> (i32, i32) {
    %c0_i32 = arith.constant 0 : i32
    %c0_i32_0 = arith.constant 0 : i32
    %c0_i32_1 = arith.constant 0 : i32
    return %c0_i32, %c0_i32_0 : i32, i32
  }
  func.func @transform_7(%arg0: i32) -> (i32, i32) {
    %c0_i32 = arith.constant 0 : i32
    %c0_i32_0 = arith.constant 0 : i32
    %c0_i32_1 = arith.constant 0 : i32
    return %c0_i32, %c0_i32_0 : i32, i32
  }
  func.func @transform_8(%arg0: i32) -> (i32, i32) {
    %c0_i32 = arith.constant 0 : i32
    %c0_i32_0 = arith.constant 0 : i32
    %c0_i32_1 = arith.constant 0 : i32
    return %c0_i32, %c0_i32_0 : i32, i32
  }
  func.func @transform_9(%arg0: i32) -> (i32, i32) {
    %c0_i32 = arith.constant 0 : i32
    %c0_i32_0 = arith.constant 0 : i32
    %c0_i32_1 = arith.constant 0 : i32
    return %c0_i32, %c0_i32_0 : i32, i32
  }
  func.func @transform_10(%arg0: i32) -> (i32, i32) {
    %c0_i32 = arith.constant 0 : i32
    %c0_i32_0 = arith.constant 0 : i32
    %c0_i32_1 = arith.constant 0 : i32
    return %c0_i32, %c0_i32_0 : i32, i32
  }
  func.func @transform_11(%arg0: i32) -> (i32, i32) {
    %c0_i32 = arith.constant 0 : i32
    %c0_i32_0 = arith.constant 0 : i32
    %c0_i32_1 = arith.constant 0 : i32
    return %c0_i32, %c0_i32_0 : i32, i32
  }
  func.func @transform_12(%arg0: i32) -> (i32, i32) {
    %c0_i32 = arith.constant 0 : i32
    %c0_i32_0 = arith.constant 0 : i32
    %c0_i32_1 = arith.constant 0 : i32
    return %c0_i32, %c0_i32_0 : i32, i32
  }
  func.func @transform_13(%arg0: i32) -> (i32, i32) {
    %c0_i32 = arith.constant 0 : i32
    %c0_i32_0 = arith.constant 0 : i32
    return %arg0, %c0_i32 : i32, i32
  }
}

</mosaic_0001>

<bundles_post_ra>
// kernel: cnn_forward.1
= control target key start
LH: loop header
LB: loop body
LE: loop exit
PB: predicated region body
PF: predicated region fallthrough
CT: control target
= control target key end

     0   :  { %s5552_s20 = smov 32   ;;  %s5553_s21 = smov 96   ;;  %vm674_vm0 = vcmask 261120   ;;  %s7942_s0 = inlined_call_operand.vmem [shape: f32[32,16,32], index: 0, kind: input, shape index: {}]   ;;  %s7943_s1 = inlined_call_operand.vmem [shape: bf16[160,168], index: 1, kind: input, shape index: {}]   ;;  %s7944_s2 = inlined_call_operand.vmem [shape: f32[1,168], index: 2, kind: input, shape index: {}]   ;;  %s7945_s3 = inlined_call_operand.vmem [shape: bf16[420,160], index: 3, kind: input, shape index: {}]   ;;  %s7946_s4 = inlined_call_operand.vmem [shape: f32[1,160], index: 4, kind: input, shape index: {}]   ;;  %s7947_s5 = inlined_call_operand.vmem [shape: bf16[162,84], index: 5, kind: input, shape index: {}]   ;;  %s7948_s6 = inlined_call_operand.vmem [shape: bf16[144,80], index: 6, kind: input, shape index: {}]   ;;  %s7949_s7 = inlined_call_operand.vmem [shape: bf16[400,120], index: 7, kind: input, shape index: {}]   ;;  %s7950_s8 = inlined_call_operand.vmem [shape: f32[1,120], index: 8, kind: input, shape index: {}]   ;;  %s7951_s9 = inlined_call_operand.vmem [shape: bf16[120,84], index: 9, kind: input, shape index: {}]   ;;  %s7952_s10 = inlined_call_operand.vmem [shape: f32[1,84], index: 10, kind: input, shape index: {}]   ;;  %s7953_s11 = inlined_call_operand.vmem [shape: bf16[84,128], index: 11, kind: input, shape index: {}]   ;;  %s7954_s12 = inlined_call_operand.vmem [shape: f32[1,128], index: 12, kind: input, shape index: {}]   ;;  %s7955_s13 = inlined_call_operand.hbm [shape: f32[16,128], index: 13, kind: output, shape index: {}]  }
   0x1   :  { %v5640_v0 = vld [vmem:[%s7942_s0 + $0x10] sm:$0xff]  ;;  %v5645_v1 = vld [vmem:[%s7942_s0 + $0x18] sm:$0xff]  ;;  %v5662_v5 = vld [vmem:[%s7942_s0 + $0x20] sm:$0xff]  ;;  %s5554_s26 = smov 64  }
   0x2   :  { %v5650_v2 = vld [vmem:[%s7942_s0 + $0x30] sm:$0xff]  ;;  %v4517_v3 = vpack.i.bf16 %v5645_v1, %v5640_v0  ;;  %v5657_v4 = vld [vmem:[%s7942_s0 + $0x38] sm:$0xff]  ;;  %v5667_v6 = vld [vmem:[%s7942_s0 + $0x28] sm:$0xff] }
   0x3   :  { %v4527_v7 = vpack.i.bf16 %v5657_v4, %v5650_v2  ;;  %v4522_v8 = vpack.i.bf16 %v5667_v6, %v5662_v5  ;;  %v5678_v9 = vld [vmem:[%s7942_s0 + $0x40] sm:$0xff]  ;;  %v5683_v10 = vld [vmem:[%s7942_s0 + $0x48] sm:$0xff]  ;;  %v5350_v14 = vld [vmem:[%s7943_s1 + $0x14] ss:$8 sps:$4 sm:$0xff]  }
   0x4   :  { %4518 = vrot.lane.b32.xlu0 %v4517_v3, %s5552_s20  ;;  %v4542_v11 = vpack.i.bf16 %v5683_v10, %v5678_v9  ;;  %v5347_v12 = vld [vmem:[%s7943_s1 + $0x4] ss:$8 sps:$4 sm:$0xff]   ;;  %v5349_v13 = vld [vmem:[%s7943_s1] ss:$8 sps:$4 sm:$0xff]   ;;  %v846_v15 = vpack.c.bf16 %v5683_v10, %v5678_v9  ;;  %v5704_v16 = vld [vmem:[%s7942_s0 + $0x50] sm:$0xff] }
   0x5   :  { %4528 = vrot.lane.b32.xlu1 %v4527_v7, %s5553_s21  ;;  %v5709_v17 = vld [vmem:[%s7942_s0 + $0x58] sm:$0xff]  ;;  %1117 = vmatprep.subr.bf16.mxu0 %v5347_v12  ;;  %v5353_v19 = vld [vmem:[%s7943_s1 + $0x24] ss:$8 sps:$4 sm:$0xff]   ;;  %v5355_v22 = vld [vmem:[%s7943_s1 + $0x20] ss:$8 sps:$4 sm:$0xff]  }
   0x6   :  { %1118 = vmatpush1.bf16.msra.mxu0 %v5349_v13  ;;  %v5352_v18 = vld [vmem:[%s7943_s1 + $0x10] ss:$8 sps:$4 sm:$0xff]   ;;  %4171 = vmatprep.mubr.msk.bf16.mxu0 %vm674_vm0, %v846_v15  ;;  %v4557_v20 = vpack.i.bf16 %v5709_v17, %v5704_v16  ;;  %v5726_v21 = vld [vmem:[%s7942_s0 + $0x60] sm:$0xff]  ;;  %v5734_v23 = vld [vmem:[%s7942_s0 + $0x68] sm:$0xff] }
   0x7   :  { %1119 = vmatprep.subr.bf16.mxu0 %v5350_v14  ;;  %v5356_v24 = vld [vmem:[%s7943_s1 + $0x34] ss:$8 sps:$4 sm:$0xff]   ;;  %v4572_v25 = vpack.i.bf16 %v5734_v23, %v5726_v21  ;;  %v5358_v26 = vld [vmem:[%s7943_s1 + $0x30] ss:$8 sps:$4 sm:$0xff]   ;;  %v5359_v27 = vld [vmem:[%s7943_s1 + $0x44] ss:$8 sps:$4 sm:$0xff]  }
   0x8   :  { %4523 = vrot.lane.b32.xlu0 %v4522_v8, %s5554_s26  ;;  %v5753_v28 = vld [vmem:[%s7942_s0 + $0x70] sm:$0xff]  ;;  %v5758_v29 = vld [vmem:[%s7942_s0 + $0x78] sm:$0xff]  ;;  %v5361_v30 = vld [vmem:[%s7943_s1 + $0x40] ss:$8 sps:$4 sm:$0xff]  }
   0x9   :  { %4533 = vrot.lane.b32.xlu1 %v4522_v8, %s5552_s20  ;;  %v5362_v31 = vld [vmem:[%s7943_s1 + $0x54] ss:$8 sps:$4 sm:$0xff]   ;;  %v4587_v32 = vpack.i.bf16 %v5758_v29, %v5753_v28  ;;  %v5773_v33 = vld [vmem:[%s7942_s0 + $0x80] sm:$0xff]  ;;  %v5778_v34 = vld [vmem:[%s7942_s0 + $0x88] sm:$0xff] }
   0xa   :  { %1120 = vmatpush1.bf16.msra.mxu0 %v5352_v18  ;;  %v5364_v35 = vld [vmem:[%s7943_s1 + $0x50] ss:$8 sps:$4 sm:$0xff]   ;;  %v5365_v36 = vld [vmem:[%s7943_s1 + $0x64] ss:$8 sps:$4 sm:$0xff]   ;;  %v4602_v37 = vpack.i.bf16 %v5778_v34, %v5773_v33  ;;  %v5367_v38 = vld [vmem:[%s7943_s1 + $0x60] ss:$8 sps:$4 sm:$0xff]  }
   0xb   :  { %1121 = vmatprep.subr.bf16.mxu0 %v5353_v19  ;;  %v5368_v39 = vld [vmem:[%s7943_s1 + $0x74] ss:$8 sps:$4 sm:$0xff]   ;;  %v5370_v42 = vld [vmem:[%s7943_s1 + $0x70] ss:$8 sps:$4 sm:$0xff]   ;;  %v5371_v43 = vld [vmem:[%s7943_s1 + $0x84] ss:$8 sps:$4 sm:$0xff]  }
   0xc   :  { %4538 = vrot.lane.b32.xlu0 %v4527_v7, %s5554_s26  ;;  %v5800_v40 = vld [vmem:[%s7942_s0 + $0x90] sm:$0xff]  ;;  %v5805_v41 = vld [vmem:[%s7942_s0 + $0x98] sm:$0xff]  ;;  %v5821_v45 = vld [vmem:[%s7942_s0 + $0xa0] sm:$0xff] }
   0xd   :  { %4543 = vrot.lane.b32.xlu1 %v4542_v11, %s5553_s21  ;;  %v4617_v44 = vpack.i.bf16 %v5805_v41, %v5800_v40  ;;  %v5826_v46 = vld [vmem:[%s7942_s0 + $0xa8] sm:$0xff]  ;;  %v5374_v48 = vld [vmem:[%s7943_s1 + $0x94] ss:$8 sps:$4 sm:$0xff]   ;;  %v5376_v49 = vld [vmem:[%s7943_s1 + $0x90] ss:$8 sps:$4 sm:$0xff]  }
   0xe   :  { %1122 = vmatpush1.bf16.msra.mxu0 %v5355_v22  ;;  %v5373_v47 = vld [vmem:[%s7943_s1 + $0x80] ss:$8 sps:$4 sm:$0xff]   ;;  %v4632_v50 = vpack.i.bf16 %v5826_v46, %v5821_v45  ;;  %v5847_v51 = vld [vmem:[%s7942_s0 + $0xb0] sm:$0xff]  ;;  %v5852_v52 = vld [vmem:[%s7942_s0 + $0xb8] sm:$0xff] }
   0xf   :  { %1123 = vmatprep.subr.bf16.mxu0 %v5356_v24  ;;  %v4647_v53 = vpack.i.bf16 %v5852_v52, %v5847_v51  ;;  %v5860_v54 = vld [vmem:[%s7942_s0 + $0xc0] sm:$0xff]  ;;  %v5865_v55 = vld [vmem:[%s7942_s0 + $0xc8] sm:$0xff]  ;;  %v5875_v57 = vld [vmem:[%s7942_s0 + $0xd0] sm:$0xff] }
  0x10   :  { %4548 = vrot.lane.b32.xlu0 %v4527_v7, %s5552_s20  ;;  %v4662_v56 = vpack.i.bf16 %v5865_v55, %v5860_v54  ;;  %v5880_v58 = vld [vmem:[%s7942_s0 + $0xd8] sm:$0xff]  ;;  %v5891_v60 = vld [vmem:[%s7942_s0 + $0xe0] sm:$0xff]  ;;  %v5896_v61 = vld [vmem:[%s7942_s0 + $0xe8] sm:$0xff] }
  0x11   :  { %4553 = vrot.lane.b32.xlu1 %v4542_v11, %s5554_s26  ;;  %v4677_v59 = vpack.i.bf16 %v5880_v58, %v5875_v57  ;;  %v4692_v62 = vpack.i.bf16 %v5896_v61, %v5891_v60  ;;  %v5907_v63 = vld [vmem:[%s7942_s0 + $0xf0] sm:$0xff]  ;;  %v5912_v3 = vld [vmem:[%s7942_s0 + $0xf8] sm:$0xff]  ;;  %v5920_v8 = vld [vmem:[%s7942_s0 + $0x100] sm:$0xff] }
  0x12   :  { %1124 = vmatpush1.bf16.msra.mxu0 %v5358_v26  ;;  %v4707_v7 = vpack.i.bf16 %v5912_v3, %v5907_v63  ;;  %v5935_v13 = vld [vmem:[%s7942_s0 + $0x110] sm:$0xff]  ;;  %v5940_v14 = vld [vmem:[%s7942_s0 + $0x118] sm:$0xff]  ;;  %v5950_v18 = vld [vmem:[%s7942_s0 + $0x120] sm:$0xff] }
  0x13   :  { %1125 = vmatprep.subr.bf16.mxu0 %v5359_v27  ;;  %v4737_v15 = vpack.i.bf16 %v5940_v14, %v5935_v13  ;;  %v5955_v19 = vld [vmem:[%s7942_s0 + $0x128] sm:$0xff] }
  0x14   :  { %4558 = vrot.lane.b32.xlu0 %v4557_v20, %s5553_s21  ;;  %v5966_v22 = vld [vmem:[%s7942_s0 + $0x1e8] sm:$0xff] }
  0x15   :  { %4563 = vrot.lane.b32.xlu1 %v4542_v11, %s5552_s20  ;;  %v5925_v11 = vld [vmem:[%s7942_s0 + $0x108] sm:$0xff] }
  0x16   :  { %1126 = vmatpush1.bf16.msra.mxu0 %v5361_v30  ;;  %v4722_v12 = vpack.i.bf16 %v5925_v11, %v5920_v8 }
  0x17   :  { %1127 = vmatprep.subr.bf16.mxu0 %v5362_v31 }
  0x18   :  { %4568 = vrot.lane.b32.xlu0 %v4557_v20, %s5554_s26 }
  0x19   :  { %4573 = vrot.lane.b32.xlu1 %v4572_v25, %s5553_s21 }
  0x1a   :  { %1128 = vmatpush1.bf16.msra.mxu0 %v5364_v35 }
  0x1b   :  { %1129 = vmatprep.subr.bf16.mxu0 %v5365_v36 }
  0x1c   :  { %4578 = vrot.lane.b32.xlu0 %v4557_v20, %s5552_s20  ;;  %v5961_v20 = vld [vmem:[%s7942_s0 + $0x1e0] sm:$0xff] }
  0x1d   :  { %4583 = vrot.lane.b32.xlu1 %v4572_v25, %s5554_s26 }
  0x1e   :  { %1130 = vmatpush1.bf16.msra.mxu0 %v5367_v38 }
  0x1f   :  { %1131 = vmatprep.subr.bf16.mxu0 %v5368_v39 }
  0x20   :  { %4588 = vrot.lane.b32.xlu0 %v4587_v32, %s5553_s21 }
  0x21   :  { %4593 = vrot.lane.b32.xlu1 %v4572_v25, %s5552_s20 }
  0x22   :  { %1132 = vmatpush1.bf16.msra.mxu0 %v5370_v42 }
  0x23   :  { %1133 = vmatprep.subr.bf16.mxu0 %v5371_v43 }
  0x24   :  { %4598 = vrot.lane.b32.xlu0 %v4587_v32, %s5554_s26 }
  0x25   :  { %4603 = vrot.lane.b32.xlu1 %v4602_v37, %s5553_s21 }
  0x26   :  { %1134 = vmatpush1.bf16.msra.mxu0 %v5373_v47 }
  0x27   :  { %1135 = vmatprep.subr.bf16.mxu0 %v5374_v48 }
  0x28   :  { %4608 = vrot.lane.b32.xlu0 %v4587_v32, %s5552_s20 }
  0x29   :  { %4613 = vrot.lane.b32.xlu1 %v4602_v37, %s5554_s26 }
  0x2a   :  { %1136 = vmatpush1.bf16.msra.mxu0 %v5376_v49 }
  0x2c   :  { %4618 = vrot.lane.b32.xlu0 %v4617_v44, %s5553_s21 }
  0x2d   :  { %4623 = vrot.lane.b32.xlu1 %v4602_v37, %s5552_s20 }
  0x30   :  { %4628 = vrot.lane.b32.xlu0 %v4617_v44, %s5554_s26 }
  0x31   :  { %4633 = vrot.lane.b32.xlu1 %v4632_v50, %s5553_s21 }
  0x34   :  { %4638 = vrot.lane.b32.xlu0 %v4617_v44, %s5552_s20 }
  0x35   :  { %4643 = vrot.lane.b32.xlu1 %v4632_v50, %s5554_s26 }
  0x38   :  { %4648 = vrot.lane.b32.xlu0 %v4647_v53, %s5553_s21 }
  0x39   :  { %4653 = vrot.lane.b32.xlu1 %v4632_v50, %s5552_s20 }
  0x3c   :  { %4658 = vrot.lane.b32.xlu0 %v4647_v53, %s5554_s26 }
  0x3d   :  { %4663 = vrot.lane.b32.xlu1 %v4662_v56, %s5553_s21 }
  0x40   :  { %4668 = vrot.lane.b32.xlu0 %v4647_v53, %s5552_s20 }
  0x41   :  { %4673 = vrot.lane.b32.xlu1 %v4662_v56, %s5554_s26 }
  0x44   :  { %4678 = vrot.lane.b32.xlu0 %v4677_v59, %s5553_s21 }
  0x45   :  { %4683 = vrot.lane.b32.xlu1 %v4662_v56, %s5552_s20 }
  0x48   :  { %4688 = vrot.lane.b32.xlu0 %v4677_v59, %s5554_s26 }
  0x49   :  { %4693 = vrot.lane.b32.xlu1 %v4692_v62, %s5553_s21 }
  0x4c   :  { %4698 = vrot.lane.b32.xlu0 %v4677_v59, %s5552_s20 }
  0x4d   :  { %4703 = vrot.lane.b32.xlu1 %v4692_v62, %s5554_s26 }
  0x50   :  { %4708 = vrot.lane.b32.xlu0 %v4707_v7, %s5553_s21 }
  0x51   :  { %4713 = vrot.lane.b32.xlu1 %v4692_v62, %s5552_s20 }
  0x54   :  { %4718 = vrot.lane.b32.xlu0 %v4707_v7, %s5554_s26 }
  0x55   :  { %4723 = vrot.lane.b32.xlu1 %v4722_v12, %s5553_s21 }
  0x58   :  { %4728 = vrot.lane.b32.xlu0 %v4707_v7, %s5552_s20 }
  0x59   :  { %4733 = vrot.lane.b32.xlu1 %v4722_v12, %s5554_s26 }
  0x5a   :  { %18 = vsyncpa [#allocation3], 0  ;;  %v4752_v25 = vpack.i.bf16 %v5955_v19, %v5950_v18  ;;  %v5979_v26 = vld [vmem:[%s7942_s0 + $0x130] sm:$0xff]  ;;  %v5984_v27 = vld [vmem:[%s7942_s0 + $0x138] sm:$0xff]  ;;  %vm731_vm1 = vcmask 523264   ;;  %vm788_vm2 = vcmask 785408  }
  0x5b   :  { %v4767_v30 = vpack.i.bf16 %v5984_v27, %v5979_v26  ;;  %v5993_v31 = vld [vmem:[%s7942_s0 + $0x140] sm:$0xff]  ;;  %v5998_v32 = vld [vmem:[%s7942_s0 + $0x148] sm:$0xff]  ;;  %v6009_v36 = vld [vmem:[%s7942_s0 + $0x150] sm:$0xff]  ;;  %vm2062_vm3 = vcmask 1040384   ;;  %vm1766_vm4 = vcmask 998400   ;;  %vm2019_vm5 = vcmask 277504  }
  0x5c   :  { %4738 = vrot.lane.b32.xlu0 %v4737_v15, %s5553_s21  ;;  %v4782_v35 = vpack.i.bf16 %v5998_v32, %v5993_v31  ;;  %v6014_v37 = vld [vmem:[%s7942_s0 + $0x158] sm:$0xff]  ;;  %v6023_v39 = vld [vmem:[%s7942_s0 + $0x160] sm:$0xff]  ;;  %v6028_v42 = vld [vmem:[%s7942_s0 + $0x168] sm:$0xff]  ;;  %s5557_s18 = smov 84   ;;  %s5558_s16 = smov 40   ;;  %vm2477_vm6 = vcmask 687104  }
  0x5d   :  { %4743 = vrot.lane.b32.xlu1 %v4722_v12, %s5552_s20  ;;  %7964 = vst [vmem:[#allocation5_spill] sm:$0xff] %v6014_v37  ;;  %v4797_v38 = vpack.i.bf16 %v6014_v37, %v6009_v36  ;;  %7965 = vst [vmem:[#allocation6_spill] sm:$0xff] %v6023_v39  ;;  %v4812_v43 = vpack.i.bf16 %v6028_v42, %v6023_v39  ;;  %v6038_v50 = vld [vmem:[%s7942_s0 + $0x170] sm:$0xff]  ;;  %v6043_v53 = vld [vmem:[%s7942_s0 + $0x178] sm:$0xff]  ;;  %s5559_s24 = smov 124   ;;  %vm2498_vm7 = vcmask 326656  }
  0x5e   :  { %7966 = vst [vmem:[#allocation7_spill] sm:$0xff] %v6028_v42  ;;  %7967 = vst [vmem:[#allocation8_spill] sm:$0xff] %v6043_v53  ;;  %v46_v56 = vld [vmem:[%s7942_s0] sm:$0xff]  ;;  %v47_v59 = vld [vmem:[%s7942_s0 + $0x8] sm:$0xff]  ;;  %vm2519_vm8 = vcmask 1014784   ;;  %vm2962_vm9 = vcmask 1041408  }
  0x5f   :  { %vm2931_vm10 = vcmask 293888   ;;  %vm2540_vm11 = vcmask 654336   ;;  %vm3355_vm12 = vcmask 916480   ;;  %vm3488_vm13 = vcmask 130048   ;;  %s5564_s23 = smov [#allocation2]  }
  0x60   :  { %4748 = vrot.lane.b32.xlu0 %v4737_v15, %s5554_s26  ;;  %vm3987_vm14 = vcmask 1043456   ;;  %vm5563_vm15 = vmmov 0  }
  0x61   :  { %4753 = vrot.lane.b32.xlu1 %v4752_v25, %s5553_s21 }
  0x64   :  { %4758 = vrot.lane.b32.xlu0 %v4737_v15, %s5552_s20 }
  0x65   :  { %4763 = vrot.lane.b32.xlu1 %v4752_v25, %s5554_s26 }
  0x68   :  { %4768 = vrot.lane.b32.xlu0 %v4767_v30, %s5553_s21 }
  0x69   :  { %4773 = vrot.lane.b32.xlu1 %v4752_v25, %s5552_s20 }
  0x6c   :  { %4778 = vrot.lane.b32.xlu0 %v4767_v30, %s5554_s26 }
  0x6d   :  { %4783 = vrot.lane.b32.xlu1 %v4782_v35, %s5553_s21 }
  0x70   :  { %4788 = vrot.lane.b32.xlu0 %v4767_v30, %s5552_s20 }
  0x71   :  { %4793 = vrot.lane.b32.xlu1 %v4782_v35, %s5554_s26 }
  0x74   :  { %4798 = vrot.lane.b32.xlu0 %v4797_v38, %s5553_s21 }
  0x75   :  { %4803 = vrot.lane.b32.xlu1 %v4782_v35, %s5552_s20  ;;  %v4827_v35 = vpack.i.bf16 %v6043_v53, %v6038_v50 }
  0x76   :  { %v4519_v44 = vpop.permute.xlu0 %4518 }
  0x77   :  { %v4529_v47 = vpop.permute.xlu1 %4528  ;;  %v4521_v48 = vunpack.i.h.bf16 %v4519_v44  ;;  %v4520_v49 = vunpack.i.l.bf16 %v4519_v44 }
  0x78   :  { %4808 = vrot.lane.b32.xlu0 %v4797_v38, %s5554_s26  ;;  %v4531_v62 = vunpack.i.h.bf16 %v4529_v47  ;;  %v4530_v7 = vunpack.i.l.bf16 %v4529_v47 }
  0x79   :  { %4813 = vrot.lane.b32.xlu1 %v4812_v43, %s5553_s21  ;;  %v675_v44 = vsel %vm674_vm0, %v46_v56, %v4520_v49  ;;  %v676_v24 = vsel %vm674_vm0, %v47_v59, %v4521_v48 }
  0x7a   :  { %v4524_v12 = vpop.permute.xlu0 %4523 }
  0x7b   :  { %v4526_v15 = vunpack.i.h.bf16 %v4524_v12  ;;  %v4525_v25 = vunpack.i.l.bf16 %v4524_v12  ;;  %v4534_v30 = vpop.permute.xlu1 %4533  ;;  %v848_v12 = vpack.c.bf16 %v5709_v17, %v5704_v16  ;;  %v6076_v16 = vld [vmem:[%s7942_s0 + $0x188] sm:$0xff] }
  0x7c   :  { %v4536_v42 = vunpack.i.h.bf16 %v4534_v30  ;;  %v4535_v39 = vunpack.i.l.bf16 %v4534_v30  ;;  %4818 = vrot.lane.b32.xlu0 %v4797_v38, %s5552_s20 }
  0x7d   :  { %v732_v37 = vsel %vm731_vm1, %v675_v44, %v4525_v25  ;;  %v733_v47 = vsel %vm731_vm1, %v676_v24, %v4526_v15  ;;  %4823 = vrot.lane.b32.xlu1 %v4812_v43, %s5554_s26  ;;  %v6071_v24 = vld [vmem:[%s7942_s0 + $0x180] sm:$0xff] }
  0x7e   :  { %v677_v53 = vsel %vm674_vm0, %v5640_v0, %v4535_v39  ;;  %v678_v49 = vsel %vm674_vm0, %v5645_v1, %v4536_v42  ;;  %v4539_v48 = vpop.permute.xlu0 %4538  ;;  %v789_v56 = vsel %vm788_vm2, %v732_v37, %v4530_v7  ;;  %v790_v38 = vsel %vm788_vm2, %v733_v47, %v4531_v62 }
  0x7f   :  { %v4541_v17 = vunpack.i.h.bf16 %v4539_v48  ;;  %v4540_v0 = vunpack.i.l.bf16 %v4539_v48  ;;  %v4544_v39 = vpop.permute.xlu1 %4543  ;;  %v845_v59 = vpack.c.bf16 %v790_v38, %v789_v56  ;;  %v4842_v7 = vpack.i.bf16 %v6076_v16, %v6071_v24 }
  0x80   :  { %v4546_v1 = vunpack.i.h.bf16 %v4544_v39  ;;  %v4545_v42 = vunpack.i.l.bf16 %v4544_v39  ;;  %4828 = vrot.lane.b32.xlu0 %v4827_v35, %s5553_s21 }
  0x81   :  { %1150 = vmatmul.mubr.bf16.vlgmr.msra.gmra.mrb[0].mxu0 %v845_v59  ;;  %v734_v37 = vsel %vm731_vm1, %v677_v53, %v4540_v0  ;;  %v735_v62 = vsel %vm731_vm1, %v678_v49, %v4541_v17  ;;  %4833 = vrot.lane.b32.xlu1 %v4812_v43, %s5552_s20  ;;  %v6092_v43 = vld [vmem:[%s7942_s0 + $0x190] sm:$0xff]  ;;  %v850_v0 = vpack.c.bf16 %v5734_v23, %v5726_v21  ;;  %v6115_v21 = vld [vmem:[%s7942_s0 + $0x1a0] sm:$0xff]  ;;  %v6120_v23 = vld [vmem:[%s7942_s0 + $0x1a8] sm:$0xff] }
  0x82   :  { %v4549_v15 = vpop.permute.xlu0 %4548  ;;  %4172 = vmatprep.mubr.msk.bf16.mxu0 %vm674_vm0, %v848_v12  ;;  %v791_v47 = vsel %vm788_vm2, %v734_v37, %v4545_v42  ;;  %v792_v48 = vsel %vm788_vm2, %v735_v62, %v4546_v1  ;;  %v6097_v12 = vld [vmem:[%s7942_s0 + $0x198] sm:$0xff] }
  0x83   :  { %v4551_v25 = vunpack.i.h.bf16 %v4549_v15  ;;  %v4550_v30 = vunpack.i.l.bf16 %v4549_v15  ;;  %v4554_v44 = vpop.permute.xlu1 %4553  ;;  %v847_v39 = vpack.c.bf16 %v792_v48, %v791_v47  ;;  %v4857_v37 = vpack.i.bf16 %v6097_v12, %v6092_v43 }
  0x84   :  { %4838 = vrot.lane.b32.xlu0 %v4827_v35, %s5554_s26  ;;  %v4556_v53 = vunpack.i.h.bf16 %v4554_v44  ;;  %v4555_v56 = vunpack.i.l.bf16 %v4554_v44 }
  0x85   :  { %4843 = vrot.lane.b32.xlu1 %v4842_v7, %s5553_s21  ;;  %v680_v49 = vsel %vm674_vm0, %v5667_v6, %v4551_v25  ;;  %v679_v38 = vsel %vm674_vm0, %v5662_v5, %v4550_v30 }
  0x86   :  { %v4559_v17 = vpop.permute.xlu0 %4558  ;;  %v736_v62 = vsel %vm731_vm1, %v679_v38, %v4555_v56  ;;  %v737_v6 = vsel %vm731_vm1, %v680_v49, %v4556_v53  ;;  %v4872_v53 = vpack.i.bf16 %v6120_v23, %v6115_v21  ;;  %v852_v38 = vpack.c.bf16 %v5758_v29, %v5753_v28 }
  0x87   :  { %v4564_v59 = vpop.permute.xlu1 %4563  ;;  %v4561_v1 = vunpack.i.h.bf16 %v4559_v17  ;;  %v4560_v42 = vunpack.i.l.bf16 %v4559_v17 }
  0x88   :  { %4848 = vrot.lane.b32.xlu0 %v4827_v35, %s5552_s20  ;;  %v4566_v5 = vunpack.i.h.bf16 %v4564_v59  ;;  %v4565_v15 = vunpack.i.l.bf16 %v4564_v59 }
  0x89   :  { %1160 = vmatmul.mubr.bf16.gmra.mrb[4].mxu0 %v847_v39  ;;  %4853 = vrot.lane.b32.xlu1 %v4842_v7, %s5554_s26  ;;  %v793_v30 = vsel %vm788_vm2, %v736_v62, %v4560_v42  ;;  %v794_v44 = vsel %vm788_vm2, %v737_v6, %v4561_v1 }
  0x8a   :  { %v4569_v25 = vpop.permute.xlu0 %4568  ;;  %4173 = vmatprep.mubr.msk.bf16.mxu0 %vm674_vm0, %v850_v0  ;;  %v682_v56 = vsel %vm674_vm0, %v5657_v4, %v4566_v5  ;;  %v681_v49 = vsel %vm674_vm0, %v5650_v2, %v4565_v15  ;;  %v849_v17 = vpack.c.bf16 %v794_v44, %v793_v30  ;;  %v6141_v2 = vld [vmem:[%s7942_s0 + $0x1b0] sm:$0xff]  ;;  %v6146_v4 = vld [vmem:[%s7942_s0 + $0x1b8] sm:$0xff] }
  0x8b   :  { %v4574_v35 = vpop.permute.xlu1 %4573  ;;  %v4571_v47 = vunpack.i.h.bf16 %v4569_v25  ;;  %v4570_v48 = vunpack.i.l.bf16 %v4569_v25  ;;  %v4887_v5 = vpack.i.bf16 %v6146_v4, %v6141_v2 }
  0x8c   :  { %4858 = vrot.lane.b32.xlu0 %v4857_v37, %s5553_s21  ;;  %v4576_v59 = vunpack.i.h.bf16 %v4574_v35  ;;  %v4575_v1 = vunpack.i.l.bf16 %v4574_v35 }
  0x8d   :  { %4863 = vrot.lane.b32.xlu1 %v4842_v7, %s5552_s20  ;;  %v738_v7 = vsel %vm731_vm1, %v681_v49, %v4570_v48  ;;  %v739_v42 = vsel %vm731_vm1, %v682_v56, %v4571_v47  ;;  %v854_v48 = vpack.c.bf16 %v5778_v34, %v5773_v33  ;;  %v6169_v56 = vld [vmem:[%s7942_s0 + $0x1c8] sm:$0xff] }
  0x8e   :  { %v4579_v0 = vpop.permute.xlu0 %4578  ;;  %v795_v62 = vsel %vm788_vm2, %v738_v7, %v4575_v1  ;;  %v796_v6 = vsel %vm788_vm2, %v739_v42, %v4576_v59 }
  0x8f   :  { %v4584_v39 = vpop.permute.xlu1 %4583  ;;  %v4581_v28 = vunpack.i.h.bf16 %v4579_v0  ;;  %v4580_v29 = vunpack.i.l.bf16 %v4579_v0  ;;  %v851_v49 = vpack.c.bf16 %v796_v6, %v795_v62  ;;  %v5516_v62 = vld [vmem:[%s7942_s0 + $0x58] sm:$0xff] }
  0x90   :  { %4868 = vrot.lane.b32.xlu0 %v4857_v37, %s5554_s26  ;;  %v4586_v15 = vunpack.i.h.bf16 %v4584_v39  ;;  %v4585_v25 = vunpack.i.l.bf16 %v4584_v39 }
  0x91   :  { %1170 = vmatmul.mubr.bf16.gmra.mrb[8].mxu0 %v849_v17  ;;  %4873 = vrot.lane.b32.xlu1 %v4872_v53, %s5553_s21  ;;  %v684_v44 = vsel %vm674_vm0, %v5683_v10, %v4581_v28  ;;  %v683_v47 = vsel %vm674_vm0, %v5678_v9, %v4580_v29  ;;  %v6190_v29 = vld [vmem:[%s7942_s0 + $0x1d8] sm:$0xff] }
  0x92   :  { %4174 = vmatprep.mubr.msk.bf16.mxu0 %vm674_vm0, %v852_v38  ;;  %v4589_v35 = vpop.permute.xlu0 %4588  ;;  %v740_v10 = vsel %vm731_vm1, %v683_v47, %v4585_v25  ;;  %v741_v33 = vsel %vm731_vm1, %v684_v44, %v4586_v15  ;;  %v5517_v15 = vld [vmem:[%s7942_s0 + $0x50] sm:$0xff] }
  0x93   :  { %v4594_v30 = vpop.permute.xlu1 %4593  ;;  %v4591_v38 = vunpack.i.h.bf16 %v4589_v35  ;;  %v4590_v17 = vunpack.i.l.bf16 %v4589_v35  ;;  %v856_v35 = vpack.c.bf16 %v5805_v41, %v5800_v40 }
  0x94   :  { %4878 = vrot.lane.b32.xlu0 %v4857_v37, %s5552_s20  ;;  %v6164_v37 = vld [vmem:[%s7942_s0 + $0x1c0] sm:$0xff]  ;;  %v4596_v0 = vunpack.i.h.bf16 %v4594_v30  ;;  %v4595_v39 = vunpack.i.l.bf16 %v4594_v30 }
  0x95   :  { %4883 = vrot.lane.b32.xlu1 %v4872_v53, %s5554_s26  ;;  %v4902_v34 = vpack.i.bf16 %v6169_v56, %v6164_v37  ;;  %v797_v1 = vsel %vm788_vm2, %v740_v10, %v4590_v17  ;;  %v798_v7 = vsel %vm788_vm2, %v741_v33, %v4591_v38 }
  0x96   :  { %v4599_v9 = vpop.permute.xlu0 %4598  ;;  %v686_v6 = vsel %vm674_vm0, %v5516_v62, %v4596_v0  ;;  %v685_v25 = vsel %vm674_vm0, %v5517_v15, %v4595_v39  ;;  %v853_v30 = vpack.c.bf16 %v798_v7, %v797_v1  ;;  %v4932_v1 = vpack.i.bf16 %v5966_v22, %v5961_v20  ;;  %v5518_v7 = vld [vmem:[%s7942_s0 + $0x68] sm:$0xff] }
  0x97   :  { %v4604_v59 = vpop.permute.xlu1 %4603  ;;  %v4601_v42 = vunpack.i.h.bf16 %v4599_v9  ;;  %v4600_v28 = vunpack.i.l.bf16 %v4599_v9 }
  0x98   :  { %4888 = vrot.lane.b32.xlu0 %v4887_v5, %s5553_s21 }
  0x99   :  { %1180 = vmatmul.mubr.bf16.gmra.mrb[12].mxu0 %v851_v49  ;;  %4893 = vrot.lane.b32.xlu1 %v4872_v53, %s5552_s20  ;;  %v6185_v53 = vld [vmem:[%s7942_s0 + $0x1d0] sm:$0xff]  ;;  %v4605_v49 = vunpack.i.l.bf16 %v4604_v59  ;;  %v742_v17 = vsel %vm731_vm1, %v685_v25, %v4600_v28  ;;  %v743_v9 = vsel %vm731_vm1, %v686_v6, %v4601_v42  ;;  %v5519_v28 = vld [vmem:[%s7942_s0 + $0x60] sm:$0xff]  ;;  %v858_v6 = vpack.c.bf16 %v5826_v46, %v5821_v45 }
  0x9a   :  { %4175 = vmatprep.mubr.msk.bf16.mxu0 %vm674_vm0, %v854_v48  ;;  %v4609_v44 = vpop.permute.xlu0 %4608  ;;  %v4606_v48 = vunpack.i.h.bf16 %v4604_v59  ;;  %v4917_v38 = vpack.i.bf16 %v6190_v29, %v6185_v53 }
  0x9b   :  { %v4614_v47 = vpop.permute.xlu1 %4613  ;;  %v4611_v10 = vunpack.i.h.bf16 %v4609_v44  ;;  %v4610_v33 = vunpack.i.l.bf16 %v4609_v44  ;;  %v799_v40 = vsel %vm788_vm2, %v742_v17, %v4605_v49 }
  0x9c   :  { %4898 = vrot.lane.b32.xlu0 %v4887_v5, %s5554_s26  ;;  %v800_v41 = vsel %vm788_vm2, %v743_v9, %v4606_v48  ;;  %v4615_v0 = vunpack.i.l.bf16 %v4614_v47 }
  0x9d   :  { %4903 = vrot.lane.b32.xlu1 %v4902_v34, %s5553_s21  ;;  %v688_v42 = vsel %vm674_vm0, %v5518_v7, %v4611_v10  ;;  %v687_v62 = vsel %vm674_vm0, %v5519_v28, %v4610_v33  ;;  %v855_v15 = vpack.c.bf16 %v800_v41, %v799_v40  ;;  %v5521_v33 = vld [vmem:[%s7942_s0 + $0x70] sm:$0xff]  ;;  %v860_v41 = vpack.c.bf16 %v5852_v52, %v5847_v51 }
  0x9e   :  { %v4619_v39 = vpop.permute.xlu0 %4618 }
  0x9f   :  { %v4624_v59 = vpop.permute.xlu1 %4623  ;;  %v4620_v25 = vunpack.i.l.bf16 %v4619_v39 }
  0xa0   :  { %4908 = vrot.lane.b32.xlu0 %v4887_v5, %s5552_s20  ;;  %v4616_v5 = vunpack.i.h.bf16 %v4614_v47  ;;  %v4626_v47 = vunpack.i.h.bf16 %v4624_v59  ;;  %v4625_v48 = vunpack.i.l.bf16 %v4624_v59 }
  0xa1   :  { %1190 = vmatmul.mubr.bf16.gmra.mrb[16].mxu0 %v853_v30  ;;  %4913 = vrot.lane.b32.xlu1 %v4902_v34, %s5554_s26  ;;  %v744_v30 = vsel %vm731_vm1, %v687_v62, %v4615_v0 }
  0xa2   :  { %4176 = vmatprep.mubr.msk.bf16.mxu0 %vm674_vm0, %v856_v35  ;;  %v4629_v35 = vpop.permute.xlu0 %4628  ;;  %v745_v44 = vsel %vm731_vm1, %v688_v42, %v4616_v5  ;;  %v801_v45 = vsel %vm788_vm2, %v744_v30, %v4620_v25  ;;  %v689_v40 = vsel %vm674_vm0, %v5521_v33, %v4625_v48  ;;  %v5523_v48 = vld [vmem:[%s7942_s0 + $0x80] sm:$0xff] }
  0xa3   :  { %v4634_v49 = vpop.permute.xlu1 %4633  ;;  %v4631_v17 = vunpack.i.h.bf16 %v4629_v35  ;;  %v4630_v9 = vunpack.i.l.bf16 %v4629_v35 }
  0xa4   :  { %4918 = vrot.lane.b32.xlu0 %v4917_v38, %s5553_s21  ;;  %v4636_v59 = vunpack.i.h.bf16 %v4634_v49 }
  0xa5   :  { %4923 = vrot.lane.b32.xlu1 %v4902_v34, %s5552_s20  ;;  %v4621_v34 = vunpack.i.h.bf16 %v4619_v39  ;;  %v746_v7 = vsel %vm731_vm1, %v689_v40, %v4630_v9 }
  0xa6   :  { %v4639_v0 = vpop.permute.xlu0 %4638 }
  0xa7   :  { %v802_v46 = vsel %vm788_vm2, %v745_v44, %v4621_v34  ;;  %v4644_v39 = vpop.permute.xlu1 %4643  ;;  %v4641_v28 = vunpack.i.h.bf16 %v4639_v0  ;;  %v4640_v62 = vunpack.i.l.bf16 %v4639_v0  ;;  %v5522_v44 = vld [vmem:[%s7942_s0 + $0x88] sm:$0xff] }
  0xa8   :  { %4928 = vrot.lane.b32.xlu0 %v4917_v38, %s5554_s26  ;;  %v5520_v38 = vld [vmem:[%s7942_s0 + $0x78] sm:$0xff]  ;;  %v857_v5 = vpack.c.bf16 %v802_v46, %v801_v45  ;;  %v4646_v34 = vunpack.i.h.bf16 %v4644_v39  ;;  %v4645_v25 = vunpack.i.l.bf16 %v4644_v39  ;;  %v862_v45 = vpack.c.bf16 %v5865_v55, %v5860_v54 }
  0xa9   :  { %1200 = vmatmul.mubr.bf16.gmra.mrb[20].mxu0 %v855_v15  ;;  %4933 = vrot.lane.b32.xlu1 %v4932_v1, %s5553_s21  ;;  %v690_v10 = vsel %vm674_vm0, %v5520_v38, %v4626_v47  ;;  %v4635_v1 = vunpack.i.l.bf16 %v4634_v49  ;;  %v692_v47 = vsel %vm674_vm0, %v5522_v44, %v4641_v28  ;;  %v691_v49 = vsel %vm674_vm0, %v5523_v48, %v4640_v62  ;;  %v5525_v28 = vld [vmem:[%s7942_s0 + $0x90] sm:$0xff] }
  0xaa   :  { %4177 = vmatprep.mubr.msk.bf16.mxu0 %vm674_vm0, %v858_v6  ;;  %v747_v42 = vsel %vm731_vm1, %v690_v10, %v4631_v17  ;;  %v4649_v35 = vpop.permute.xlu0 %4648  ;;  %v748_v10 = vsel %vm731_vm1, %v691_v49, %v4645_v25  ;;  %v749_v33 = vsel %vm731_vm1, %v692_v47, %v4646_v34 }
  0xab   :  { %v803_v6 = vsel %vm788_vm2, %v746_v7, %v4635_v1  ;;  %v804_v15 = vsel %vm788_vm2, %v747_v42, %v4636_v59  ;;  %v4654_v30 = vpop.permute.xlu1 %4653  ;;  %v4651_v17 = vunpack.i.h.bf16 %v4649_v35  ;;  %v4650_v9 = vunpack.i.l.bf16 %v4649_v35  ;;  %v5524_v7 = vld [vmem:[%s7942_s0 + $0x98] sm:$0xff] }
  0xac   :  { %v859_v46 = vpack.c.bf16 %v804_v15, %v803_v6  ;;  %v4656_v40 = vunpack.i.h.bf16 %v4654_v30  ;;  %v864_v6 = vpack.c.bf16 %v5880_v58, %v5875_v57 }
  0xad   :  { %v805_v0 = vsel %vm788_vm2, %v748_v10, %v4650_v9  ;;  %v806_v39 = vsel %vm788_vm2, %v749_v33, %v4651_v17  ;;  %v5526_v33 = vld [vmem:[%s7942_s0 + $0xa8] sm:$0xff] }
  0xae   :  { %v4659_v38 = vpop.permute.xlu0 %4658  ;;  %v694_v42 = vsel %vm674_vm0, %v5524_v7, %v4656_v40  ;;  %v861_v15 = vpack.c.bf16 %v806_v39, %v805_v0  ;;  %v866_v0 = vpack.c.bf16 %v5896_v61, %v5891_v60 }
  0xaf   :  { %v4661_v59 = vunpack.i.h.bf16 %v4659_v38  ;;  %v4660_v1 = vunpack.i.l.bf16 %v4659_v38 }
  0xb1   :  { %1210 = vmatmul.mubr.bf16.gmra.mrb[24].mxu0 %v857_v5  ;;  %v4664_v5 = vpop.permute.xlu1 %4663  ;;  %v751_v47 = vsel %vm731_vm1, %v694_v42, %v4661_v59 }
  0xb2   :  { %4178 = vmatprep.mubr.msk.bf16.mxu0 %vm674_vm0, %v860_v41  ;;  %v4655_v41 = vunpack.i.l.bf16 %v4654_v30  ;;  %v4669_v34 = vpop.permute.xlu0 %4668  ;;  %v4666_v35 = vunpack.i.h.bf16 %v4664_v5  ;;  %v4665_v30 = vunpack.i.l.bf16 %v4664_v5 }
  0xb3   :  { %v4671_v48 = vunpack.i.h.bf16 %v4669_v34  ;;  %v4670_v49 = vunpack.i.l.bf16 %v4669_v34 }
  0xb4   :  { %v693_v62 = vsel %vm674_vm0, %v5525_v28, %v4655_v41  ;;  %v5527_v41 = vld [vmem:[%s7942_s0 + $0xa0] sm:$0xff] }
  0xb5   :  { %v4674_v25 = vpop.permute.xlu1 %4673  ;;  %v750_v44 = vsel %vm731_vm1, %v693_v62, %v4660_v1  ;;  %v696_v40 = vsel %vm674_vm0, %v5526_v33, %v4671_v48  ;;  %v695_v5 = vsel %vm674_vm0, %v5527_v41, %v4670_v49  ;;  %v868_v48 = vpack.c.bf16 %v5912_v3, %v5907_v63 }
  0xb6   :  { %v4676_v17 = vunpack.i.h.bf16 %v4674_v25  ;;  %v4675_v9 = vunpack.i.l.bf16 %v4674_v25  ;;  %v4679_v38 = vpop.permute.xlu0 %4678 }
  0xb7   :  { %v4681_v59 = vunpack.i.h.bf16 %v4679_v38  ;;  %v4680_v1 = vunpack.i.l.bf16 %v4679_v38 }
  0xb8   :  { %v752_v42 = vsel %vm731_vm1, %v695_v5, %v4675_v9  ;;  %v753_v28 = vsel %vm731_vm1, %v696_v40, %v4676_v17 }
  0xb9   :  { %1220 = vmatmul.mubr.bf16.gmra.mrb[28].mxu0 %v859_v46  ;;  %v808_v46 = vsel %vm788_vm2, %v751_v47, %v4666_v35  ;;  %v4684_v10 = vpop.permute.xlu1 %4683  ;;  %v809_v34 = vsel %vm788_vm2, %v752_v42, %v4680_v1  ;;  %v810_v25 = vsel %vm788_vm2, %v753_v28, %v4681_v59 }
  0xba   :  { %4179 = vmatprep.mubr.msk.bf16.mxu0 %vm674_vm0, %v862_v45  ;;  %v807_v45 = vsel %vm788_vm2, %v750_v44, %v4665_v30  ;;  %v4689_v7 = vpop.permute.xlu0 %4688  ;;  %v4686_v62 = vunpack.i.h.bf16 %v4684_v10  ;;  %v865_v49 = vpack.c.bf16 %v810_v25, %v809_v34 }
  0xbb   :  { %v863_v39 = vpack.c.bf16 %v808_v46, %v807_v45  ;;  %v4691_v35 = vunpack.i.h.bf16 %v4689_v7  ;;  %v4690_v30 = vunpack.i.l.bf16 %v4689_v7  ;;  %v870_v7 = vpack.c.bf16 %v5925_v11, %v5920_v8 }
  0xbc   :  { %v698_v44 = vsel %vm674_vm0, %v5852_v52, %v4686_v62 }
  0xbe   :  { %v4699_v45 = vpop.permute.xlu0 %4698 }
  0xbf   :  { %v4701_v33 = vunpack.i.h.bf16 %v4699_v45  ;;  %v4700_v40 = vunpack.i.l.bf16 %v4699_v45  ;;  %v872_v45 = vpack.c.bf16 %v5940_v14, %v5935_v13 }
  0xc1   :  { %1230 = vmatmul.mubr.bf16.gmra.mrb[32].mxu0 %v861_v15  ;;  %v4694_v15 = vpop.permute.xlu1 %4693  ;;  %v700_v59 = vsel %vm674_vm0, %v5865_v55, %v4701_v33  ;;  %v699_v1 = vsel %vm674_vm0, %v5860_v54, %v4700_v40 }
  0xc2   :  { %4180 = vmatprep.mubr.msk.bf16.mxu0 %vm674_vm0, %v864_v6  ;;  %v4685_v6 = vunpack.i.l.bf16 %v4684_v10  ;;  %v4696_v17 = vunpack.i.h.bf16 %v4694_v15  ;;  %v4695_v9 = vunpack.i.l.bf16 %v4694_v15  ;;  %v755_v10 = vsel %vm731_vm1, %v698_v44, %v4691_v35 }
  0xc4   :  { %v697_v47 = vsel %vm674_vm0, %v5847_v51, %v4685_v6  ;;  %v812_v51 = vsel %vm788_vm2, %v755_v10, %v4696_v17 }
  0xc5   :  { %v4704_v46 = vpop.permute.xlu1 %4703  ;;  %v754_v38 = vsel %vm731_vm1, %v697_v47, %v4690_v30 }
  0xc6   :  { %v811_v52 = vsel %vm788_vm2, %v754_v38, %v4695_v9  ;;  %v4706_v41 = vunpack.i.h.bf16 %v4704_v46  ;;  %v4705_v5 = vunpack.i.l.bf16 %v4704_v46 }
  0xc7   :  { %v867_v42 = vpack.c.bf16 %v812_v51, %v811_v52 }
  0xc8   :  { %v756_v15 = vsel %vm731_vm1, %v699_v1, %v4705_v5  ;;  %v757_v34 = vsel %vm731_vm1, %v700_v59, %v4706_v41 }
  0xc9   :  { %1240 = vmatmul.mubr.bf16.gmra.mrb[36].mxu0 %v863_v39  ;;  %v4714_v39 = vpop.permute.xlu1 %4713 }
  0xca   :  { %4181 = vmatprep.mubr.msk.bf16.mxu0 %vm674_vm0, %v866_v0  ;;  %v4709_v0 = vpop.permute.xlu0 %4708  ;;  %v4716_v25 = vunpack.i.h.bf16 %v4714_v39  ;;  %v4715_v35 = vunpack.i.l.bf16 %v4714_v39 }
  0xcb   :  { %v4711_v28 = vunpack.i.h.bf16 %v4709_v0  ;;  %v4710_v62 = vunpack.i.l.bf16 %v4709_v0 }
  0xcd   :  { %v4724_v55 = vpop.permute.xlu1 %4723  ;;  %v813_v30 = vsel %vm788_vm2, %v756_v15, %v4710_v62  ;;  %v814_v54 = vsel %vm788_vm2, %v757_v34, %v4711_v28 }
  0xce   :  { %v4719_v6 = vpop.permute.xlu0 %4718  ;;  %v869_v46 = vpack.c.bf16 %v814_v54, %v813_v30  ;;  %v4726_v38 = vunpack.i.h.bf16 %v4724_v55  ;;  %v4725_v10 = vunpack.i.l.bf16 %v4724_v55 }
  0xcf   :  { %v4721_v44 = vunpack.i.h.bf16 %v4719_v6  ;;  %v4720_v47 = vunpack.i.l.bf16 %v4719_v6 }
  0xd1   :  { %1250 = vmatmul.mubr.bf16.gmra.mrb[40].mxu0 %v865_v49  ;;  %v701_v49 = vsel %vm674_vm0, %v5875_v57, %v4715_v35  ;;  %v4734_v9 = vpop.permute.xlu1 %4733 }
  0xd2   :  { %4182 = vmatprep.mubr.msk.bf16.mxu0 %vm674_vm0, %v868_v48  ;;  %v702_v48 = vsel %vm674_vm0, %v5880_v58, %v4716_v25  ;;  %v4729_v17 = vpop.permute.xlu0 %4728  ;;  %v758_v33 = vsel %vm731_vm1, %v701_v49, %v4720_v47  ;;  %v4736_v41 = vunpack.i.h.bf16 %v4734_v9  ;;  %v4735_v5 = vunpack.i.l.bf16 %v4734_v9 }
  0xd3   :  { %v759_v40 = vsel %vm731_vm1, %v702_v48, %v4721_v44  ;;  %v4731_v52 = vunpack.i.h.bf16 %v4729_v17  ;;  %v4730_v51 = vunpack.i.l.bf16 %v4729_v17  ;;  %v815_v58 = vsel %vm788_vm2, %v758_v33, %v4725_v10 }
  0xd4   :  { %v816_v57 = vsel %vm788_vm2, %v759_v40, %v4726_v38  ;;  %v876_v48 = vpack.c.bf16 %v5984_v27, %v5979_v26 }
  0xd5   :  { %v4744_v39 = vpop.permute.xlu1 %4743  ;;  %v704_v59 = vsel %vm674_vm0, %v5896_v61, %v4731_v52  ;;  %v703_v1 = vsel %vm674_vm0, %v5891_v60, %v4730_v51 }
  0xd6   :  { %v4739_v0 = vpop.permute.xlu0 %4738  ;;  %v760_v15 = vsel %vm731_vm1, %v703_v1, %v4735_v5  ;;  %v761_v34 = vsel %vm731_vm1, %v704_v59, %v4736_v41  ;;  %v4746_v25 = vunpack.i.h.bf16 %v4744_v39  ;;  %v4745_v35 = vunpack.i.l.bf16 %v4744_v39 }
  0xd7   :  { %v4741_v28 = vunpack.i.h.bf16 %v4739_v0  ;;  %v4740_v62 = vunpack.i.l.bf16 %v4739_v0  ;;  %v878_v0 = vpack.c.bf16 %v5998_v32, %v5993_v31 }
  0xd8   :  { %v706_v44 = vsel %vm674_vm0, %v5912_v3, %v4746_v25  ;;  %v705_v47 = vsel %vm674_vm0, %v5907_v63, %v4745_v35 }
  0xd9   :  { %1260 = vmatmul.mubr.bf16.gmra.mrb[44].mxu0 %v867_v42  ;;  %v871_v42 = vpack.c.bf16 %v816_v57, %v815_v58  ;;  %v4754_v61 = vpop.permute.xlu1 %4753  ;;  %v817_v55 = vsel %vm788_vm2, %v760_v15, %v4740_v62  ;;  %v818_v60 = vsel %vm788_vm2, %v761_v34, %v4741_v28 }
  0xda   :  { %4183 = vmatprep.mubr.msk.bf16.mxu0 %vm674_vm0, %v870_v7  ;;  %v874_v7 = vpack.c.bf16 %v5955_v19, %v5950_v18  ;;  %v4749_v6 = vpop.permute.xlu0 %4748  ;;  %v873_v49 = vpack.c.bf16 %v818_v60, %v817_v55  ;;  %v4756_v17 = vunpack.i.h.bf16 %v4754_v61  ;;  %v4755_v9 = vunpack.i.l.bf16 %v4754_v61  ;;  %v7968_v55 = vld [vmem:[#allocation5_spill] sm:$0xff] }
  0xdb   :  { %v4751_v30 = vunpack.i.h.bf16 %v4749_v6  ;;  %v4750_v54 = vunpack.i.l.bf16 %v4749_v6  ;;  %v880_v60 = vpack.c.bf16 %v7968_v55, %v6009_v36 }
  0xdd   :  { %v762_v38 = vsel %vm731_vm1, %v705_v47, %v4750_v54  ;;  %v763_v10 = vsel %vm731_vm1, %v706_v44, %v4751_v30 }
  0xde   :  { %v819_v3 = vsel %vm788_vm2, %v762_v38, %v4755_v9  ;;  %v820_v63 = vsel %vm788_vm2, %v763_v10, %v4756_v17 }
  0xdf   :  { %v875_v39 = vpack.c.bf16 %v820_v63, %v819_v3  ;;  %v7969_v63 = vld [vmem:[#allocation6_spill] sm:$0xff] }
  0xe1   :  { %1270 = vmatmul.mubr.bf16.gmra.mrb[48].mxu0 %v869_v46  ;;  %v4764_v46 = vpop.permute.xlu1 %4763 }
  0xe2   :  { %4184 = vmatprep.mubr.msk.bf16.mxu0 %vm674_vm0, %v872_v45  ;;  %v4759_v45 = vpop.permute.xlu0 %4758  ;;  %v4766_v52 = vunpack.i.h.bf16 %v4764_v46  ;;  %v4765_v51 = vunpack.i.l.bf16 %v4764_v46 }
  0xe3   :  { %v4761_v33 = vunpack.i.h.bf16 %v4759_v45  ;;  %v4760_v40 = vunpack.i.l.bf16 %v4759_v45 }
  0xe5   :  { %v4774_v57 = vpop.permute.xlu1 %4773  ;;  %v708_v41 = vsel %vm674_vm0, %v5925_v11, %v4761_v33  ;;  %v707_v5 = vsel %vm674_vm0, %v5920_v8, %v4760_v40 }
  0xe6   :  { %v4769_v58 = vpop.permute.xlu0 %4768  ;;  %v765_v28 = vsel %vm731_vm1, %v708_v41, %v4766_v52  ;;  %v4776_v62 = vunpack.i.h.bf16 %v4774_v57  ;;  %v4775_v6 = vunpack.i.l.bf16 %v4774_v57  ;;  %v7970_v52 = vld [vmem:[#allocation7_spill] sm:$0xff] }
  0xe7   :  { %v4771_v59 = vunpack.i.h.bf16 %v4769_v58  ;;  %v4770_v1 = vunpack.i.l.bf16 %v4769_v58 }
  0xe8   :  { %v710_v35 = vsel %vm674_vm0, %v5940_v14, %v4776_v62  ;;  %v709_v61 = vsel %vm674_vm0, %v5935_v13, %v4775_v6 }
  0xe9   :  { %1280 = vmatmul.mubr.bf16.gmra.mrb[52].mxu0 %v871_v42  ;;  %v764_v42 = vsel %vm731_vm1, %v707_v5, %v4765_v51  ;;  %v4784_v11 = vpop.permute.xlu1 %4783  ;;  %v822_v8 = vsel %vm788_vm2, %v765_v28, %v4771_v59  ;;  %v882_v51 = vpack.c.bf16 %v7970_v52, %v7969_v63 }
  0xea   :  { %4185 = vmatprep.mubr.msk.bf16.mxu0 %vm674_vm0, %v874_v7  ;;  %v4779_v7 = vpop.permute.xlu0 %4778  ;;  %v821_v15 = vsel %vm788_vm2, %v764_v42, %v4770_v1  ;;  %v4786_v47 = vunpack.i.h.bf16 %v4784_v11 }
  0xeb   :  { %v4781_v34 = vunpack.i.h.bf16 %v4779_v7  ;;  %v4780_v25 = vunpack.i.l.bf16 %v4779_v7  ;;  %v877_v30 = vpack.c.bf16 %v822_v8, %v821_v15 }
  0xed   :  { %v4794_v44 = vpop.permute.xlu1 %4793  ;;  %v767_v45 = vsel %vm731_vm1, %v710_v35, %v4781_v34 }
  0xee   :  { %v4789_v54 = vpop.permute.xlu0 %4788  ;;  %v824_v13 = vsel %vm788_vm2, %v767_v45, %v4786_v47  ;;  %v4796_v9 = vunpack.i.h.bf16 %v4794_v44  ;;  %v4795_v38 = vunpack.i.l.bf16 %v4794_v44 }
  0xef   :  { %v4791_v46 = vunpack.i.h.bf16 %v4789_v54  ;;  %v4790_v17 = vunpack.i.l.bf16 %v4789_v54 }
  0xf1   :  { %1290 = vmatmul.mubr.bf16.gmra.mrb[56].mxu0 %v873_v49  ;;  %v766_v49 = vsel %vm731_vm1, %v709_v61, %v4780_v25  ;;  %v4804_v33 = vpop.permute.xlu1 %4803  ;;  %v712_v40 = vsel %vm674_vm0, %v5955_v19, %v4791_v46  ;;  %v711_v3 = vsel %vm674_vm0, %v5950_v18, %v4790_v17 }
  0xf2   :  { %4186 = vmatprep.mubr.msk.bf16.mxu0 %vm674_vm0, %v876_v48  ;;  %v4785_v48 = vunpack.i.l.bf16 %v4784_v11  ;;  %v4799_v10 = vpop.permute.xlu0 %4798  ;;  %v4806_v59 = vunpack.i.h.bf16 %v4804_v33  ;;  %v4805_v1 = vunpack.i.l.bf16 %v4804_v33  ;;  %v7971_v11 = vld [vmem:[#allocation8_spill] sm:$0xff] }
  0xf3   :  { %v4801_v57 = vunpack.i.h.bf16 %v4799_v10  ;;  %v4800_v41 = vunpack.i.l.bf16 %v4799_v10  ;;  %v884_v15 = vpack.c.bf16 %v7971_v11, %v6038_v50 }
  0xf4   :  { %v823_v14 = vsel %vm788_vm2, %v766_v49, %v4785_v48  ;;  %v714_v62 = vsel %vm674_vm0, %v5984_v27, %v4806_v59  ;;  %v713_v6 = vsel %vm674_vm0, %v5979_v26, %v4805_v1 }
  0xf5   :  { %v879_v58 = vpack.c.bf16 %v824_v13, %v823_v14  ;;  %v4814_v19 = vpop.permute.xlu1 %4813  ;;  %v886_v14 = vpack.c.bf16 %v6076_v16, %v6071_v24 }
  0xf6   :  { %v4809_v5 = vpop.permute.xlu0 %4808  ;;  %v4816_v35 = vunpack.i.h.bf16 %v4814_v19  ;;  %v4815_v61 = vunpack.i.l.bf16 %v4814_v19 }
  0xf7   :  { %v4811_v42 = vunpack.i.h.bf16 %v4809_v5  ;;  %v4810_v28 = vunpack.i.l.bf16 %v4809_v5 }
  0xf9   :  { %1300 = vmatmul.mubr.bf16.gmra.mrb[60].mxu0 %v875_v39  ;;  %v769_v39 = vsel %vm731_vm1, %v712_v40, %v4796_v9  ;;  %v4824_v25 = vpop.permute.xlu1 %4823 }
  0xfa   :  { %4187 = vmatprep.mubr.msk.bf16.mxu0 %vm674_vm0, %v878_v0  ;;  %v768_v0 = vsel %vm731_vm1, %v711_v3, %v4795_v38  ;;  %v826_v18 = vsel %vm788_vm2, %v769_v39, %v4801_v57  ;;  %v4819_v34 = vpop.permute.xlu0 %4818  ;;  %v4826_v47 = vunpack.i.h.bf16 %v4824_v25  ;;  %v4825_v48 = vunpack.i.l.bf16 %v4824_v25 }
  0xfb   :  { %v825_v7 = vsel %vm788_vm2, %v768_v0, %v4800_v41  ;;  %v4821_v54 = vunpack.i.h.bf16 %v4819_v34  ;;  %v4820_v44 = vunpack.i.l.bf16 %v4819_v34  ;;  %v888_v39 = vpack.c.bf16 %v6097_v12, %v6092_v43 }
  0xfc   :  { %v881_v8 = vpack.c.bf16 %v826_v18, %v825_v7 }
  0xfd   :  { %v4834_v45 = vpop.permute.xlu1 %4833  ;;  %v716_v46 = vsel %vm674_vm0, %v5998_v32, %v4821_v54  ;;  %v715_v17 = vsel %vm674_vm0, %v5993_v31, %v4820_v44 }
  0xfe   :  { %v4829_v49 = vpop.permute.xlu0 %4828  ;;  %v772_v33 = vsel %vm731_vm1, %v715_v17, %v4825_v48  ;;  %v773_v40 = vsel %vm731_vm1, %v716_v46, %v4826_v47  ;;  %v4836_v3 = vunpack.i.h.bf16 %v4834_v45 }
  0xff   :  { %v4831_v9 = vunpack.i.h.bf16 %v4829_v49  ;;  %v4830_v38 = vunpack.i.l.bf16 %v4829_v49 }
 0x100   :  { %v718_v5 = vsel %vm674_vm0, %v7968_v55, %v4836_v3 }
 0x101   :  { %1310 = vmatmul.mubr.bf16.gmra.mrb[64].mxu0 %v877_v30  ;;  %v771_v30 = vsel %vm731_vm1, %v714_v62, %v4811_v42  ;;  %v4844_v32 = vpop.permute.xlu1 %4843  ;;  %v830_v31 = vsel %vm788_vm2, %v773_v40, %v4831_v9  ;;  %v892_v9 = vpack.c.bf16 %v6146_v4, %v6141_v2 }
 0x102   :  { %4188 = vmatprep.mubr.msk.bf16.mxu0 %vm674_vm0, %v880_v60  ;;  %v770_v60 = vsel %vm731_vm1, %v713_v6, %v4810_v28  ;;  %v828_v26 = vsel %vm788_vm2, %v771_v30, %v4816_v35  ;;  %v4839_v10 = vpop.permute.xlu0 %4838  ;;  %v4846_v7 = vunpack.i.h.bf16 %v4844_v32  ;;  %v4845_v18 = vunpack.i.l.bf16 %v4844_v32 }
 0x103   :  { %v827_v27 = vsel %vm788_vm2, %v770_v60, %v4815_v61  ;;  %v4841_v57 = vunpack.i.h.bf16 %v4839_v10  ;;  %v4840_v41 = vunpack.i.l.bf16 %v4839_v10  ;;  %v890_v60 = vpack.c.bf16 %v6120_v23, %v6115_v21 }
 0x104   :  { %v883_v13 = vpack.c.bf16 %v828_v26, %v827_v27 }
 0x105   :  { %v4854_v19 = vpop.permute.xlu1 %4853  ;;  %v775_v28 = vsel %vm731_vm1, %v718_v5, %v4841_v57 }
 0x106   :  { %v4849_v1 = vpop.permute.xlu0 %4848 }
 0x107   :  { %v4851_v62 = vunpack.i.h.bf16 %v4849_v1  ;;  %v4850_v6 = vunpack.i.l.bf16 %v4849_v1 }
 0x109   :  { %1320 = vmatmul.mubr.bf16.gmra.mrb[68].mxu0 %v879_v58  ;;  %v829_v58 = vsel %vm788_vm2, %v772_v33, %v4830_v38  ;;  %v4864_v25 = vpop.permute.xlu1 %4863  ;;  %v720_v35 = vsel %vm674_vm0, %v7970_v52, %v4851_v62  ;;  %v719_v61 = vsel %vm674_vm0, %v7969_v63, %v4850_v6 }
 0x10a   :  { %4189 = vmatprep.mubr.msk.bf16.mxu0 %vm674_vm0, %v882_v51  ;;  %v4835_v51 = vunpack.i.l.bf16 %v4834_v45  ;;  %v885_v59 = vpack.c.bf16 %v830_v31, %v829_v58  ;;  %v4859_v34 = vpop.permute.xlu0 %4858  ;;  %v4866_v48 = vunpack.i.h.bf16 %v4864_v25  ;;  %v4865_v49 = vunpack.i.l.bf16 %v4864_v25 }
 0x10b   :  { %v4861_v54 = vunpack.i.h.bf16 %v4859_v34  ;;  %v4860_v44 = vunpack.i.l.bf16 %v4859_v34 }
 0x10c   :  { %v717_v0 = vsel %vm674_vm0, %v6009_v36, %v4835_v51  ;;  %v832_v36 = vsel %vm788_vm2, %v775_v28, %v4846_v7  ;;  %v5555_v7 = vmov 0  }
 0x10d   :  { %v774_v42 = vsel %vm731_vm1, %v717_v0, %v4840_v41  ;;  %v4874_v52 = vpop.permute.xlu1 %4873  ;;  %2066 = vmatprep.subr.bf16.mxu1 %v5555_v7  ;;  %3504 = vmatprep.subr.bf16.mxu0 %v5555_v7 }
 0x10e   :  { %v831_v55 = vsel %vm788_vm2, %v774_v42, %v4845_v18  ;;  %v4869_v27 = vpop.permute.xlu0 %4868  ;;  %v4876_v40 = vunpack.i.h.bf16 %v4874_v52  ;;  %v4875_v3 = vunpack.i.l.bf16 %v4874_v52 }
 0x10f   :  { %v887_v30 = vpack.c.bf16 %v832_v36, %v831_v55  ;;  %v4871_v46 = vunpack.i.h.bf16 %v4869_v27  ;;  %v4870_v17 = vunpack.i.l.bf16 %v4869_v27 }
 0x111   :  { %1330 = vmatmul.mubr.bf16.gmra.mrb[72].mxu0 %v881_v8  ;;  %v4855_v8 = vunpack.i.l.bf16 %v4854_v19  ;;  %v4884_v33 = vpop.permute.xlu1 %4883 }
 0x112   :  { %4190 = vmatprep.mubr.msk.bf16.mxu0 %vm674_vm0, %v884_v15  ;;  %v4856_v15 = vunpack.i.h.bf16 %v4854_v19  ;;  %v4879_v10 = vpop.permute.xlu0 %4878  ;;  %v4886_v57 = vunpack.i.h.bf16 %v4884_v33  ;;  %v4885_v41 = vunpack.i.l.bf16 %v4884_v33  ;;  %v894_v19 = vpack.c.bf16 %v6169_v56, %v6164_v37  ;;  %v5378_v37 = vld [vmem:[%s7947_s5 + $0x8] sm:$0xff]  }
 0x113   :  { %v776_v26 = vsel %vm731_vm1, %v719_v61, %v4855_v8  ;;  %v4881_v58 = vunpack.i.h.bf16 %v4879_v10  ;;  %v4880_v31 = vunpack.i.l.bf16 %v4879_v10 }
 0x114   :  { %v777_v47 = vsel %vm731_vm1, %v720_v35, %v4856_v15  ;;  %v833_v45 = vsel %vm788_vm2, %v776_v26, %v4860_v44  ;;  %v5379_v35 = vld [vmem:[%s7947_s5 + $0x10] sm:$0xff]  }
 0x115   :  { %v834_v63 = vsel %vm788_vm2, %v777_v47, %v4861_v54  ;;  %v4894_v0 = vpop.permute.xlu1 %4893  ;;  %v723_v1 = vsel %vm674_vm0, %v6071_v24, %v4880_v31 }
 0x116   :  { %v889_v38 = vpack.c.bf16 %v834_v63, %v833_v45  ;;  %v4889_v5 = vpop.permute.xlu0 %4888  ;;  %v780_v62 = vsel %vm731_vm1, %v723_v1, %v4885_v41  ;;  %v4896_v56 = vunpack.i.h.bf16 %v4894_v0  ;;  %v4895_v6 = vunpack.i.l.bf16 %v4894_v0  ;;  %v109_v0 = vld [vmem:[%s7942_s0 + $0x1f8] sm:$0xff] }
 0x117   :  { %v4891_v42 = vunpack.i.h.bf16 %v4889_v5  ;;  %v4890_v28 = vunpack.i.l.bf16 %v4889_v5  ;;  %v923_v41 = vlaneseq  ;;  %v108_v5 = vld [vmem:[%s7942_s0 + $0x1f0] sm:$0xff] }
 0x118   :  { %v726_v61 = vsel %vm674_vm0, %v6097_v12, %v4896_v56 }
 0x119   :  { %1340 = vmatmul.mubr.bf16.gmra.mrb[76].mxu0 %v883_v13  ;;  %v721_v13 = vsel %vm674_vm0, %v6038_v50, %v4865_v49  ;;  %v4904_v55 = vpop.permute.xlu1 %4903  ;;  %v837_v36 = vsel %vm788_vm2, %v780_v62, %v4890_v28  ;;  %v6510_v62 = vshrl.u32 %v923_v41, 7 }
 0x11a   :  { %4191 = vmatprep.mubr.msk.bf16.mxu0 %vm674_vm0, %v886_v14  ;;  %v722_v14 = vsel %vm674_vm0, %v7971_v11, %v4866_v48  ;;  %v778_v32 = vsel %vm731_vm1, %v721_v13, %v4870_v17  ;;  %v4899_v24 = vpop.permute.xlu0 %4898  ;;  %v4906_v27 = vunpack.i.h.bf16 %v4904_v55  ;;  %v4905_v26 = vunpack.i.l.bf16 %v4904_v55  ;;  %v5381_v13 = vld [vmem:[%s7947_s5 + $0x20] sm:$0xff]  }
 0x11b   :  { %v779_v51 = vsel %vm731_vm1, %v722_v14, %v4871_v46  ;;  %v835_v11 = vsel %vm788_vm2, %v778_v32, %v4875_v3  ;;  %v4901_v8 = vunpack.i.h.bf16 %v4899_v24  ;;  %v4900_v34 = vunpack.i.l.bf16 %v4899_v24 }
 0x11c   :  { %v836_v50 = vsel %vm788_vm2, %v779_v51, %v4876_v40  ;;  %v5382_v51 = vld [vmem:[%s7947_s5 + $0x28] sm:$0xff]   ;;  %v7972_v32 = vpack.c.bf16 %v5966_v22, %v5961_v20  ;;  %v925_v24 = vsub.s32 0, %v6510_v62 }
 0x11d   :  { %v891_v18 = vpack.c.bf16 %v836_v50, %v835_v11  ;;  %v4914_v44 = vpop.permute.xlu1 %4913  ;;  %v783_v49 = vsel %vm731_vm1, %v726_v61, %v4901_v8  ;;  %v5386_v61 = vld [vmem:[%s7947_s5 + $0x48] sm:$0xff]  }
 0x11e   :  { %v4909_v25 = vpop.permute.xlu0 %4908  ;;  %v4916_v12 = vunpack.i.h.bf16 %v4914_v44  ;;  %v840_v17 = vsel %vm788_vm2, %v783_v49, %v4906_v27 }
 0x11f   :  { %v4911_v47 = vunpack.i.h.bf16 %v4909_v25  ;;  %v4910_v48 = vunpack.i.l.bf16 %v4909_v25 }
 0x121   :  { %1350 = vmatmul.mubr.bf16.gmra.mrb[80].mxu0 %v885_v59  ;;  %v724_v59 = vsel %vm674_vm0, %v6076_v16, %v4881_v58  ;;  %v728_v45 = vsel %vm674_vm0, %v6120_v23, %v4911_v47  ;;  %v727_v63 = vsel %vm674_vm0, %v6115_v21, %v4910_v48  ;;  %v4924_v14 = vpop.permute.xlu1 %4923 }
 0x122   :  { %4192 = vmatprep.mubr.msk.bf16.mxu0 %vm674_vm0, %v888_v39  ;;  %v5377_v39 = vld [vmem:[%s7947_s5] sm:$0xff]   ;;  %v781_v16 = vsel %vm731_vm1, %v724_v59, %v4886_v57  ;;  %v785_v23 = vsel %vm731_vm1, %v728_v45, %v4916_v12  ;;  %v4926_v21 = vunpack.i.h.bf16 %v4924_v14  ;;  %v4925_v40 = vunpack.i.l.bf16 %v4924_v14  ;;  %v5383_v59 = vld [vmem:[%s7947_s5 + $0x30] sm:$0xff]  }
 0x123   :  { %2067 = vmatpush1.bf16.msra.mxu1 %v5377_v39  ;;  %v838_v15 = vsel %vm788_vm2, %v781_v16, %v4891_v42 }
 0x124   :  { %2068 = vmatprep.subr.bf16.mxu1 %v5555_v7  ;;  %v893_v54 = vpack.c.bf16 %v838_v15, %v837_v36  ;;  %v730_v20 = vsel %vm674_vm0, %v6146_v4, %v4926_v21  ;;  %v729_v22 = vsel %vm674_vm0, %v6141_v2, %v4925_v40  ;;  %v5384_v2 = vld [vmem:[%s7947_s5 + $0x38] sm:$0xff]   ;;  %v5385_v15 = vld [vmem:[%s7947_s5 + $0x40] sm:$0xff]  }
 0x125   :  { %v4934_v57 = vpop.permute.xlu1 %4933 }
 0x126   :  { %v4936_v1 = vunpack.i.h.bf16 %v4934_v57 }
 0x127   :  { %2069 = vmatpush1.bf16.msra.mxu1 %v5378_v37  ;;  %v921_v37 = vld [vmem:[%s7944_s2] sm:$0x3] }
 0x128   :  { %2070 = vmatprep.subr.bf16.mxu1 %v5555_v7 }
 0x129   :  { %1360 = vmatmul.mubr.bf16.gmra.mrb[84].mxu0 %v887_v30  ;;  %v896_v30 = vpack.c.bf16 %v6190_v29, %v6185_v53  ;;  %v4915_v53 = vunpack.i.l.bf16 %v4914_v44  ;;  %v4919_v29 = vpop.permute.xlu0 %4918  ;;  %v5387_v44 = vld [vmem:[%s7947_s5 + $0x50] ss:$0 sps:$4 sm:$0x11]  }
 0x12a   :  { %4193 = vmatprep.mubr.msk.bf16.mxu0 %vm674_vm0, %v890_v60  ;;  %v725_v60 = vsel %vm674_vm0, %v6092_v43, %v4895_v6  ;;  %v5380_v43 = vld [vmem:[%s7947_s5 + $0x18] sm:$0xff]   ;;  %v929_v6 = vsub.s32 1, %v6510_v62  ;;  %s5556_s5 = smov 122  }
 0x12b   :  { %2071 = vmatpush1.bf16.msra.mxu1 %v5379_v35  ;;  %v782_v52 = vsel %vm731_vm1, %v725_v60, %v4900_v34  ;;  %v784_v33 = vsel %vm731_vm1, %v727_v63, %v4915_v53  ;;  %v6530_v34 = vrot.slane %v921_v37, %v925_v24 }
 0x12c   :  { %2072 = vmatprep.subr.bf16.mxu1 %v5555_v7  ;;  %v839_v46 = vsel %vm788_vm2, %v782_v52, %v4905_v26  ;;  %v6534_v35 = vrot.slane %v921_v37, %v929_v6 }
 0x12d   :  { %v895_v10 = vpack.c.bf16 %v840_v17, %v839_v46  ;;  %v4929_v3 = vpop.permute.xlu0 %4928 }
 0x12e   :  { %v4931_v11 = vunpack.i.h.bf16 %v4929_v3  ;;  %v4930_v50 = vunpack.i.l.bf16 %v4929_v3 }
 0x12f   :  { %2073 = vmatpush1.bf16.msra.mxu1 %v5380_v43  ;;  %v2064_v43 = vsel %vm2062_vm3, %v5387_v44, 0 }
 0x130   :  { %2074 = vmatprep.subr.bf16.mxu1 %v5555_v7  ;;  %v787_v42 = vsel %vm731_vm1, %v730_v20, %v4931_v11  ;;  %v786_v28 = vsel %vm731_vm1, %v729_v22, %v4930_v50 }
 0x131   :  { %1370 = vmatmul.mubr.bf16.gmra.mrb[88].mxu0 %v889_v38  ;;  %v4920_v38 = vunpack.i.l.bf16 %v4919_v29  ;;  %v844_v16 = vsel %vm788_vm2, %v787_v42, %v4936_v1 }
 0x132   :  { %4194 = vmatprep.mubr.msk.bf16.mxu0 %vm674_vm0, %v892_v9  ;;  %v4921_v9 = vunpack.i.h.bf16 %v4919_v29 }
 0x133   :  { %2075 = vmatpush1.bf16.msra.mxu1 %v5381_v13  ;;  %v841_v58 = vsel %vm788_vm2, %v784_v33, %v4920_v38 }
 0x134   :  { %2076 = vmatprep.subr.bf16.mxu1 %v5555_v7  ;;  %v842_v31 = vsel %vm788_vm2, %v785_v23, %v4921_v9 }
 0x135   :  { %v897_v39 = vpack.c.bf16 %v842_v31, %v841_v58 }
 0x137   :  { %2077 = vmatpush1.bf16.msra.mxu1 %v5382_v51 }
 0x138   :  { %2078 = vmatprep.subr.bf16.mxu1 %v5555_v7 }
 0x139   :  { %1380 = vmatmul.mubr.bf16.gmra.mrb[92].mxu0 %v891_v18  ;;  %v900_v18 = vpack.c.bf16 %v109_v0, %v108_v5 }
 0x13a   :  { %4195 = vmatprep.mubr.msk.bf16.mxu0 %vm674_vm0, %v894_v19  ;;  %v4935_v19 = vunpack.i.l.bf16 %v4934_v57 }
 0x13b   :  { %2079 = vmatpush1.bf16.msra.mxu1 %v5383_v59 }
 0x13c   :  { %2080 = vmatprep.subr.bf16.mxu1 %v5555_v7  ;;  %v843_v4 = vsel %vm788_vm2, %v786_v28, %v4935_v19 }
 0x13d   :  { %v899_v36 = vpack.c.bf16 %v844_v16, %v843_v4 }
 0x13f   :  { %2081 = vmatpush1.bf16.msra.mxu1 %v5384_v2 }
 0x140   :  { %2082 = vmatprep.subr.bf16.mxu1 %v5555_v7 }
 0x141   :  { %1390 = vmatmul.mubr.bf16.gmra.mrb[96].mxu0 %v893_v54 }
 0x142   :  { %4196 = vmatprep.mubr.msk.bf16.mxu0 %vm674_vm0, %v896_v30 }
 0x143   :  { %2083 = vmatpush1.bf16.msra.mxu1 %v5385_v15 }
 0x144   :  { %2084 = vmatprep.subr.bf16.mxu1 %v5555_v7 }
 0x147   :  { %2085 = vmatpush1.bf16.msra.mxu1 %v5386_v61 }
 0x148   :  { %2086 = vmatprep.subr.bf16.mxu1 %v5555_v7 }
 0x149   :  { %1400 = vmatmul.mubr.bf16.gmra.mrb[100].mxu0 %v895_v10 }
 0x14a   :  { %4197 = vmatprep.mubr.msk.bf16.mxu0 %vm674_vm0, %v7972_v32 }
 0x14b   :  { %2087 = vmatpush1.bf16.msra.mxu1 %v2064_v43 }
 0x151   :  { %1410 = vmatmul.mubr.bf16.gmra.mrb[104].mxu0 %v897_v39 }
 0x152   :  { %4198 = vmatprep.mubr.msk.bf16.mxu0 %vm674_vm0, %v900_v18 }
 0x154   :  { %v1151_v56 = vpop.f32.mrb[0].mxu0 }
 0x155   :  { %v1153_v55 = vpop.f32.mrb[1].mxu0  ;;  %v1152_v60 = vadd.f32 %v1151_v56, %v6530_v34 }
 0x156   :  { %v1155_v8 = vpop.f32.mrb[2].mxu0  ;;  %v1154_v30 = vadd.f32 %v1153_v55, %v6534_v35 }
 0x157   :  { %v1157_v25 = vpop.f32.mrb[3].mxu0  ;;  %v1156_v27 = vadd.f32 %v1155_v8, %v6530_v34  ;;  %v1430_v12 = vmax.f32 %v1152_v60, 0.0 }
 0x158   :  { %v1158_v48 = vadd.f32 %v1157_v25, %v6534_v35  ;;  %v1431_v63 = vmax.f32 %v1154_v30, 0.0 }
 0x159   :  { %1420 = vmatmul.mubr.bf16.gmra.mrb[108].mxu0 %v899_v36  ;;  %v1432_v14 = vmax.f32 %v1156_v27, 0.0 }
 0x15a   :  { %v1433_v38 = vmax.f32 %v1158_v48, 0.0 }
 0x15c   :  { %v1161_v54 = vpop.f32.mrb[4].mxu0 }
 0x15d   :  { %v1162_v26 = vadd.f32 %v1161_v54, %v6530_v34  ;;  %v1163_v47 = vpop.f32.mrb[5].mxu0 }
 0x15e   :  { %v1164_v49 = vadd.f32 %v1163_v47, %v6534_v35  ;;  %v1165_v52 = vpop.f32.mrb[6].mxu0 }
 0x15f   :  { %v1434_v53 = vmax.f32 %v1162_v26, 0.0  ;;  %v1166_v29 = vadd.f32 %v1165_v52, %v6530_v34  ;;  %v1167_v45 = vpop.f32.mrb[7].mxu0 }
 0x160   :  { %v1435_v46 = vmax.f32 %v1164_v49, 0.0  ;;  %v1168_v17 = vadd.f32 %v1167_v45, %v6534_v35 }
 0x161   :  { %v6552_v13 = vmax.f32 %v1430_v12, %v1434_v53  ;;  %v1436_v9 = vmax.f32 %v1166_v29, 0.0 }
 0x162   :  { %v6554_v10 = vmax.f32 %v1431_v63, %v1435_v46  ;;  %v1437_v33 = vmax.f32 %v1168_v17, 0.0 }
 0x163   :  { %v6556_v23 = vmax.f32 %v1432_v14, %v1436_v9 }
 0x164   :  { %v6558_v21 = vmax.f32 %v1433_v38, %v1437_v33  ;;  %v1171_v40 = vpop.f32.mrb[8].mxu0  ;;  %v4937_v3 = vpack.i.bf16 %v6554_v10, %v6552_v13 }
 0x165   :  { %v1173_v51 = vpop.f32.mrb[9].mxu0  ;;  %v1172_v11 = vadd.f32 %v1171_v40, %v6530_v34 }
 0x166   :  { %v1175_v32 = vpop.f32.mrb[10].mxu0  ;;  %4938 = vrot.lane.b32.xlu0 %v4937_v3, %s5556_s5  ;;  %v4942_v58 = vpack.i.bf16 %v6558_v21, %v6556_v23  ;;  %v1174_v50 = vadd.f32 %v1173_v51, %v6534_v35 }
 0x167   :  { %v1177_v31 = vpop.f32.mrb[11].mxu0  ;;  %v1176_v41 = vadd.f32 %v1175_v32, %v6530_v34  ;;  %v1438_v59 = vmax.f32 %v1172_v11, 0.0 }
 0x168   :  { %4943 = vrot.lane.b32.xlu1 %v4942_v58, %s5556_s5  ;;  %v1178_v20 = vadd.f32 %v1177_v31, %v6534_v35  ;;  %v1439_v42 = vmax.f32 %v1174_v50, 0.0 }
 0x169   :  { %v1440_v4 = vmax.f32 %v1176_v41, 0.0 }
 0x16a   :  { %v1441_v56 = vmax.f32 %v1178_v20, 0.0 }
 0x16c   :  { %v1181_v57 = vpop.f32.mrb[12].mxu0 }
 0x16d   :  { %v1182_v5 = vadd.f32 %v1181_v57, %v6530_v34  ;;  %v1183_v0 = vpop.f32.mrb[13].mxu0 }
 0x16e   :  { %v1184_v22 = vadd.f32 %v1183_v0, %v6534_v35  ;;  %v1185_v39 = vpop.f32.mrb[14].mxu0 }
 0x16f   :  { %v1442_v1 = vmax.f32 %v1182_v5, 0.0  ;;  %v1186_v19 = vadd.f32 %v1185_v39, %v6530_v34  ;;  %v1187_v18 = vpop.f32.mrb[15].mxu0 }
 0x170   :  { %v1443_v28 = vmax.f32 %v1184_v22, 0.0  ;;  %v1188_v2 = vadd.f32 %v1187_v18, %v6534_v35 }
 0x171   :  { %v6574_v16 = vmax.f32 %v1438_v59, %v1442_v1  ;;  %v1444_v37 = vmax.f32 %v1186_v19, 0.0 }
 0x172   :  { %v6576_v55 = vmax.f32 %v1439_v42, %v1443_v28  ;;  %v1445_v36 = vmax.f32 %v1188_v2, 0.0 }
 0x173   :  { %v6578_v15 = vmax.f32 %v1440_v4, %v1444_v37 }
 0x174   :  { %v6580_v8 = vmax.f32 %v1441_v56, %v1445_v36  ;;  %v1191_v25 = vpop.f32.mrb[16].mxu0  ;;  %v4947_v61 = vpack.i.bf16 %v6576_v55, %v6574_v16 }
 0x175   :  { %v1193_v60 = vpop.f32.mrb[17].mxu0  ;;  %v1192_v27 = vadd.f32 %v1191_v25, %v6530_v34 }
 0x176   :  { %v1195_v30 = vpop.f32.mrb[18].mxu0  ;;  %4948 = vrot.lane.b32.xlu0 %v4947_v61, %s5556_s5  ;;  %v4952_v54 = vpack.i.bf16 %v6580_v8, %v6578_v15  ;;  %v1194_v26 = vadd.f32 %v1193_v60, %v6534_v35 }
 0x177   :  { %v1197_v44 = vpop.f32.mrb[19].mxu0  ;;  %v1196_v48 = vadd.f32 %v1195_v30, %v6530_v34  ;;  %v1446_v29 = vmax.f32 %v1192_v27, 0.0 }
 0x178   :  { %4953 = vrot.lane.b32.xlu1 %v4952_v54, %s5556_s5  ;;  %v1198_v43 = vadd.f32 %v1197_v44, %v6534_v35  ;;  %v1447_v17 = vmax.f32 %v1194_v26, 0.0 }
 0x179   :  { %v1448_v38 = vmax.f32 %v1196_v48, 0.0 }
 0x17a   :  { %v1449_v3 = vmax.f32 %v1198_v43, 0.0 }
 0x17c   :  { %v1201_v47 = vpop.f32.mrb[20].mxu0 }
 0x17d   :  { %v1202_v49 = vadd.f32 %v1201_v47, %v6530_v34  ;;  %v1203_v52 = vpop.f32.mrb[21].mxu0 }
 0x17e   :  { %v1204_v12 = vadd.f32 %v1203_v52, %v6534_v35  ;;  %v1205_v53 = vpop.f32.mrb[22].mxu0 }
 0x17f   :  { %v1450_v45 = vmax.f32 %v1202_v49, 0.0  ;;  %v1206_v63 = vadd.f32 %v1205_v53, %v6530_v34  ;;  %v1207_v46 = vpop.f32.mrb[23].mxu0 }
 0x180   :  { %v1451_v14 = vmax.f32 %v1204_v12, 0.0  ;;  %v1208_v9 = vadd.f32 %v1207_v46, %v6534_v35 }
 0x181   :  { %v6596_v33 = vmax.f32 %v1446_v29, %v1450_v45  ;;  %v1452_v40 = vmax.f32 %v1206_v63, 0.0 }
 0x182   :  { %v6598_v51 = vmax.f32 %v1447_v17, %v1451_v14  ;;  %v1453_v32 = vmax.f32 %v1208_v9, 0.0 }
 0x183   :  { %v6600_v58 = vmax.f32 %v1448_v38, %v1452_v40 }
 0x184   :  { %v6602_v31 = vmax.f32 %v1449_v3, %v1453_v32  ;;  %v1211_v11 = vpop.f32.mrb[24].mxu0  ;;  %v4957_v50 = vpack.i.bf16 %v6598_v51, %v6596_v33 }
 0x185   :  { %v1213_v57 = vpop.f32.mrb[25].mxu0  ;;  %v1212_v20 = vadd.f32 %v1211_v11, %v6530_v34 }
 0x186   :  { %v1215_v41 = vpop.f32.mrb[26].mxu0  ;;  %4958 = vrot.lane.b32.xlu0 %v4957_v50, %s5556_s5  ;;  %v4962_v5 = vpack.i.bf16 %v6602_v31, %v6600_v58  ;;  %v1214_v22 = vadd.f32 %v1213_v57, %v6534_v35 }
 0x187   :  { %v1217_v0 = vpop.f32.mrb[27].mxu0  ;;  %v1216_v59 = vadd.f32 %v1215_v41, %v6530_v34  ;;  %v1454_v2 = vmax.f32 %v1212_v20, 0.0 }
 0x188   :  { %4963 = vrot.lane.b32.xlu1 %v4962_v5, %s5556_s5  ;;  %v1218_v18 = vadd.f32 %v1217_v0, %v6534_v35  ;;  %v1455_v36 = vmax.f32 %v1214_v22, 0.0 }
 0x189   :  { %v1456_v60 = vmax.f32 %v1216_v59, 0.0 }
 0x18a   :  { %v1457_v44 = vmax.f32 %v1218_v18, 0.0 }
 0x18c   :  { %v1221_v39 = vpop.f32.mrb[28].mxu0 }
 0x18d   :  { %v1222_v1 = vadd.f32 %v1221_v39, %v6530_v34  ;;  %v1223_v19 = vpop.f32.mrb[29].mxu0 }
 0x18e   :  { %v1224_v42 = vadd.f32 %v1223_v19, %v6534_v35  ;;  %v1225_v28 = vpop.f32.mrb[30].mxu0 }
 0x18f   :  { %v1458_v4 = vmax.f32 %v1222_v1, 0.0  ;;  %v1226_v37 = vadd.f32 %v1225_v28, %v6530_v34  ;;  %v1227_v56 = vpop.f32.mrb[31].mxu0 }
 0x190   :  { %v1459_v25 = vmax.f32 %v1224_v42, 0.0  ;;  %v1228_v61 = vadd.f32 %v1227_v56, %v6534_v35 }
 0x191   :  { %v6618_v30 = vmax.f32 %v1454_v2, %v1458_v4  ;;  %v1460_v54 = vmax.f32 %v1226_v37, 0.0 }
 0x192   :  { %v6620_v27 = vmax.f32 %v1455_v36, %v1459_v25  ;;  %v1461_v26 = vmax.f32 %v1228_v61, 0.0 }
 0x193   :  { %v6622_v47 = vmax.f32 %v1456_v60, %v1460_v54 }
 0x194   :  { %v6624_v48 = vmax.f32 %v1457_v44, %v1461_v26  ;;  %v1231_v49 = vpop.f32.mrb[32].mxu0  ;;  %v4967_v52 = vpack.i.bf16 %v6620_v27, %v6618_v30 }
 0x195   :  { %v1233_v43 = vpop.f32.mrb[33].mxu0  ;;  %v1232_v45 = vadd.f32 %v1231_v49, %v6530_v34 }
 0x196   :  { %v1235_v12 = vpop.f32.mrb[34].mxu0  ;;  %4968 = vrot.lane.b32.xlu0 %v4967_v52, %s5556_s5  ;;  %v4972_v53 = vpack.i.bf16 %v6624_v48, %v6622_v47  ;;  %v1234_v63 = vadd.f32 %v1233_v43, %v6534_v35 }
 0x197   :  { %v1237_v29 = vpop.f32.mrb[35].mxu0  ;;  %v1236_v17 = vadd.f32 %v1235_v12, %v6530_v34  ;;  %v1462_v32 = vmax.f32 %v1232_v45, 0.0 }
 0x198   :  { %4973 = vrot.lane.b32.xlu1 %v4972_v53, %s5556_s5  ;;  %v1238_v38 = vadd.f32 %v1237_v29, %v6534_v35  ;;  %v1463_v41 = vmax.f32 %v1234_v63, 0.0 }
 0x199   :  { %v1464_v20 = vmax.f32 %v1236_v17, 0.0 }
 0x19a   :  { %v1465_v59 = vmax.f32 %v1238_v38, 0.0 }
 0x19c   :  { %v1241_v46 = vpop.f32.mrb[36].mxu0 }
 0x19d   :  { %v1242_v14 = vadd.f32 %v1241_v46, %v6530_v34  ;;  %v1243_v9 = vpop.f32.mrb[37].mxu0 }
 0x19e   :  { %v1244_v40 = vadd.f32 %v1243_v9, %v6534_v35  ;;  %v1245_v3 = vpop.f32.mrb[38].mxu0 }
 0x19f   :  { %v1466_v11 = vmax.f32 %v1242_v14, 0.0  ;;  %v1246_v50 = vadd.f32 %v1245_v3, %v6530_v34  ;;  %v1247_v57 = vpop.f32.mrb[39].mxu0 }
 0x1a0   :  { %v1467_v5 = vmax.f32 %v1244_v40, 0.0  ;;  %v1248_v0 = vadd.f32 %v1247_v57, %v6534_v35 }
 0x1a1   :  { %v6640_v22 = vmax.f32 %v1462_v32, %v1466_v11  ;;  %v1468_v39 = vmax.f32 %v1246_v50, 0.0 }
 0x1a2   :  { %v6642_v1 = vmax.f32 %v1463_v41, %v1467_v5  ;;  %v1469_v19 = vmax.f32 %v1248_v0, 0.0 }
 0x1a3   :  { %v6644_v18 = vmax.f32 %v1464_v20, %v1468_v39 }
 0x1a4   :  { %v6646_v42 = vmax.f32 %v1465_v59, %v1469_v19  ;;  %v1251_v28 = vpop.f32.mrb[40].mxu0  ;;  %v4977_v2 = vpack.i.bf16 %v6642_v1, %v6640_v22 }
 0x1a5   :  { %v1253_v4 = vpop.f32.mrb[41].mxu0  ;;  %v1252_v25 = vadd.f32 %v1251_v28, %v6530_v34 }
 0x1a6   :  { %v1255_v37 = vpop.f32.mrb[42].mxu0  ;;  %4978 = vrot.lane.b32.xlu0 %v4977_v2, %s5556_s5  ;;  %v4982_v56 = vpack.i.bf16 %v6646_v42, %v6644_v18  ;;  %v1254_v61 = vadd.f32 %v1253_v4, %v6534_v35 }
 0x1a7   :  { %v1257_v36 = vpop.f32.mrb[43].mxu0  ;;  %v1256_v54 = vadd.f32 %v1255_v37, %v6530_v34  ;;  %v1470_v12 = vmax.f32 %v1252_v25, 0.0 }
 0x1a8   :  { %4983 = vrot.lane.b32.xlu1 %v4982_v56, %s5556_s5  ;;  %v1258_v49 = vadd.f32 %v1257_v36, %v6534_v35  ;;  %v1471_v63 = vmax.f32 %v1254_v61, 0.0 }
 0x1a9   :  { %v1472_v14 = vmax.f32 %v1256_v54, 0.0 }
 0x1aa   :  { %v1473_v40 = vmax.f32 %v1258_v49, 0.0 }
 0x1ac   :  { %v1261_v60 = vpop.f32.mrb[44].mxu0 }
 0x1ad   :  { %v1262_v44 = vadd.f32 %v1261_v60, %v6530_v34  ;;  %v1263_v26 = vpop.f32.mrb[45].mxu0 }
 0x1ae   :  { %v1264_v52 = vadd.f32 %v1263_v26, %v6534_v35  ;;  %v1265_v43 = vpop.f32.mrb[46].mxu0 }
 0x1af   :  { %v1474_v53 = vmax.f32 %v1262_v44, 0.0  ;;  %v1266_v29 = vadd.f32 %v1265_v43, %v6530_v34  ;;  %v1267_v45 = vpop.f32.mrb[47].mxu0 }
 0x1b0   :  { %v1475_v46 = vmax.f32 %v1264_v52, 0.0  ;;  %v1268_v17 = vadd.f32 %v1267_v45, %v6534_v35 }
 0x1b1   :  { %v6662_v9 = vmax.f32 %v1470_v12, %v1474_v53  ;;  %v1476_v38 = vmax.f32 %v1266_v29, 0.0 }
 0x1b2   :  { %v6664_v3 = vmax.f32 %v1471_v63, %v1475_v46  ;;  %v1477_v32 = vmax.f32 %v1268_v17, 0.0 }
 0x1b3   :  { %v6666_v11 = vmax.f32 %v1472_v14, %v1476_v38 }
 0x1b4   :  { %v6668_v50 = vmax.f32 %v1473_v40, %v1477_v32  ;;  %v1271_v57 = vpop.f32.mrb[48].mxu0  ;;  %v4987_v41 = vpack.i.bf16 %v6664_v3, %v6662_v9 }
 0x1b5   :  { %v1273_v5 = vpop.f32.mrb[49].mxu0  ;;  %v1272_v59 = vadd.f32 %v1271_v57, %v6530_v34 }
 0x1b6   :  { %v1275_v0 = vpop.f32.mrb[50].mxu0  ;;  %4988 = vrot.lane.b32.xlu0 %v4987_v41, %s5556_s5  ;;  %v4992_v20 = vpack.i.bf16 %v6668_v50, %v6666_v11  ;;  %v1274_v19 = vadd.f32 %v1273_v5, %v6534_v35 }
 0x1b7   :  { %v1277_v39 = vpop.f32.mrb[51].mxu0  ;;  %v1276_v2 = vadd.f32 %v1275_v0, %v6530_v34  ;;  %v1478_v61 = vmax.f32 %v1272_v59, 0.0 }
 0x1b8   :  { %4993 = vrot.lane.b32.xlu1 %v4992_v20, %s5556_s5  ;;  %v1278_v56 = vadd.f32 %v1277_v39, %v6534_v35  ;;  %v1479_v26 = vmax.f32 %v1274_v19, 0.0 }
 0x1b9   :  { %v1480_v43 = vmax.f32 %v1276_v2, 0.0 }
 0x1ba   :  { %v1481_v29 = vmax.f32 %v1278_v56, 0.0 }
 0x1bc   :  { %v1281_v28 = vpop.f32.mrb[52].mxu0 }
 0x1bd   :  { %v1282_v4 = vadd.f32 %v1281_v28, %v6530_v34  ;;  %v1283_v37 = vpop.f32.mrb[53].mxu0 }
 0x1be   :  { %v1284_v36 = vadd.f32 %v1283_v37, %v6534_v35  ;;  %v1285_v25 = vpop.f32.mrb[54].mxu0 }
 0x1bf   :  { %v1482_v60 = vmax.f32 %v1282_v4, 0.0  ;;  %v1286_v54 = vadd.f32 %v1285_v25, %v6530_v34  ;;  %v1287_v44 = vpop.f32.mrb[55].mxu0 }
 0x1c0   :  { %v1483_v49 = vmax.f32 %v1284_v36, 0.0  ;;  %v1288_v52 = vadd.f32 %v1287_v44, %v6534_v35 }
 0x1c1   :  { %v6684_v12 = vmax.f32 %v1478_v61, %v1482_v60  ;;  %v1484_v53 = vmax.f32 %v1286_v54, 0.0 }
 0x1c2   :  { %v6686_v45 = vmax.f32 %v1479_v26, %v1483_v49  ;;  %v1485_v63 = vmax.f32 %v1288_v52, 0.0 }
 0x1c3   :  { %v6688_v46 = vmax.f32 %v1480_v43, %v1484_v53 }
 0x1c4   :  { %v6690_v17 = vmax.f32 %v1481_v29, %v1485_v63  ;;  %v1291_v14 = vpop.f32.mrb[56].mxu0  ;;  %v4997_v38 = vpack.i.bf16 %v6686_v45, %v6684_v12 }
 0x1c5   :  { %v1293_v40 = vpop.f32.mrb[57].mxu0  ;;  %v1292_v5 = vadd.f32 %v1291_v14, %v6530_v34 }
 0x1c6   :  { %v1295_v32 = vpop.f32.mrb[58].mxu0  ;;  %4998 = vrot.lane.b32.xlu0 %v4997_v38, %s5556_s5  ;;  %v5002_v57 = vpack.i.bf16 %v6690_v17, %v6688_v46  ;;  %v1294_v0 = vadd.f32 %v1293_v40, %v6534_v35 }
 0x1c7   :  { %v1297_v41 = vpop.f32.mrb[59].mxu0  ;;  %v1296_v39 = vadd.f32 %v1295_v32, %v6530_v34  ;;  %v1486_v37 = vmax.f32 %v1292_v5, 0.0 }
 0x1c8   :  { %5003 = vrot.lane.b32.xlu1 %v5002_v57, %s5556_s5  ;;  %v1298_v28 = vadd.f32 %v1297_v41, %v6534_v35  ;;  %v1487_v61 = vmax.f32 %v1294_v0, 0.0 }
 0x1c9   :  { %v1488_v44 = vmax.f32 %v1296_v39, 0.0 }
 0x1ca   :  { %v1489_v52 = vmax.f32 %v1298_v28, 0.0 }
 0x1cc   :  { %v1301_v20 = vpop.f32.mrb[60].mxu0 }
 0x1cd   :  { %v1302_v59 = vadd.f32 %v1301_v20, %v6530_v34  ;;  %v1303_v19 = vpop.f32.mrb[61].mxu0 }
 0x1ce   :  { %v1304_v2 = vadd.f32 %v1303_v19, %v6534_v35  ;;  %v1305_v4 = vpop.f32.mrb[62].mxu0 }
 0x1cf   :  { %v1490_v56 = vmax.f32 %v1302_v59, 0.0  ;;  %v1306_v36 = vadd.f32 %v1305_v4, %v6530_v34  ;;  %v1307_v25 = vpop.f32.mrb[63].mxu0 }
 0x1d0   :  { %v1491_v60 = vmax.f32 %v1304_v2, 0.0  ;;  %v1308_v54 = vadd.f32 %v1307_v25, %v6534_v35 }
 0x1d1   :  { %v6706_v26 = vmax.f32 %v1486_v37, %v1490_v56  ;;  %v1492_v49 = vmax.f32 %v1306_v36, 0.0 }
 0x1d2   :  { %v6708_v43 = vmax.f32 %v1487_v61, %v1491_v60  ;;  %v1493_v53 = vmax.f32 %v1308_v54, 0.0 }
 0x1d3   :  { %v6710_v29 = vmax.f32 %v1488_v44, %v1492_v49 }
 0x1d4   :  { %v5007_v63 = vpack.i.bf16 %v6708_v43, %v6706_v26  ;;  %v6714_v14 = vmax.f32 %v1489_v52, %v1493_v53  ;;  %v1311_v38 = vpop.f32.mrb[64].mxu0 }
 0x1d5   :  { %v1313_v40 = vpop.f32.mrb[65].mxu0  ;;  %v1312_v59 = vadd.f32 %v1311_v38, %v6530_v34 }
 0x1d6   :  { %v5012_v32 = vpack.i.bf16 %v6714_v14, %v6710_v29  ;;  %v1315_v57 = vpop.f32.mrb[66].mxu0  ;;  %5008 = vrot.lane.b32.xlu0 %v5007_v63, %s5556_s5  ;;  %v1314_v4 = vadd.f32 %v1313_v40, %v6534_v35 }
 0x1d7   :  { %v1317_v41 = vpop.f32.mrb[67].mxu0  ;;  %v1316_v37 = vadd.f32 %v1315_v57, %v6530_v34  ;;  %v1494_v38 = vmax.f32 %v1312_v59, 0.0 }
 0x1d8   :  { %5013 = vrot.lane.b32.xlu1 %v5012_v32, %s5556_s5  ;;  %v4939_v5 = vpop.permute.xlu0 %4938  ;;  %v1318_v44 = vadd.f32 %v1317_v41, %v6534_v35 }
 0x1d9   :  { %v4941_v0 = vunpack.i.h.bf16 %v4939_v5  ;;  %v4940_v20 = vunpack.i.l.bf16 %v4939_v5 }
 0x1da   :  { %v4944_v39 = vpop.permute.xlu1 %4943 }
 0x1db   :  { %v1767_v19 = vsel %vm1766_vm4, %v4940_v20, %v4941_v0  ;;  %v4946_v28 = vunpack.i.h.bf16 %v4944_v39  ;;  %v4945_v2 = vunpack.i.l.bf16 %v4944_v39  ;;  %v1852_v60 = vmax.f32 %v6554_v10, %v4941_v0 }
 0x1dc   :  { %v1321_v56 = vpop.f32.mrb[68].mxu0  ;;  %v1851_v53 = vmax.f32 %v6552_v13, %v1767_v19  ;;  %v1495_v20 = vmax.f32 %v1314_v4, 0.0  ;;  %v1496_v0 = vmax.f32 %v1316_v37, 0.0  ;;  %v1497_v13 = vmax.f32 %v1318_v44, 0.0 }
 0x1dd   :  { %v1768_v36 = vsel %vm1766_vm4, %v4945_v2, %v4946_v28  ;;  %v1322_v25 = vadd.f32 %v1321_v56, %v6530_v34  ;;  %v1323_v61 = vpop.f32.mrb[69].mxu0  ;;  %v1854_v54 = vmax.f32 %v6558_v21, %v4946_v28 }
 0x1de   :  { %v1324_v49 = vadd.f32 %v1323_v61, %v6534_v35  ;;  %v1325_v52 = vpop.f32.mrb[70].mxu0  ;;  %v1853_v63 = vmax.f32 %v6556_v23, %v1768_v36 }
 0x1df   :  { %v1498_v40 = vmax.f32 %v1322_v25, 0.0  ;;  %v1326_v32 = vadd.f32 %v1325_v52, %v6530_v34  ;;  %v1327_v57 = vpop.f32.mrb[71].mxu0  ;;  %v1908_v5 = vpack.c.bf16 %v1854_v54, %v1852_v60 }
 0x1e0   :  { %v1499_v39 = vmax.f32 %v1324_v49, 0.0  ;;  %v1328_v10 = vadd.f32 %v1327_v57, %v6534_v35  ;;  %v1907_v21 = vpack.c.bf16 %v1853_v63, %v1851_v53 }
 0x1e1   :  { %v6734_v41 = vmax.f32 %v1494_v38, %v1498_v40  ;;  %v1500_v28 = vmax.f32 %v1326_v32, 0.0  ;;  %4210 = vmatprep.mubr.msk.bf16.mxu1 %vm2019_vm5, %v1908_v5 }
 0x1e2   :  { %v6737_v19 = vmax.f32 %v1495_v20, %v1499_v39  ;;  %v1501_v23 = vmax.f32 %v1328_v10, 0.0  ;;  %2099 = vmatmul.mubr.bf16.vlgmr.msra.gmra.mrb[0].mxu1 %v1907_v21 }
 0x1e3   :  { %v6739_v59 = vmax.f32 %v1496_v0, %v1500_v28 }
 0x1e4   :  { %v5017_v2 = vpack.i.bf16 %v6737_v19, %v6734_v41  ;;  %v6743_v4 = vmax.f32 %v1497_v13, %v1501_v23  ;;  %v1331_v56 = vpop.f32.mrb[72].mxu0 }
 0x1e5   :  { %v1333_v36 = vpop.f32.mrb[73].mxu0  ;;  %v1332_v52 = vadd.f32 %v1331_v56, %v6530_v34 }
 0x1e6   :  { %v5022_v37 = vpack.i.bf16 %v6743_v4, %v6739_v59  ;;  %v1335_v25 = vpop.f32.mrb[74].mxu0  ;;  %5018 = vrot.lane.b32.xlu0 %v5017_v2, %s5556_s5  ;;  %v1334_v40 = vadd.f32 %v1333_v36, %v6534_v35 }
 0x1e7   :  { %v1337_v61 = vpop.f32.mrb[75].mxu0  ;;  %v1336_v32 = vadd.f32 %v1335_v25, %v6530_v34  ;;  %v1502_v56 = vmax.f32 %v1332_v52, 0.0 }
 0x1e8   :  { %5023 = vrot.lane.b32.xlu1 %v5022_v37, %s5556_s5  ;;  %v4949_v60 = vpop.permute.xlu0 %4948  ;;  %v1338_v0 = vadd.f32 %v1337_v61, %v6534_v35  ;;  %v1503_v25 = vmax.f32 %v1334_v40, 0.0 }
 0x1e9   :  { %v4951_v54 = vunpack.i.h.bf16 %v4949_v60  ;;  %v4950_v44 = vunpack.i.l.bf16 %v4949_v60 }
 0x1ea   :  { %v4954_v49 = vpop.permute.xlu1 %4953 }
 0x1eb   :  { %v1769_v53 = vsel %vm1766_vm4, %v4950_v44, %v4951_v54  ;;  %v4956_v63 = vunpack.i.h.bf16 %v4954_v49  ;;  %v4955_v38 = vunpack.i.l.bf16 %v4954_v49  ;;  %v1856_v5 = vmax.f32 %v6576_v55, %v4951_v54 }
 0x1ec   :  { %v1341_v57 = vpop.f32.mrb[76].mxu0  ;;  %v1855_v23 = vmax.f32 %v6574_v16, %v1769_v53  ;;  %v1504_v49 = vmax.f32 %v1336_v32, 0.0  ;;  %v1505_v16 = vmax.f32 %v1338_v0, 0.0 }
 0x1ed   :  { %v1858_v20 = vmax.f32 %v6580_v8, %v4956_v63  ;;  %v1770_v39 = vsel %vm1766_vm4, %v4955_v38, %v4956_v63  ;;  %v1342_v10 = vadd.f32 %v1341_v57, %v6530_v34  ;;  %v1343_v21 = vpop.f32.mrb[77].mxu0 }
 0x1ee   :  { %v1344_v28 = vadd.f32 %v1343_v21, %v6534_v35  ;;  %v1345_v13 = vpop.f32.mrb[78].mxu0  ;;  %v1857_v2 = vmax.f32 %v6578_v15, %v1770_v39 }
 0x1ef   :  { %v1910_v36 = vpack.c.bf16 %v1858_v20, %v1856_v5  ;;  %v1506_v37 = vmax.f32 %v1342_v10, 0.0  ;;  %v1346_v55 = vadd.f32 %v1345_v13, %v6530_v34  ;;  %v1347_v8 = vpop.f32.mrb[79].mxu0 }
 0x1f0   :  { %v1507_v60 = vmax.f32 %v1344_v28, 0.0  ;;  %v1348_v54 = vadd.f32 %v1347_v8, %v6534_v35  ;;  %v1909_v44 = vpack.c.bf16 %v1857_v2, %v1855_v23 }
 0x1f1   :  { %v6763_v61 = vmax.f32 %v1502_v56, %v1506_v37  ;;  %v1508_v63 = vmax.f32 %v1346_v55, 0.0  ;;  %4211 = vmatprep.mubr.msk.bf16.mxu1 %vm2019_vm5, %v1910_v36 }
 0x1f2   :  { %v6766_v53 = vmax.f32 %v1503_v25, %v1507_v60  ;;  %v1509_v15 = vmax.f32 %v1348_v54, 0.0  ;;  %2107 = vmatmul.mubr.bf16.gmra.mrb[4].mxu1 %v1909_v44 }
 0x1f3   :  { %v6768_v52 = vmax.f32 %v1504_v49, %v1508_v63 }
 0x1f4   :  { %v5027_v38 = vpack.i.bf16 %v6766_v53, %v6763_v61  ;;  %v6772_v40 = vmax.f32 %v1505_v16, %v1509_v15  ;;  %v1351_v57 = vpop.f32.mrb[80].mxu0 }
 0x1f5   :  { %v1353_v5 = vpop.f32.mrb[81].mxu0  ;;  %v1352_v13 = vadd.f32 %v1351_v57, %v6530_v34 }
 0x1f6   :  { %v5032_v32 = vpack.i.bf16 %v6772_v40, %v6768_v52  ;;  %v1355_v20 = vpop.f32.mrb[82].mxu0  ;;  %5028 = vrot.lane.b32.xlu0 %v5027_v38, %s5556_s5  ;;  %v1354_v36 = vadd.f32 %v1353_v5, %v6534_v35 }
 0x1f7   :  { %v1357_v39 = vpop.f32.mrb[83].mxu0  ;;  %v1356_v37 = vadd.f32 %v1355_v20, %v6530_v34  ;;  %v1510_v57 = vmax.f32 %v1352_v13, 0.0 }
 0x1f8   :  { %5033 = vrot.lane.b32.xlu1 %v5032_v32, %s5556_s5  ;;  %v4959_v10 = vpop.permute.xlu0 %4958  ;;  %v1358_v49 = vadd.f32 %v1357_v39, %v6534_v35  ;;  %v1511_v20 = vmax.f32 %v1354_v36, 0.0 }
 0x1f9   :  { %v4961_v21 = vunpack.i.h.bf16 %v4959_v10  ;;  %v4960_v0 = vunpack.i.l.bf16 %v4959_v10 }
 0x1fa   :  { %v4964_v28 = vpop.permute.xlu1 %4963 }
 0x1fb   :  { %v1771_v23 = vsel %vm1766_vm4, %v4960_v0, %v4961_v21  ;;  %v4966_v2 = vunpack.i.h.bf16 %v4964_v28  ;;  %v4965_v56 = vunpack.i.l.bf16 %v4964_v28  ;;  %v1860_v8 = vmax.f32 %v6598_v51, %v4961_v21 }
 0x1fc   :  { %v1361_v55 = vpop.f32.mrb[84].mxu0  ;;  %v1859_v15 = vmax.f32 %v6596_v33, %v1771_v23  ;;  %v1512_v28 = vmax.f32 %v1356_v37, 0.0  ;;  %v1513_v33 = vmax.f32 %v1358_v49, 0.0 }
 0x1fd   :  { %v1862_v25 = vmax.f32 %v6602_v31, %v4966_v2  ;;  %v1772_v60 = vsel %vm1766_vm4, %v4965_v56, %v4966_v2  ;;  %v1362_v54 = vadd.f32 %v1361_v55, %v6530_v34  ;;  %v1363_v44 = vpop.f32.mrb[85].mxu0 }
 0x1fe   :  { %v1364_v63 = vadd.f32 %v1363_v44, %v6534_v35  ;;  %v1365_v16 = vpop.f32.mrb[86].mxu0  ;;  %v1861_v38 = vmax.f32 %v6600_v58, %v1772_v60 }
 0x1ff   :  { %v1912_v5 = vpack.c.bf16 %v1862_v25, %v1860_v8  ;;  %v1514_v32 = vmax.f32 %v1362_v54, 0.0  ;;  %v1366_v51 = vadd.f32 %v1365_v16, %v6530_v34  ;;  %v1367_v31 = vpop.f32.mrb[87].mxu0 }
 0x200   :  { %v1515_v10 = vmax.f32 %v1364_v63, 0.0  ;;  %v1368_v21 = vadd.f32 %v1367_v31, %v6534_v35  ;;  %v1911_v0 = vpack.c.bf16 %v1861_v38, %v1859_v15 }
 0x201   :  { %v6792_v39 = vmax.f32 %v1510_v57, %v1514_v32  ;;  %v1516_v2 = vmax.f32 %v1366_v51, 0.0  ;;  %4212 = vmatprep.mubr.msk.bf16.mxu1 %vm2019_vm5, %v1912_v5 }
 0x202   :  { %v6795_v23 = vmax.f32 %v1511_v20, %v1515_v10  ;;  %v1517_v58 = vmax.f32 %v1368_v21, 0.0  ;;  %2115 = vmatmul.mubr.bf16.gmra.mrb[8].mxu1 %v1911_v0 }
 0x203   :  { %v6797_v13 = vmax.f32 %v1512_v28, %v1516_v2 }
 0x204   :  { %v5037_v56 = vpack.i.bf16 %v6795_v23, %v6792_v39  ;;  %v6801_v36 = vmax.f32 %v1513_v33, %v1517_v58  ;;  %v1371_v55 = vpop.f32.mrb[88].mxu0 }
 0x205   :  { %v1373_v8 = vpop.f32.mrb[89].mxu0  ;;  %v1372_v16 = vadd.f32 %v1371_v55, %v6530_v34 }
 0x206   :  { %v5042_v37 = vpack.i.bf16 %v6801_v36, %v6797_v13  ;;  %v1375_v25 = vpop.f32.mrb[90].mxu0  ;;  %5038 = vrot.lane.b32.xlu0 %v5037_v56, %s5556_s5  ;;  %v1374_v5 = vadd.f32 %v1373_v8, %v6534_v35 }
 0x207   :  { %v1377_v60 = vpop.f32.mrb[91].mxu0  ;;  %v1376_v32 = vadd.f32 %v1375_v25, %v6530_v34  ;;  %v1518_v55 = vmax.f32 %v1372_v16, 0.0 }
 0x208   :  { %5043 = vrot.lane.b32.xlu1 %v5042_v37, %s5556_s5  ;;  %v4969_v54 = vpop.permute.xlu0 %4968  ;;  %v1378_v28 = vadd.f32 %v1377_v60, %v6534_v35  ;;  %v1519_v25 = vmax.f32 %v1374_v5, 0.0 }
 0x209   :  { %v4971_v44 = vunpack.i.h.bf16 %v4969_v54  ;;  %v4970_v49 = vunpack.i.l.bf16 %v4969_v54 }
 0x20a   :  { %v4974_v63 = vpop.permute.xlu1 %4973 }
 0x20b   :  { %v1773_v15 = vsel %vm1766_vm4, %v4970_v49, %v4971_v44  ;;  %v4976_v38 = vunpack.i.h.bf16 %v4974_v63  ;;  %v4975_v57 = vunpack.i.l.bf16 %v4974_v63  ;;  %v1864_v31 = vmax.f32 %v6620_v27, %v4971_v44 }
 0x20c   :  { %v1381_v51 = vpop.f32.mrb[92].mxu0  ;;  %v1863_v58 = vmax.f32 %v6618_v30, %v1773_v15  ;;  %v1520_v63 = vmax.f32 %v1376_v32, 0.0  ;;  %v1521_v30 = vmax.f32 %v1378_v28, 0.0 }
 0x20d   :  { %v1866_v20 = vmax.f32 %v6624_v48, %v4976_v38  ;;  %v1774_v10 = vsel %vm1766_vm4, %v4975_v57, %v4976_v38  ;;  %v1382_v21 = vadd.f32 %v1381_v51, %v6530_v34  ;;  %v1383_v0 = vpop.f32.mrb[93].mxu0 }
 0x20e   :  { %v1384_v2 = vadd.f32 %v1383_v0, %v6534_v35  ;;  %v1385_v33 = vpop.f32.mrb[94].mxu0  ;;  %v1865_v56 = vmax.f32 %v6622_v47, %v1774_v10 }
 0x20f   :  { %v1914_v8 = vpack.c.bf16 %v1866_v20, %v1864_v31  ;;  %v1522_v37 = vmax.f32 %v1382_v21, 0.0  ;;  %v1386_v27 = vadd.f32 %v1385_v33, %v6530_v34  ;;  %v1387_v48 = vpop.f32.mrb[95].mxu0 }
 0x210   :  { %v1523_v54 = vmax.f32 %v1384_v2, 0.0  ;;  %v1388_v44 = vadd.f32 %v1387_v48, %v6534_v35  ;;  %v1913_v49 = vpack.c.bf16 %v1865_v56, %v1863_v58 }
 0x211   :  { %v6821_v60 = vmax.f32 %v1518_v55, %v1522_v37  ;;  %v1524_v38 = vmax.f32 %v1386_v27, 0.0  ;;  %4213 = vmatprep.mubr.msk.bf16.mxu1 %vm2019_vm5, %v1914_v8 }
 0x212   :  { %v6824_v15 = vmax.f32 %v1519_v25, %v1523_v54  ;;  %v1525_v47 = vmax.f32 %v1388_v44, 0.0  ;;  %2123 = vmatmul.mubr.bf16.gmra.mrb[12].mxu1 %v1913_v49 }
 0x213   :  { %v6826_v16 = vmax.f32 %v1520_v63, %v1524_v38 }
 0x214   :  { %v5047_v57 = vpack.i.bf16 %v6824_v15, %v6821_v60  ;;  %v6830_v5 = vmax.f32 %v1521_v30, %v1525_v47  ;;  %v1391_v51 = vpop.f32.mrb[96].mxu0 }
 0x215   :  { %v1393_v31 = vpop.f32.mrb[97].mxu0  ;;  %v1392_v33 = vadd.f32 %v1391_v51, %v6530_v34 }
 0x216   :  { %v5052_v32 = vpack.i.bf16 %v6830_v5, %v6826_v16  ;;  %v1395_v20 = vpop.f32.mrb[98].mxu0  ;;  %5048 = vrot.lane.b32.xlu0 %v5047_v57, %s5556_s5  ;;  %v1394_v8 = vadd.f32 %v1393_v31, %v6534_v35 }
 0x217   :  { %v1397_v10 = vpop.f32.mrb[99].mxu0  ;;  %v1396_v37 = vadd.f32 %v1395_v20, %v6530_v34  ;;  %v1526_v51 = vmax.f32 %v1392_v33, 0.0 }
 0x218   :  { %5053 = vrot.lane.b32.xlu1 %v5052_v32, %s5556_s5  ;;  %v4979_v21 = vpop.permute.xlu0 %4978  ;;  %v1398_v63 = vadd.f32 %v1397_v10, %v6534_v35  ;;  %v1527_v20 = vmax.f32 %v1394_v8, 0.0 }
 0x219   :  { %v4981_v0 = vunpack.i.h.bf16 %v4979_v21  ;;  %v4980_v28 = vunpack.i.l.bf16 %v4979_v21 }
 0x21a   :  { %v4984_v2 = vpop.permute.xlu1 %4983 }
 0x21b   :  { %v1775_v58 = vsel %vm1766_vm4, %v4980_v28, %v4981_v0  ;;  %v4986_v56 = vunpack.i.h.bf16 %v4984_v2  ;;  %v4985_v55 = vunpack.i.l.bf16 %v4984_v2  ;;  %v1868_v48 = vmax.f32 %v6642_v1, %v4981_v0 }
 0x21c   :  { %v1401_v27 = vpop.f32.mrb[100].mxu0  ;;  %v1867_v47 = vmax.f32 %v6640_v22, %v1775_v58  ;;  %v1528_v2 = vmax.f32 %v1396_v37, 0.0  ;;  %v1529_v22 = vmax.f32 %v1398_v63, 0.0 }
 0x21d   :  { %v1870_v25 = vmax.f32 %v6646_v42, %v4986_v56  ;;  %v1776_v54 = vsel %vm1766_vm4, %v4985_v55, %v4986_v56  ;;  %v1402_v44 = vadd.f32 %v1401_v27, %v6530_v34  ;;  %v1403_v49 = vpop.f32.mrb[101].mxu0 }
 0x21e   :  { %v1404_v38 = vadd.f32 %v1403_v49, %v6534_v35  ;;  %v1405_v30 = vpop.f32.mrb[102].mxu0  ;;  %v1869_v57 = vmax.f32 %v6644_v18, %v1776_v54 }
 0x21f   :  { %v1916_v31 = vpack.c.bf16 %v1870_v25, %v1868_v48  ;;  %v1530_v32 = vmax.f32 %v1402_v44, 0.0  ;;  %v1406_v1 = vadd.f32 %v1405_v30, %v6530_v34  ;;  %v1407_v42 = vpop.f32.mrb[103].mxu0 }
 0x220   :  { %v1531_v21 = vmax.f32 %v1404_v38, 0.0  ;;  %v1408_v0 = vadd.f32 %v1407_v42, %v6534_v35  ;;  %v1915_v28 = vpack.c.bf16 %v1869_v57, %v1867_v47 }
 0x221   :  { %v6850_v10 = vmax.f32 %v1526_v51, %v1530_v32  ;;  %v1532_v56 = vmax.f32 %v1406_v1, 0.0  ;;  %4214 = vmatprep.mubr.msk.bf16.mxu1 %vm2019_vm5, %v1916_v31 }
 0x222   :  { %v6853_v58 = vmax.f32 %v1527_v20, %v1531_v21  ;;  %v1533_v18 = vmax.f32 %v1408_v0, 0.0  ;;  %2131 = vmatmul.mubr.bf16.gmra.mrb[16].mxu1 %v1915_v28 }
 0x223   :  { %v6855_v33 = vmax.f32 %v1528_v2, %v1532_v56 }
 0x224   :  { %v5057_v55 = vpack.i.bf16 %v6853_v58, %v6850_v10  ;;  %v6859_v8 = vmax.f32 %v1529_v22, %v1533_v18  ;;  %v1411_v27 = vpop.f32.mrb[104].mxu0 }
 0x225   :  { %v1413_v48 = vpop.f32.mrb[105].mxu0  ;;  %v1412_v44 = vadd.f32 %v1411_v27, %v6530_v34 }
 0x226   :  { %v5062_v37 = vpack.i.bf16 %v6859_v8, %v6855_v33  ;;  %5058 = vrot.lane.b32.xlu0 %v5057_v55, %s5556_s5  ;;  %v1415_v25 = vpop.f32.mrb[106].mxu0  ;;  %v1414_v30 = vadd.f32 %v1413_v48, %v6534_v35 }
 0x227   :  { %v1417_v54 = vpop.f32.mrb[107].mxu0  ;;  %v1416_v51 = vadd.f32 %v1415_v25, %v6530_v34  ;;  %v1534_v1 = vmax.f32 %v1412_v44, 0.0 }
 0x228   :  { %5063 = vrot.lane.b32.xlu1 %v5062_v37, %s5556_s5  ;;  %v4989_v49 = vpop.permute.xlu0 %4988  ;;  %v1418_v42 = vadd.f32 %v1417_v54, %v6534_v35  ;;  %v1535_v22 = vmax.f32 %v1414_v30, 0.0 }
 0x229   :  { %v4991_v63 = vunpack.i.h.bf16 %v4989_v49  ;;  %v4990_v38 = vunpack.i.l.bf16 %v4989_v49  ;;  %v1536_v37 = vmax.f32 %v1416_v51, 0.0 }
 0x22a   :  { %v4994_v47 = vpop.permute.xlu1 %4993 }
 0x22b   :  { %v1777_v57 = vsel %vm1766_vm4, %v4990_v38, %v4991_v63  ;;  %v4996_v31 = vunpack.i.h.bf16 %v4994_v47  ;;  %v4995_v32 = vunpack.i.l.bf16 %v4994_v47  ;;  %v1872_v21 = vmax.f32 %v6664_v3, %v4991_v63 }
 0x22c   :  { %v1421_v20 = vpop.f32.mrb[108].mxu0  ;;  %v1871_v27 = vmax.f32 %v6662_v9, %v1777_v57 }
 0x22d   :  { %v1874_v0 = vmax.f32 %v6668_v50, %v4996_v31  ;;  %v1778_v28 = vsel %vm1766_vm4, %v4995_v32, %v4996_v31  ;;  %v1422_v2 = vadd.f32 %v1421_v20, %v6530_v34  ;;  %v1423_v56 = vpop.f32.mrb[109].mxu0  ;;  %v1537_v50 = vmax.f32 %v1418_v42, 0.0 }
 0x22e   :  { %v1424_v18 = vadd.f32 %v1423_v56, %v6534_v35  ;;  %v1425_v55 = vpop.f32.mrb[110].mxu0  ;;  %v1873_v48 = vmax.f32 %v6666_v11, %v1778_v28 }
 0x22f   :  { %v1918_v25 = vpack.c.bf16 %v1874_v0, %v1872_v21  ;;  %v1538_v54 = vmax.f32 %v1422_v2, 0.0  ;;  %v1426_v3 = vadd.f32 %v1425_v55, %v6530_v34  ;;  %v1427_v44 = vpop.f32.mrb[111].mxu0 }
 0x230   :  { %v1539_v49 = vmax.f32 %v1424_v18, 0.0  ;;  %v1428_v63 = vadd.f32 %v1427_v44, %v6534_v35  ;;  %v1917_v38 = vpack.c.bf16 %v1873_v48, %v1871_v27 }
 0x231   :  { %v6879_v47 = vmax.f32 %v1534_v1, %v1538_v54  ;;  %v1540_v30 = vmax.f32 %v1426_v3, 0.0  ;;  %4215 = vmatprep.mubr.msk.bf16.mxu1 %vm2019_vm5, %v1918_v25 }
 0x232   :  { %v6882_v31 = vmax.f32 %v1535_v22, %v1539_v49  ;;  %v1541_v9 = vmax.f32 %v1428_v63, 0.0  ;;  %2139 = vmatmul.mubr.bf16.gmra.mrb[20].mxu1 %v1917_v38 }
 0x233   :  { %v6884_v11 = vmax.f32 %v1536_v37, %v1540_v30 }
 0x234   :  { %v5067_v34 = vpack.i.bf16 %v6882_v31, %v6879_v47  ;;  %v6888_v57 = vmax.f32 %v1537_v50, %v1541_v9 }
 0x236   :  { %v5072_v35 = vpack.i.bf16 %v6888_v57, %v6884_v11  ;;  %5068 = vrot.lane.b32.xlu0 %v5067_v34, %s5556_s5 }
 0x238   :  { %5073 = vrot.lane.b32.xlu1 %v5072_v35, %s5556_s5  ;;  %v4999_v51 = vpop.permute.xlu0 %4998 }
 0x239   :  { %v5001_v32 = vunpack.i.h.bf16 %v4999_v51  ;;  %v5000_v1 = vunpack.i.l.bf16 %v4999_v51 }
 0x23a   :  { %v5004_v42 = vpop.permute.xlu1 %5003 }
 0x23b   :  { %v1779_v20 = vsel %vm1766_vm4, %v5000_v1, %v5001_v32  ;;  %v5006_v21 = vunpack.i.h.bf16 %v5004_v42  ;;  %v5005_v0 = vunpack.i.l.bf16 %v5004_v42  ;;  %v1876_v28 = vmax.f32 %v6686_v45, %v5001_v32 }
 0x23c   :  { %v1875_v22 = vmax.f32 %v6684_v12, %v1779_v20 }
 0x23d   :  { %v1878_v2 = vmax.f32 %v6690_v17, %v5006_v21  ;;  %v1780_v56 = vsel %vm1766_vm4, %v5005_v0, %v5006_v21 }
 0x23e   :  { %v1877_v18 = vmax.f32 %v6688_v46, %v1780_v56 }
 0x23f   :  { %v1920_v55 = vpack.c.bf16 %v1878_v2, %v1876_v28 }
 0x240   :  { %v1919_v27 = vpack.c.bf16 %v1877_v18, %v1875_v22 }
 0x241   :  { %4216 = vmatprep.mubr.msk.bf16.mxu1 %vm2019_vm5, %v1920_v55 }
 0x242   :  { %2147 = vmatmul.mubr.bf16.gmra.mrb[24].mxu1 %v1919_v27 }
 0x248   :  { %v5009_v48 = vpop.permute.xlu0 %5008 }
 0x249   :  { %v5011_v37 = vunpack.i.h.bf16 %v5009_v48  ;;  %v5010_v25 = vunpack.i.l.bf16 %v5009_v48 }
 0x24a   :  { %v5014_v54 = vpop.permute.xlu1 %5013 }
 0x24b   :  { %v1781_v3 = vsel %vm1766_vm4, %v5010_v25, %v5011_v37  ;;  %v5016_v45 = vunpack.i.h.bf16 %v5014_v54  ;;  %v5015_v44 = vunpack.i.l.bf16 %v5014_v54  ;;  %v1880_v17 = vmax.f32 %v6708_v43, %v5011_v37 }
 0x24c   :  { %v1879_v46 = vmax.f32 %v6706_v26, %v1781_v3 }
 0x24d   :  { %v1882_v50 = vmax.f32 %v6714_v14, %v5016_v45  ;;  %v1782_v12 = vsel %vm1766_vm4, %v5015_v44, %v5016_v45 }
 0x24e   :  { %v1881_v49 = vmax.f32 %v6710_v29, %v1782_v12 }
 0x24f   :  { %v1922_v63 = vpack.c.bf16 %v1882_v50, %v1880_v17 }
 0x250   :  { %v1921_v38 = vpack.c.bf16 %v1881_v49, %v1879_v46 }
 0x251   :  { %4217 = vmatprep.mubr.msk.bf16.mxu1 %vm2019_vm5, %v1922_v63 }
 0x252   :  { %2155 = vmatmul.mubr.bf16.gmra.mrb[28].mxu1 %v1921_v38 }
 0x258   :  { %v5019_v30 = vpop.permute.xlu0 %5018 }
 0x259   :  { %v5021_v9 = vunpack.i.h.bf16 %v5019_v30  ;;  %v5020_v34 = vunpack.i.l.bf16 %v5019_v30 }
 0x25a   :  { %v5024_v35 = vpop.permute.xlu1 %5023 }
 0x25b   :  { %v1783_v51 = vsel %vm1766_vm4, %v5020_v34, %v5021_v9  ;;  %v5026_v43 = vunpack.i.h.bf16 %v5024_v35  ;;  %v5025_v32 = vunpack.i.l.bf16 %v5024_v35  ;;  %v1884_v14 = vmax.f32 %v6737_v19, %v5021_v9 }
 0x25c   :  { %v1883_v29 = vmax.f32 %v6734_v41, %v1783_v51 }
 0x25d   :  { %v1886_v1 = vmax.f32 %v6743_v4, %v5026_v43  ;;  %v1784_v26 = vsel %vm1766_vm4, %v5025_v32, %v5026_v43 }
 0x25e   :  { %v1885_v42 = vmax.f32 %v6739_v59, %v1784_v26 }
 0x25f   :  { %v1924_v20 = vpack.c.bf16 %v1886_v1, %v1884_v14 }
 0x260   :  { %v1923_v21 = vpack.c.bf16 %v1885_v42, %v1883_v29 }
 0x261   :  { %4218 = vmatprep.mubr.msk.bf16.mxu1 %vm2019_vm5, %v1924_v20 }
 0x262   :  { %2163 = vmatmul.mubr.bf16.gmra.mrb[32].mxu1 %v1923_v21 }
 0x268   :  { %v5029_v0 = vpop.permute.xlu0 %5028 }
 0x269   :  { %v5031_v28 = vunpack.i.h.bf16 %v5029_v0  ;;  %v5030_v2 = vunpack.i.l.bf16 %v5029_v0 }
 0x26a   :  { %v5034_v56 = vpop.permute.xlu1 %5033 }
 0x26b   :  { %v1785_v22 = vsel %vm1766_vm4, %v5030_v2, %v5031_v28  ;;  %v5036_v19 = vunpack.i.h.bf16 %v5034_v56  ;;  %v5035_v18 = vunpack.i.l.bf16 %v5034_v56  ;;  %v1888_v4 = vmax.f32 %v6766_v53, %v5031_v28 }
 0x26c   :  { %v1887_v59 = vmax.f32 %v6763_v61, %v1785_v22  ;;  %v5390_v22 = vld [vmem:[%s7945_s3 + $0x4] ss:$8 sps:$4 sm:$0xff]  }
 0x26d   :  { %v1890_v55 = vmax.f32 %v6772_v40, %v5036_v19  ;;  %v1786_v41 = vsel %vm1766_vm4, %v5035_v18, %v5036_v19  ;;  %2969 = vmatprep.subr.bf16.mxu1 %v5390_v22 }
 0x26e   :  { %v1889_v27 = vmax.f32 %v6768_v52, %v1786_v41  ;;  %v5394_v41 = vld [vmem:[%s7945_s3 + $0x20] ss:$8 sps:$4 sm:$0xff]  }
 0x26f   :  { %v1926_v48 = vpack.c.bf16 %v1890_v55, %v1888_v4  ;;  %v5396_v4 = vld [vmem:[%s7945_s3 + $0x24] ss:$8 sps:$4 sm:$0xff]  }
 0x270   :  { %v1925_v37 = vpack.c.bf16 %v1889_v27, %v1887_v59 }
 0x271   :  { %4219 = vmatprep.mubr.msk.bf16.mxu1 %vm2019_vm5, %v1926_v48 }
 0x272   :  { %2171 = vmatmul.mubr.bf16.gmra.mrb[36].mxu1 %v1925_v37 }
 0x278   :  { %v5039_v25 = vpop.permute.xlu0 %5038 }
 0x279   :  { %v5041_v54 = vunpack.i.h.bf16 %v5039_v25  ;;  %v5040_v3 = vunpack.i.l.bf16 %v5039_v25 }
 0x27a   :  { %v5044_v45 = vpop.permute.xlu1 %5043 }
 0x27b   :  { %v1787_v44 = vsel %vm1766_vm4, %v5040_v3, %v5041_v54  ;;  %v5046_v53 = vunpack.i.h.bf16 %v5044_v45  ;;  %v5045_v17 = vunpack.i.l.bf16 %v5044_v45  ;;  %v1892_v40 = vmax.f32 %v6795_v23, %v5041_v54  ;;  %v5399_v3 = vld [vmem:[%s7945_s3 + $0x34] ss:$8 sps:$4 sm:$0xff]  }
 0x27c   :  { %v1891_v52 = vmax.f32 %v6792_v39, %v1787_v44 }
 0x27d   :  { %v1894_v50 = vmax.f32 %v6801_v36, %v5046_v53  ;;  %v1788_v61 = vsel %vm1766_vm4, %v5045_v17, %v5046_v53  ;;  %v5397_v53 = vld [vmem:[%s7945_s3 + $0x30] ss:$8 sps:$4 sm:$0xff]  }
 0x27e   :  { %v1893_v12 = vmax.f32 %v6797_v13, %v1788_v61  ;;  %v5403_v61 = vld [vmem:[%s7945_s3 + $0x50] ss:$8 sps:$4 sm:$0xff]  }
 0x27f   :  { %v1928_v46 = vpack.c.bf16 %v1894_v50, %v1892_v40 }
 0x280   :  { %v1927_v49 = vpack.c.bf16 %v1893_v12, %v1891_v52 }
 0x281   :  { %4220 = vmatprep.mubr.msk.bf16.mxu1 %vm2019_vm5, %v1928_v46  ;;  %v5408_v46 = vld [vmem:[%s7945_s3 + $0x64] ss:$8 sps:$4 sm:$0xff]  }
 0x282   :  { %2179 = vmatmul.mubr.bf16.gmra.mrb[40].mxu1 %v1927_v49  ;;  %v5406_v49 = vld [vmem:[%s7945_s3 + $0x60] ss:$8 sps:$4 sm:$0xff]  }
 0x288   :  { %v5049_v63 = vpop.permute.xlu0 %5048 }
 0x289   :  { %v5051_v38 = vunpack.i.h.bf16 %v5049_v63  ;;  %v5050_v30 = vunpack.i.l.bf16 %v5049_v63  ;;  %v5411_v63 = vld [vmem:[%s7945_s3 + $0x74] ss:$8 sps:$4 sm:$0xff]  }
 0x28a   :  { %v5054_v9 = vpop.permute.xlu1 %5053 }
 0x28b   :  { %v1789_v34 = vsel %vm1766_vm4, %v5050_v30, %v5051_v38  ;;  %v5056_v23 = vunpack.i.h.bf16 %v5054_v9  ;;  %v5055_v35 = vunpack.i.l.bf16 %v5054_v9  ;;  %v1896_v36 = vmax.f32 %v6824_v15, %v5051_v38  ;;  %v5409_v38 = vld [vmem:[%s7945_s3 + $0x70] ss:$8 sps:$4 sm:$0xff]   ;;  %v5414_v30 = vld [vmem:[%s7945_s3 + $0x84] ss:$8 sps:$4 sm:$0xff]   ;;  %v5412_v9 = vld [vmem:[%s7945_s3 + $0x80] ss:$8 sps:$4 sm:$0xff]  }
 0x28c   :  { %v1895_v13 = vmax.f32 %v6821_v60, %v1789_v34 }
 0x28d   :  { %v1898_v51 = vmax.f32 %v6830_v5, %v5056_v23  ;;  %v1790_v39 = vsel %vm1766_vm4, %v5055_v35, %v5056_v23  ;;  %v5417_v23 = vld [vmem:[%s7945_s3 + $0x94] ss:$8 sps:$4 sm:$0xff]  }
 0x28e   :  { %v1897_v43 = vmax.f32 %v6826_v16, %v1790_v39 }
 0x28f   :  { %v1930_v32 = vpack.c.bf16 %v1898_v51, %v1896_v36  ;;  %v5415_v36 = vld [vmem:[%s7945_s3 + $0x90] ss:$8 sps:$4 sm:$0xff]  }
 0x290   :  { %v1929_v14 = vpack.c.bf16 %v1897_v43, %v1895_v13  ;;  %v5420_v43 = vld [vmem:[%s7945_s3 + $0xa4] ss:$8 sps:$4 sm:$0xff]  }
 0x291   :  { %4221 = vmatprep.mubr.msk.bf16.mxu1 %vm2019_vm5, %v1930_v32  ;;  %v5418_v32 = vld [vmem:[%s7945_s3 + $0xa0] ss:$8 sps:$4 sm:$0xff]  }
 0x292   :  { %2187 = vmatmul.mubr.bf16.gmra.mrb[44].mxu1 %v1929_v14  ;;  %v5423_v14 = vld [vmem:[%s7945_s3 + $0xb4] ss:$8 sps:$4 sm:$0xff]  }
 0x298   :  { %v5059_v1 = vpop.permute.xlu0 %5058 }
 0x299   :  { %v5061_v26 = vunpack.i.h.bf16 %v5059_v1  ;;  %v5060_v29 = vunpack.i.l.bf16 %v5059_v1  ;;  %v5421_v1 = vld [vmem:[%s7945_s3 + $0xb0] ss:$8 sps:$4 sm:$0xff]  }
 0x29a   :  { %v5064_v42 = vpop.permute.xlu1 %5063 }
 0x29b   :  { %v1791_v20 = vsel %vm1766_vm4, %v5060_v29, %v5061_v26  ;;  %v5066_v15 = vunpack.i.h.bf16 %v5064_v42  ;;  %v5065_v21 = vunpack.i.l.bf16 %v5064_v42  ;;  %v1900_v5 = vmax.f32 %v6853_v58, %v5061_v26  ;;  %v5388_v58 = vld [vmem:[%s7945_s3] ss:$8 sps:$4 sm:$0xff]   ;;  %v5426_v26 = vld [vmem:[%s7945_s3 + $0xc4] ss:$8 sps:$4 sm:$0xff]  }
 0x29c   :  { %v1899_v16 = vmax.f32 %v6850_v10, %v1791_v20  ;;  %2970 = vmatpush1.bf16.msra.mxu1 %v5388_v58  ;;  %v5393_v10 = vld [vmem:[%s7945_s3 + $0x14] ss:$8 sps:$4 sm:$0xff]   ;;  %v5424_v29 = vld [vmem:[%s7945_s3 + $0xc0] ss:$8 sps:$4 sm:$0xff]  }
 0x29d   :  { %v1902_v0 = vmax.f32 %v6859_v8, %v5066_v15  ;;  %v1792_v60 = vsel %vm1766_vm4, %v5065_v21, %v5066_v15  ;;  %2971 = vmatprep.subr.bf16.mxu1 %v5393_v10  ;;  %v5429_v20 = vld [vmem:[%s7945_s3 + $0xd4] ss:$8 sps:$4 sm:$0xff]   ;;  %v5427_v21 = vld [vmem:[%s7945_s3 + $0xd0] ss:$8 sps:$4 sm:$0xff]  }
 0x29e   :  { %v1901_v28 = vmax.f32 %v6855_v33, %v1792_v60  ;;  %v5391_v33 = vld [vmem:[%s7945_s3 + $0x10] ss:$8 sps:$4 sm:$0xff]  }
 0x29f   :  { %v1932_v2 = vpack.c.bf16 %v1902_v0, %v1900_v5 }
 0x2a0   :  { %v1931_v56 = vpack.c.bf16 %v1901_v28, %v1899_v16  ;;  %2972 = vmatpush1.bf16.msra.mxu1 %v5391_v33  ;;  %v5432_v16 = vld [vmem:[%s7945_s3 + $0xe4] ss:$8 sps:$4 sm:$0xff]   ;;  %v5430_v28 = vld [vmem:[%s7945_s3 + $0xe0] ss:$8 sps:$4 sm:$0xff]  }
 0x2a1   :  { %4222 = vmatprep.mubr.msk.bf16.mxu1 %vm2019_vm5, %v1932_v2  ;;  %2973 = vmatprep.subr.bf16.mxu1 %v5396_v4  ;;  %v5435_v2 = vld [vmem:[%s7945_s3 + $0xf4] ss:$8 sps:$4 sm:$0xff]  }
 0x2a2   :  { %2195 = vmatmul.mubr.bf16.gmra.mrb[48].mxu1 %v1931_v56  ;;  %v5433_v56 = vld [vmem:[%s7945_s3 + $0xf0] ss:$8 sps:$4 sm:$0xff]  }
 0x2a4   :  { %2974 = vmatpush1.bf16.msra.mxu1 %v5394_v41 }
 0x2a5   :  { %2975 = vmatprep.subr.bf16.mxu1 %v5399_v3 }
 0x2a8   :  { %v5069_v8 = vpop.permute.xlu0 %5068  ;;  %2976 = vmatpush1.bf16.msra.mxu1 %v5397_v53 }
 0x2a9   :  { %v5071_v19 = vunpack.i.h.bf16 %v5069_v8  ;;  %v5070_v18 = vunpack.i.l.bf16 %v5069_v8 }
 0x2aa   :  { %v5074_v55 = vpop.permute.xlu1 %5073 }
 0x2ab   :  { %v1793_v59 = vsel %vm1766_vm4, %v5070_v18, %v5071_v19  ;;  %v5076_v27 = vunpack.i.h.bf16 %v5074_v55  ;;  %v5075_v48 = vunpack.i.l.bf16 %v5074_v55  ;;  %v1904_v37 = vmax.f32 %v6882_v31, %v5071_v19  ;;  %v5402_v31 = vld [vmem:[%s7945_s3 + $0x44] ss:$8 sps:$4 sm:$0xff]  }
 0x2ac   :  { %v1903_v45 = vmax.f32 %v6879_v47, %v1793_v59  ;;  %v5400_v47 = vld [vmem:[%s7945_s3 + $0x40] ss:$8 sps:$4 sm:$0xff]   ;;  %2977 = vmatprep.subr.bf16.mxu1 %v5402_v31 }
 0x2ad   :  { %v1906_v25 = vmax.f32 %v6888_v57, %v5076_v27  ;;  %v1794_v54 = vsel %vm1766_vm4, %v5075_v48, %v5076_v27  ;;  %2978 = vmatpush1.bf16.msra.mxu1 %v5400_v47  ;;  %v5405_v57 = vld [vmem:[%s7945_s3 + $0x54] ss:$8 sps:$4 sm:$0xff]  }
 0x2ae   :  { %v1905_v44 = vmax.f32 %v6884_v11, %v1794_v54  ;;  %2979 = vmatprep.subr.bf16.mxu1 %v5405_v57 }
 0x2af   :  { %v1934_v17 = vpack.c.bf16 %v1906_v25, %v1904_v37 }
 0x2b0   :  { %v1933_v40 = vpack.c.bf16 %v1905_v44, %v1903_v45 }
 0x2b1   :  { %4223 = vmatprep.mubr.msk.bf16.mxu1 %vm2019_vm5, %v1934_v17  ;;  %2980 = vmatpush1.bf16.msra.mxu1 %v5403_v61 }
 0x2b2   :  { %2203 = vmatmul.mubr.bf16.gmra.mrb[52].mxu1 %v1933_v40  ;;  %2981 = vmatprep.subr.bf16.mxu1 %v5408_v46  ;;  %v5438_v40 = vld [vmem:[%s7945_s3 + $0x104] ss:$8 sps:$4 sm:$0xff]  }
 0x2b5   :  { %v6980_v11 = vpop.f32.mrb[0].mxu1  ;;  %2982 = vmatpush1.bf16.msra.mxu1 %v5406_v49 }
 0x2b6   :  { %v2102_v50 = vpop.f32.mrb[1].mxu1  ;;  %2983 = vmatprep.subr.bf16.mxu1 %v5411_v63 }
 0x2b7   :  { %v6988_v52 = vpop.f32.mrb[2].mxu1 }
 0x2b8   :  { %v2105_v12 = vpop.f32.mrb[3].mxu1 }
 0x2b9   :  { %2984 = vmatpush1.bf16.msra.mxu1 %v5409_v38 }
 0x2ba   :  { %2985 = vmatprep.subr.bf16.mxu1 %v5414_v30 }
 0x2bd   :  { %2986 = vmatpush1.bf16.msra.mxu1 %v5412_v9 }
 0x2be   :  { %2987 = vmatprep.subr.bf16.mxu1 %v5417_v23 }
 0x2c1   :  { %2988 = vmatpush1.bf16.msra.mxu1 %v5415_v36 }
 0x2c2   :  { %2989 = vmatprep.subr.bf16.mxu1 %v5420_v43 }
 0x2c5   :  { %v7008_v34 = vpop.f32.mrb[4].mxu1  ;;  %2990 = vmatpush1.bf16.msra.mxu1 %v5418_v32 }
 0x2c6   :  { %v2110_v35 = vpop.f32.mrb[5].mxu1  ;;  %2991 = vmatprep.subr.bf16.mxu1 %v5423_v14 }
 0x2c7   :  { %v7016_v51 = vpop.f32.mrb[6].mxu1 }
 0x2c8   :  { %v5077_v39 = vpack.i.bf16 %v7016_v51, %v7008_v34  ;;  %v2113_v13 = vpop.f32.mrb[7].mxu1 }
 0x2c9   :  { %2992 = vmatpush1.bf16.msra.mxu1 %v5421_v1 }
 0x2ca   :  { %5078 = vrot.lane.b32.xlu0 %v5077_v39, %s5557_s18  ;;  %2993 = vmatprep.subr.bf16.mxu1 %v5426_v26 }
 0x2cd   :  { %2994 = vmatpush1.bf16.msra.mxu1 %v5424_v29 }
 0x2ce   :  { %2995 = vmatprep.subr.bf16.mxu1 %v5429_v20 }
 0x2d1   :  { %2996 = vmatpush1.bf16.msra.mxu1 %v5427_v21 }
 0x2d2   :  { %2997 = vmatprep.subr.bf16.mxu1 %v5432_v16 }
 0x2d5   :  { %v7039_v42 = vpop.f32.mrb[8].mxu1  ;;  %2998 = vmatpush1.bf16.msra.mxu1 %v5430_v28 }
 0x2d6   :  { %v2118_v15 = vpop.f32.mrb[9].mxu1  ;;  %2999 = vmatprep.subr.bf16.mxu1 %v5435_v2 }
 0x2d7   :  { %v7047_v5 = vpop.f32.mrb[10].mxu1 }
 0x2d8   :  { %v5092_v0 = vpack.i.bf16 %v7047_v5, %v7039_v42  ;;  %v2121_v60 = vpop.f32.mrb[11].mxu1 }
 0x2d9   :  { %3000 = vmatpush1.bf16.msra.mxu1 %v5433_v56 }
 0x2da   :  { %5083 = vrot.lane.b32.xlu1 %v5092_v0, %s5558_s16  ;;  %3102 = vmatprep.subr.bf16.mxu1 %v5438_v40 }
 0x2de   :  { %5093 = vrot.lane.b32.xlu1 %v5092_v0, %s5557_s18 }
 0x2e5   :  { %v7065_v22 = vpop.f32.mrb[12].mxu1 }
 0x2e6   :  { %v2126_v58 = vpop.f32.mrb[13].mxu1 }
 0x2e7   :  { %v7067_v10 = vpop.f32.mrb[14].mxu1 }
 0x2e8   :  { %v5107_v33 = vpack.i.bf16 %v7067_v10, %v7065_v22  ;;  %v2129_v8 = vpop.f32.mrb[15].mxu1 }
 0x2ea   :  { %5088 = vrot.lane.b32.xlu0 %v5107_v33, %s5559_s24 }
 0x2ee   :  { %5098 = vrot.lane.b32.xlu0 %v5107_v33, %s5558_s16 }
 0x2f2   :  { %5108 = vrot.lane.b32.xlu0 %v5107_v33, %s5557_s18 }
 0x2f5   :  { %v7074_v19 = vpop.f32.mrb[16].mxu1 }
 0x2f6   :  { %v2134_v18 = vpop.f32.mrb[17].mxu1 }
 0x2f7   :  { %v7076_v4 = vpop.f32.mrb[18].mxu1 }
 0x2f8   :  { %v2137_v55 = vpop.f32.mrb[19].mxu1  ;;  %v7080_v41 = vpack.i.bf16 %v7076_v4, %v7074_v19 }
 0x2fa   :  { %5103 = vrot.lane.b32.xlu1 %v7080_v41, %s5559_s24 }
 0x2fe   :  { %5113 = vrot.lane.b32.xlu1 %v7080_v41, %s5558_s16 }
 0x302   :  { %5123 = vrot.lane.b32.xlu1 %v7080_v41, %s5557_s18 }
 0x305   :  { %v7088_v59 = vpop.f32.mrb[20].mxu1 }
 0x306   :  { %v2142_v27 = vpop.f32.mrb[21].mxu1 }
 0x307   :  { %v7090_v48 = vpop.f32.mrb[22].mxu1 }
 0x308   :  { %v2145_v37 = vpop.f32.mrb[23].mxu1  ;;  %v7094_v25 = vpack.i.bf16 %v7090_v48, %v7088_v59 }
 0x30a   :  { %5118 = vrot.lane.b32.xlu0 %v7094_v25, %s5559_s24 }
 0x30e   :  { %5128 = vrot.lane.b32.xlu0 %v7094_v25, %s5558_s16 }
 0x312   :  { %5138 = vrot.lane.b32.xlu0 %v7094_v25, %s5557_s18 }
 0x315   :  { %v7102_v54 = vpop.f32.mrb[24].mxu1 }
 0x316   :  { %v2150_v3 = vpop.f32.mrb[25].mxu1 }
 0x317   :  { %v7104_v45 = vpop.f32.mrb[26].mxu1  ;;  %v5436_v3 = vld [vmem:[%s7945_s3 + $0x100] ss:$8 sps:$4 sm:$0xff]  }
 0x318   :  { %v2153_v44 = vpop.f32.mrb[27].mxu1  ;;  %v7108_v53 = vpack.i.bf16 %v7104_v45, %v7102_v54 }
 0x319   :  { %v5441_v44 = vld [vmem:[%s7945_s3 + $0x114] ss:$8 sps:$4 sm:$0xff]  }
 0x31a   :  { %5133 = vrot.lane.b32.xlu1 %v7108_v53, %s5559_s24 }
 0x31e   :  { %5143 = vrot.lane.b32.xlu1 %v7108_v53, %s5558_s16 }
 0x322   :  { %5153 = vrot.lane.b32.xlu1 %v7108_v53, %s5557_s18 }
 0x325   :  { %v7116_v17 = vpop.f32.mrb[28].mxu1 }
 0x326   :  { %v2158_v31 = vpop.f32.mrb[29].mxu1 }
 0x327   :  { %v7121_v47 = vpop.f32.mrb[30].mxu1  ;;  %v5439_v31 = vld [vmem:[%s7945_s3 + $0x110] ss:$8 sps:$4 sm:$0xff]  }
 0x328   :  { %v2161_v57 = vpop.f32.mrb[31].mxu1  ;;  %v7125_v50 = vpack.i.bf16 %v7121_v47, %v7116_v17 }
 0x32a   :  { %5148 = vrot.lane.b32.xlu0 %v7125_v50, %s5559_s24 }
 0x32e   :  { %5158 = vrot.lane.b32.xlu0 %v7125_v50, %s5558_s16 }
 0x332   :  { %5168 = vrot.lane.b32.xlu0 %v7125_v50, %s5557_s18 }
 0x335   :  { %v7133_v61 = vpop.f32.mrb[32].mxu1 }
 0x336   :  { %v2166_v12 = vpop.f32.mrb[33].mxu1 }
 0x337   :  { %v7135_v46 = vpop.f32.mrb[34].mxu1 }
 0x338   :  { %v2169_v49 = vpop.f32.mrb[35].mxu1  ;;  %v7139_v63 = vpack.i.bf16 %v7135_v46, %v7133_v61 }
 0x33a   :  { %5163 = vrot.lane.b32.xlu1 %v7139_v63, %s5559_s24 }
 0x33c   :  { %v5079_v38 = vpop.permute.xlu0 %5078 }
 0x33d   :  { %v5081_v30 = vunpack.i.h.bf16 %v5079_v38  ;;  %v5080_v9 = vunpack.i.l.bf16 %v5079_v38  ;;  %v5444_v38 = vld [vmem:[%s7945_s3 + $0x124] ss:$8 sps:$4 sm:$0xff]  }
 0x33e   :  { %5173 = vrot.lane.b32.xlu1 %v7139_v63, %s5558_s16 }
 0x33f   :  { %v2479_v23 = vsel %vm2477_vm6, %v6988_v52, %v5081_v30  ;;  %v2478_v35 = vsel %vm2477_vm6, %v6980_v11, %v5080_v9 }
 0x340   :  { %v2561_v36 = vpack.c.bf16 %v2479_v23, %v2478_v35 }
 0x342   :  { %5183 = vrot.lane.b32.xlu1 %v7139_v63, %s5557_s18 }
 0x345   :  { %v7151_v39 = vpop.f32.mrb[36].mxu1 }
 0x346   :  { %v2174_v13 = vpop.f32.mrb[37].mxu1 }
 0x347   :  { %v7153_v43 = vpop.f32.mrb[38].mxu1 }
 0x348   :  { %v2177_v32 = vpop.f32.mrb[39].mxu1  ;;  %v7157_v14 = vpack.i.bf16 %v7153_v43, %v7151_v39 }
 0x34a   :  { %5178 = vrot.lane.b32.xlu0 %v7157_v14, %s5559_s24 }
 0x34c   :  { %v5084_v52 = vpop.permute.xlu1 %5083 }
 0x34d   :  { %v5086_v2 = vunpack.i.h.bf16 %v5084_v52  ;;  %v5085_v56 = vunpack.i.l.bf16 %v5084_v52  ;;  %v5442_v52 = vld [vmem:[%s7945_s3 + $0x120] ss:$8 sps:$4 sm:$0xff]  }
 0x34e   :  { %5188 = vrot.lane.b32.xlu0 %v7157_v14, %s5558_s16 }
 0x34f   :  { %v2500_v33 = vsel %vm2498_vm7, %v5081_v30, %v5086_v2  ;;  %v2499_v8 = vsel %vm2498_vm7, %v5080_v9, %v5085_v56  ;;  %v5450_v2 = vld [vmem:[%s7945_s3 + $0x144] ss:$8 sps:$4 sm:$0xff]  }
 0x350   :  { %v7163_v11 = vpop.permute.xlu1 %5093 }
 0x351   :  { %v5096_v1 = vunpack.i.h.bf16 %v7163_v11  ;;  %v5095_v26 = vunpack.i.l.bf16 %v7163_v11 }
 0x352   :  { %5198 = vrot.lane.b32.xlu0 %v7157_v14, %s5557_s18 }
 0x353   :  { %v7171_v29 = vsel %vm2477_vm6, %v7008_v34, %v5095_v26  ;;  %v7175_v20 = vsel %vm2477_vm6, %v7016_v51, %v5096_v1 }
 0x354   :  { %v2565_v15 = vpack.c.bf16 %v7175_v20, %v7171_v29 }
 0x355   :  { %v2180_v21 = vpop.f32.mrb[40].mxu1 }
 0x356   :  { %v2182_v0 = vpop.f32.mrb[41].mxu1 }
 0x357   :  { %v2183_v60 = vpop.f32.mrb[42].mxu1  ;;  %v5445_v0 = vld [vmem:[%s7945_s3 + $0x130] ss:$8 sps:$4 sm:$0xff]  }
 0x358   :  { %v7179_v16 = vpack.i.bf16 %v2183_v60, %v2180_v21  ;;  %v2185_v28 = vpop.f32.mrb[43].mxu1 }
 0x35a   :  { %5193 = vrot.lane.b32.xlu1 %v7179_v16, %s5559_s24 }
 0x35c   :  { %v7183_v34 = vpop.permute.xlu0 %5088 }
 0x35d   :  { %v5091_v51 = vunpack.i.h.bf16 %v7183_v34  ;;  %v5090_v58 = vunpack.i.l.bf16 %v7183_v34 }
 0x35e   :  { %5203 = vrot.lane.b32.xlu1 %v7179_v16, %s5558_s16 }
 0x35f   :  { %v2520_v18 = vsel %vm2519_vm8, %v2499_v8, %v5090_v58  ;;  %v2521_v55 = vsel %vm2519_vm8, %v2500_v33, %v5091_v51 }
 0x360   :  { %v5099_v27 = vpop.permute.xlu0 %5098  ;;  %v2562_v37 = vpack.c.bf16 %v2521_v55, %v2520_v18 }
 0x361   :  { %v5101_v11 = vunpack.i.h.bf16 %v5099_v27  ;;  %v5100_v21 = vunpack.i.l.bf16 %v5099_v27 }
 0x362   :  { %3001 = vmatprep.mubr.bf16.mxu1 %v2562_v37  ;;  %5213 = vrot.lane.b32.xlu1 %v7179_v16, %s5557_s18 }
 0x363   :  { %3002 = vmatmul.mubr.bf16.vlgmr.msra.gmra.mrb[56].mxu1 %v2561_v36  ;;  %v2502_v56 = vsel %vm2498_vm7, %v5096_v1, %v5101_v11  ;;  %v2501_v33 = vsel %vm2498_vm7, %v5095_v26, %v5100_v21  ;;  %v5448_v1 = vld [vmem:[%s7945_s3 + $0x140] ss:$8 sps:$4 sm:$0xff]   ;;  %v5453_v26 = vld [vmem:[%s7945_s3 + $0x154] ss:$8 sps:$4 sm:$0xff]   ;;  %v5457_v11 = vld [vmem:[%s7945_s3 + $0x170] ss:$8 sps:$4 sm:$0xff]  }
 0x364   :  { %v7205_v40 = vpop.permute.xlu0 %5108  ;;  %3103 = vmatpush1.bf16.msra.mxu1 %v5436_v3  ;;  %v5451_v3 = vld [vmem:[%s7945_s3 + $0x150] ss:$8 sps:$4 sm:$0xff]  }
 0x365   :  { %v5111_v57 = vunpack.i.h.bf16 %v7205_v40  ;;  %v5110_v12 = vunpack.i.l.bf16 %v7205_v40  ;;  %v2188_v49 = vpop.f32.mrb[44].mxu1  ;;  %3104 = vmatprep.subr.bf16.mxu1 %v5441_v44  ;;  %v5460_v40 = vld [vmem:[%s7945_s3 + $0x180] ss:$8 sps:$4 sm:$0xff]  }
 0x366   :  { %v2190_v30 = vpop.f32.mrb[45].mxu1 }
 0x367   :  { %v2191_v9 = vpop.f32.mrb[46].mxu1  ;;  %v7219_v23 = vsel %vm2477_vm6, %v7039_v42, %v5110_v12  ;;  %v7225_v35 = vsel %vm2477_vm6, %v7047_v5, %v5111_v57  ;;  %v5447_v42 = vld [vmem:[%s7945_s3 + $0x134] ss:$8 sps:$4 sm:$0xff]  }
 0x368   :  { %v7227_v36 = vpack.i.bf16 %v2191_v9, %v2188_v49  ;;  %v2193_v13 = vpop.f32.mrb[47].mxu1  ;;  %v2569_v32 = vpack.c.bf16 %v7225_v35, %v7219_v23  ;;  %3105 = vmatpush1.bf16.msra.mxu1 %v5439_v31 }
 0x369   :  { %3106 = vmatprep.subr.bf16.mxu1 %v5444_v38 }
 0x36a   :  { %5208 = vrot.lane.b32.xlu0 %v7227_v36, %s5559_s24 }
 0x36c   :  { %v7239_v5 = vpop.permute.xlu1 %5103  ;;  %3107 = vmatpush1.bf16.msra.mxu1 %v5442_v52 }
 0x36d   :  { %v5106_v60 = vunpack.i.h.bf16 %v7239_v5  ;;  %v5105_v28 = vunpack.i.l.bf16 %v7239_v5  ;;  %3108 = vmatprep.subr.bf16.mxu1 %v5447_v42 }
 0x36e   :  { %5218 = vrot.lane.b32.xlu0 %v7227_v36, %s5558_s16  ;;  %s5560_s16 = smov 80  }
 0x36f   :  { %v2522_v8 = vsel %vm2519_vm8, %v2501_v33, %v5105_v28  ;;  %v2523_v18 = vsel %vm2519_vm8, %v2502_v56, %v5106_v60 }
 0x370   :  { %v5114_v55 = vpop.permute.xlu1 %5113  ;;  %v2566_v27 = vpack.c.bf16 %v2523_v18, %v2522_v8  ;;  %3109 = vmatpush1.bf16.msra.mxu1 %v5445_v0 }
 0x371   :  { %3110 = vmatprep.subr.bf16.mxu1 %v5450_v2  ;;  %v5116_v52 = vunpack.i.h.bf16 %v5114_v55  ;;  %v5115_v42 = vunpack.i.l.bf16 %v5114_v55  ;;  %v5462_v2 = vld [vmem:[%s7945_s3 + $0x184] ss:$8 sps:$4 sm:$0xff]   ;;  %v5463_v55 = vld [vmem:[%s7945_s3 + $0x190] ss:$8 sps:$4 sm:$0xff]  }
 0x372   :  { %3011 = vmatprep.mubr.bf16.mxu1 %v2566_v27  ;;  %5228 = vrot.lane.b32.xlu0 %v7080_v41, %s5560_s16  ;;  %v5456_v41 = vld [vmem:[%s7945_s3 + $0x164] ss:$8 sps:$4 sm:$0xff]  }
 0x373   :  { %3012 = vmatmul.mubr.bf16.gmra.mrb[60].mxu1 %v2565_v15  ;;  %v2503_v56 = vsel %vm2498_vm7, %v5110_v12, %v5115_v42 }
 0x374   :  { %v7270_v37 = vpop.permute.xlu1 %5123  ;;  %3111 = vmatpush1.bf16.msra.mxu1 %v5448_v1 }
 0x375   :  { %v5126_v44 = vunpack.i.h.bf16 %v7270_v37  ;;  %v5125_v31 = vunpack.i.l.bf16 %v7270_v37  ;;  %v2196_v49 = vpop.f32.mrb[48].mxu1  ;;  %3112 = vmatprep.subr.bf16.mxu1 %v5453_v26 }
 0x376   :  { %5238 = vrot.lane.b32.xlu0 %v7108_v53, %s5560_s16  ;;  %v2198_v29 = vpop.f32.mrb[49].mxu1  ;;  %v5454_v53 = vld [vmem:[%s7945_s3 + $0x160] ss:$8 sps:$4 sm:$0xff]  }
 0x377   :  { %v2199_v20 = vpop.f32.mrb[50].mxu1  ;;  %v7286_v15 = vsel %vm2477_vm6, %v7065_v22, %v5125_v31  ;;  %v7292_v38 = vsel %vm2477_vm6, %v7067_v10, %v5126_v44  ;;  %v5459_v22 = vld [vmem:[%s7945_s3 + $0x174] ss:$8 sps:$4 sm:$0xff]  }
 0x378   :  { %v5267_v30 = vpack.i.bf16 %v2199_v20, %v2196_v49  ;;  %v2201_v9 = vpop.f32.mrb[51].mxu1  ;;  %v2573_v13 = vpack.c.bf16 %v7292_v38, %v7286_v15  ;;  %3113 = vmatpush1.bf16.msra.mxu1 %v5451_v3 }
 0x379   :  { %3114 = vmatprep.subr.bf16.mxu1 %v5456_v41 }
 0x37a   :  { %5248 = vrot.lane.b32.xlu0 %v7139_v63, %s5560_s16  ;;  %5223 = vrot.lane.b32.xlu1 %v5267_v30, %s5559_s24  ;;  %v2504_v63 = vsel %vm2498_vm7, %v5111_v57, %v5116_v52  ;;  %s4140_s24 = sshll.u32 %s5564_s23, 4  ;;  %s4141_s24 = int_to_ptr.vmem [resolvable:$true] %s4140_s24 }
 0x37b   :  { %p5533_p1 = scmp.lt.s32.totalorder %s4141_s24, %s4141_s24 }
 0x37c   :  { %v7305_v10 = vpop.permute.xlu0 %5118  ;;  %3115 = vmatpush1.bf16.msra.mxu1 %v5454_v53 }
 0x37d   :  { %v5121_v21 = vunpack.i.h.bf16 %v7305_v10  ;;  %v5120_v0 = vunpack.i.l.bf16 %v7305_v10  ;;  %3116 = vmatprep.subr.bf16.mxu1 %v5459_v22 }
 0x37e   :  { %5258 = vrot.lane.b32.xlu0 %v7179_v16, %s5560_s16  ;;  %5233 = vrot.lane.b32.xlu1 %v7094_v25, %s5560_s16  ;;  %v5465_v25 = vld [vmem:[%s7945_s3 + $0x194] ss:$8 sps:$4 sm:$0xff]   ;;  %v2653_v16 = vld [vmem:[%s7945_s3 + $0x1a0] sm:$0x33] }
 0x37f   :  { %v2524_v33 = vsel %vm2519_vm8, %v2503_v56, %v5120_v0  ;;  %v2525_v8 = vsel %vm2519_vm8, %v2504_v63, %v5121_v21  ;;  %v4277_v3 = vcombine.high %v2653_v16, %v2653_v16  ;;  %v4276_v49 = vcombine.low %v2653_v16, %v2653_v16 }
 0x380   :  { %v5129_v18 = vpop.permute.xlu0 %5128  ;;  %v2570_v57 = vpack.c.bf16 %v2525_v8, %v2524_v33  ;;  %3117 = vmatpush1.bf16.msra.mxu1 %v5457_v11 }
 0x381   :  { %3118 = vmatprep.subr.bf16.mxu1 %v5462_v2  ;;  %v5131_v9 = vunpack.i.h.bf16 %v5129_v18  ;;  %v5130_v53 = vunpack.i.l.bf16 %v5129_v18 }
 0x382   :  { %3021 = vmatprep.mubr.bf16.mxu1 %v2570_v57  ;;  %5268 = vrot.lane.b32.xlu0 %v5267_v30, %s5560_s16  ;;  %v2964_v30 = vsel %vm2962_vm9, %v4276_v49, 0 }
 0x383   :  { %5243 = vrot.lane.b32.xlu1 %v7125_v50, %s5560_s16  ;;  %3022 = vmatmul.mubr.bf16.gmra.mrb[64].mxu1 %v2569_v32  ;;  %v2506_v22 = vsel %vm2498_vm7, %v5126_v44, %v5131_v9  ;;  %v2505_v52 = vsel %vm2498_vm7, %v5125_v31, %v5130_v53 }
 0x384   :  { %v5139_v12 = vpop.permute.xlu0 %5138  ;;  %3119 = vmatpush1.bf16.msra.mxu1 %v5460_v40 }
 0x385   :  { %v5141_v27 = vunpack.i.h.bf16 %v5139_v12  ;;  %v5140_v1 = vunpack.i.l.bf16 %v5139_v12  ;;  %v2204_v26 = vpop.f32.mrb[52].mxu1  ;;  %3120 = vmatprep.subr.bf16.mxu1 %v5465_v25 }
 0x386   :  { %v2206_v41 = vpop.f32.mrb[53].mxu1 }
 0x387   :  { %5253 = vrot.lane.b32.xlu1 %v7157_v14, %s5560_s16  ;;  %v2207_v50 = vpop.f32.mrb[54].mxu1  ;;  %v2486_v23 = vsel %vm2477_vm6, %v7074_v19, %v5140_v1  ;;  %v2487_v35 = vsel %vm2477_vm6, %v7076_v4, %v5141_v27 }
 0x388   :  { %v5272_v32 = vpack.i.bf16 %v2207_v50, %v2204_v26  ;;  %v2209_v29 = vpop.f32.mrb[55].mxu1  ;;  %v2577_v20 = vpack.c.bf16 %v2487_v35, %v2486_v23  ;;  %3121 = vmatpush1.bf16.msra.mxu1 %v5463_v55 }
 0x389   :  { %4278 = vmatprep.subr.msk.bf16.mxu1 %vm2962_vm9, %v4277_v3 }
 0x38b   :  { %5263 = vrot.lane.b32.xlu1 %v7227_v36, %s5560_s16 }
 0x38c   :  { %v7359_v14 = vpop.permute.xlu1 %5133  ;;  %3123 = vmatpush1.bf16.msra.mxu1 %v2964_v30 }
 0x38d   :  { %v5136_v19 = vunpack.i.h.bf16 %v7359_v14  ;;  %v5135_v4 = vunpack.i.l.bf16 %v7359_v14  ;;  %3872 = vmatprep.subr.bf16.mxu1 %v5555_v7 }
 0x38f   :  { %5273 = vrot.lane.b32.xlu1 %v5272_v32, %s5560_s16  ;;  %v2526_v36 = vsel %vm2519_vm8, %v2505_v52, %v5135_v4  ;;  %v2527_v42 = vsel %vm2519_vm8, %v2506_v22, %v5136_v19 }
 0x390   :  { %v5144_v11 = vpop.permute.xlu1 %5143  ;;  %v2574_v2 = vpack.c.bf16 %v2527_v42, %v2526_v36 }
 0x391   :  { %v5146_v8 = vunpack.i.h.bf16 %v5144_v11  ;;  %v5145_v18 = vunpack.i.l.bf16 %v5144_v11 }
 0x392   :  { %3031 = vmatprep.mubr.bf16.mxu1 %v2574_v2 }
 0x393   :  { %3032 = vmatmul.mubr.bf16.gmra.mrb[68].mxu1 %v2573_v13  ;;  %v2508_v15 = vsel %vm2498_vm7, %v5141_v27, %v5146_v8  ;;  %v2507_v38 = vsel %vm2498_vm7, %v5140_v1, %v5145_v18  ;;  %v5468_v18 = vld [vmem:[%s7948_s6] sm:$0xff]  }
 0x394   :  { %v5154_v37 = vpop.permute.xlu1 %5153  ;;  %3505 = vmatpush1.bf16.msra.mxu0 %v5468_v18 }
 0x395   :  { %v5156_v44 = vunpack.i.h.bf16 %v5154_v37  ;;  %v5155_v31 = vunpack.i.l.bf16 %v5154_v37  ;;  %3506 = vmatprep.subr.bf16.mxu0 %v5555_v7 }
 0x397   :  { %v2488_v63 = vsel %vm2477_vm6, %v7088_v59, %v5155_v31  ;;  %v2489_v56 = vsel %vm2477_vm6, %v7090_v48, %v5156_v44 }
 0x398   :  { %v2581_v33 = vpack.c.bf16 %v2489_v56, %v2488_v63 }
 0x39c   :  { %v7384_v57 = vpop.permute.xlu0 %5148 }
 0x39d   :  { %v5151_v40 = vunpack.i.h.bf16 %v7384_v57  ;;  %v5150_v25 = vunpack.i.l.bf16 %v7384_v57 }
 0x39f   :  { %v2528_v59 = vsel %vm2519_vm8, %v2507_v38, %v5150_v25  ;;  %v2529_v48 = vsel %vm2519_vm8, %v2508_v15, %v5151_v40 }
 0x3a0   :  { %v5159_v13 = vpop.permute.xlu0 %5158  ;;  %v2578_v16 = vpack.c.bf16 %v2529_v48, %v2528_v59  ;;  %v5469_v48 = vld [vmem:[%s7948_s6 + $0x8] sm:$0xff]  }
 0x3a1   :  { %v5161_v49 = vunpack.i.h.bf16 %v5159_v13  ;;  %v5160_v41 = vunpack.i.l.bf16 %v5159_v13  ;;  %3507 = vmatpush1.bf16.msra.mxu0 %v5469_v48 }
 0x3a2   :  { %3041 = vmatprep.mubr.bf16.mxu1 %v2578_v16  ;;  %3508 = vmatprep.subr.bf16.mxu0 %v5555_v7 }
 0x3a3   :  { %3042 = vmatmul.mubr.bf16.gmra.mrb[72].mxu1 %v2577_v20  ;;  %v2510_v32 = vsel %vm2498_vm7, %v5156_v44, %v5161_v49  ;;  %v2509_v29 = vsel %vm2498_vm7, %v5155_v31, %v5160_v41 }
 0x3a4   :  { %v5169_v12 = vpop.permute.xlu0 %5168 }
 0x3a5   :  { %v5171_v55 = vunpack.i.h.bf16 %v5169_v12  ;;  %v5170_v26 = vunpack.i.l.bf16 %v5169_v12 }
 0x3a7   :  { %v2490_v27 = vsel %vm2477_vm6, %v7102_v54, %v5170_v26  ;;  %v2491_v1 = vsel %vm2477_vm6, %v7104_v45, %v5171_v55 }
 0x3a8   :  { %v2585_v3 = vpack.c.bf16 %v2491_v1, %v2490_v27 }
 0x3ac   :  { %v7400_v50 = vpop.permute.xlu1 %5163 }
 0x3ad   :  { %v5166_v23 = vunpack.i.h.bf16 %v7400_v50  ;;  %v5165_v35 = vunpack.i.l.bf16 %v7400_v50 }
 0x3af   :  { %v2530_v54 = vsel %vm2519_vm8, %v2509_v29, %v5165_v35  ;;  %v2531_v45 = vsel %vm2519_vm8, %v2510_v32, %v5166_v23 }
 0x3b0   :  { %v5174_v20 = vpop.permute.xlu1 %5173  ;;  %v2582_v30 = vpack.c.bf16 %v2531_v45, %v2530_v54 }
 0x3b1   :  { %v5176_v11 = vunpack.i.h.bf16 %v5174_v20  ;;  %v5175_v2 = vunpack.i.l.bf16 %v5174_v20 }
 0x3b2   :  { %3051 = vmatprep.mubr.bf16.mxu1 %v2582_v30 }
 0x3b3   :  { %3052 = vmatmul.mubr.bf16.gmra.mrb[76].mxu1 %v2581_v33  ;;  %v2512_v63 = vsel %vm2498_vm7, %v5171_v55, %v5176_v11  ;;  %v2511_v56 = vsel %vm2498_vm7, %v5170_v26, %v5175_v2 }
 0x3b4   :  { %v5184_v9 = vpop.permute.xlu1 %5183 }
 0x3b5   :  { %v5186_v53 = vunpack.i.h.bf16 %v5184_v9  ;;  %v5185_v22 = vunpack.i.l.bf16 %v5184_v9 }
 0x3b7   :  { %v2492_v52 = vsel %vm2477_vm6, %v7116_v17, %v5185_v22  ;;  %v2493_v36 = vsel %vm2477_vm6, %v7121_v47, %v5186_v53 }
 0x3b8   :  { %v2589_v42 = vpack.c.bf16 %v2493_v36, %v2492_v52 }
 0x3bc   :  { %v7416_v37 = vpop.permute.xlu0 %5178 }
 0x3bd   :  { %v5181_v44 = vunpack.i.h.bf16 %v7416_v37  ;;  %v5180_v31 = vunpack.i.l.bf16 %v7416_v37 }
 0x3bf   :  { %v2532_v17 = vsel %vm2519_vm8, %v2511_v56, %v5180_v31  ;;  %v2533_v47 = vsel %vm2519_vm8, %v2512_v63, %v5181_v44 }
 0x3c0   :  { %v5189_v33 = vpop.permute.xlu0 %5188  ;;  %v2586_v8 = vpack.c.bf16 %v2533_v47, %v2532_v17 }
 0x3c1   :  { %v5191_v55 = vunpack.i.h.bf16 %v5189_v33  ;;  %v5190_v26 = vunpack.i.l.bf16 %v5189_v33 }
 0x3c2   :  { %3061 = vmatprep.mubr.bf16.mxu1 %v2586_v8 }
 0x3c3   :  { %3062 = vmatmul.mubr.bf16.gmra.mrb[80].mxu1 %v2585_v3  ;;  %v2514_v49 = vsel %vm2498_vm7, %v5186_v53, %v5191_v55  ;;  %v2513_v41 = vsel %vm2498_vm7, %v5185_v22, %v5190_v26 }
 0x3c4   :  { %v5199_v15 = vpop.permute.xlu0 %5198 }
 0x3c5   :  { %v5201_v38 = vunpack.i.h.bf16 %v5199_v15  ;;  %v5200_v59 = vunpack.i.l.bf16 %v5199_v15 }
 0x3c7   :  { %v2494_v13 = vsel %vm2477_vm6, %v7133_v61, %v5200_v59  ;;  %v2495_v16 = vsel %vm2477_vm6, %v7135_v46, %v5201_v38 }
 0x3c8   :  { %v2593_v12 = vpack.c.bf16 %v2495_v16, %v2494_v13 }
 0x3cc   :  { %v7440_v27 = vpop.permute.xlu1 %5193 }
 0x3cd   :  { %v5196_v1 = vunpack.i.h.bf16 %v7440_v27  ;;  %v5195_v3 = vunpack.i.l.bf16 %v7440_v27 }
 0x3cf   :  { %v2534_v61 = vsel %vm2519_vm8, %v2513_v41, %v5195_v3  ;;  %v2535_v46 = vsel %vm2519_vm8, %v2514_v49, %v5196_v1 }
 0x3d0   :  { %v5204_v32 = vpop.permute.xlu1 %5203  ;;  %v2590_v29 = vpack.c.bf16 %v2535_v46, %v2534_v61 }
 0x3d1   :  { %v5206_v22 = vunpack.i.h.bf16 %v5204_v32  ;;  %v5205_v52 = vunpack.i.l.bf16 %v5204_v32 }
 0x3d2   :  { %3071 = vmatprep.mubr.bf16.mxu1 %v2590_v29 }
 0x3d3   :  { %3072 = vmatmul.mubr.bf16.gmra.mrb[84].mxu1 %v2589_v42  ;;  %v2516_v63 = vsel %vm2498_vm7, %v5201_v38, %v5206_v22  ;;  %v2515_v56 = vsel %vm2498_vm7, %v5200_v59, %v5205_v52 }
 0x3d4   :  { %v5214_v54 = vpop.permute.xlu1 %5213 }
 0x3d5   :  { %v5216_v45 = vunpack.i.h.bf16 %v5214_v54  ;;  %v5215_v20 = vunpack.i.l.bf16 %v5214_v54 }
 0x3d7   :  { %v2496_v30 = vsel %vm2477_vm6, %v7151_v39, %v5215_v20  ;;  %v2497_v9 = vsel %vm2477_vm6, %v7153_v43, %v5216_v45 }
 0x3d8   :  { %v2597_v53 = vpack.c.bf16 %v2497_v9, %v2496_v30 }
 0x3dc   :  { %v5209_v36 = vpop.permute.xlu0 %5208 }
 0x3dd   :  { %v5211_v11 = vunpack.i.h.bf16 %v5209_v36  ;;  %v5210_v2 = vunpack.i.l.bf16 %v5209_v36 }
 0x3df   :  { %v2536_v42 = vsel %vm2519_vm8, %v2515_v56, %v5210_v2  ;;  %v2537_v17 = vsel %vm2519_vm8, %v2516_v63, %v5211_v11 }
 0x3e0   :  { %v5219_v47 = vpop.permute.xlu0 %5218  ;;  %v2594_v33 = vpack.c.bf16 %v2537_v17, %v2536_v42 }
 0x3e1   :  { %v5221_v8 = vunpack.i.h.bf16 %v5219_v47  ;;  %v5220_v18 = vunpack.i.l.bf16 %v5219_v47 }
 0x3e2   :  { %3081 = vmatprep.mubr.bf16.mxu1 %v2594_v33 }
 0x3e3   :  { %3082 = vmatmul.mubr.bf16.gmra.mrb[88].mxu1 %v2593_v12  ;;  %v2518_v59 = vsel %vm2498_vm7, %v5216_v45, %v5221_v8  ;;  %v2517_v16 = vsel %vm2498_vm7, %v5215_v20, %v5220_v18 }
 0x3e4   :  { %v5229_v39 = vpop.permute.xlu0 %5228 }
 0x3e5   :  { %v5231_v55 = vunpack.i.h.bf16 %v5229_v39  ;;  %v5230_v26 = vunpack.i.l.bf16 %v5229_v39 }
 0x3e7   :  { %v2564_v54 = vpack.c.bf16 %v5231_v55, %v5230_v26  ;;  %v2541_v36 = vsel %vm2540_vm11, %v5090_v58, %v5230_v26 }
 0x3e8   :  { %v7460_v43 = vpop.permute.xlu0 %5238 }
 0x3e9   :  { %v5241_v58 = vunpack.i.h.bf16 %v7460_v43  ;;  %v5240_v47 = vunpack.i.l.bf16 %v7460_v43 }
 0x3eb   :  { %v2545_v27 = vsel %vm2540_vm11, %v5120_v0, %v5240_v47 }
 0x3ec   :  { %v7462_v15 = vpop.permute.xlu0 %5248  ;;  %v5224_v48 = vpop.permute.xlu1 %5223 }
 0x3ed   :  { %v5226_v13 = vunpack.i.h.bf16 %v5224_v48  ;;  %v5225_v38 = vunpack.i.l.bf16 %v5224_v48 }
 0x3ef   :  { %v2538_v49 = vsel %vm2519_vm8, %v2517_v16, %v5225_v38  ;;  %v2539_v12 = vsel %vm2519_vm8, %v2518_v59, %v5226_v13 }
 0x3f0   :  { %v7468_v41 = vpop.permute.xlu0 %5258  ;;  %v5234_v61 = vpop.permute.xlu1 %5233  ;;  %v2598_v46 = vpack.c.bf16 %v2539_v12, %v2538_v49 }
 0x3f1   :  { %v5261_v32 = vunpack.i.h.bf16 %v7468_v41  ;;  %v5260_v29 = vunpack.i.l.bf16 %v7468_v41  ;;  %v5236_v37 = vunpack.i.h.bf16 %v5234_v61  ;;  %v5235_v63 = vunpack.i.l.bf16 %v5234_v61  ;;  %v5472_v41 = vld [vmem:[%s7948_s6 + $0x20] sm:$0xff]  }
 0x3f2   :  { %3091 = vmatprep.mubr.bf16.mxu1 %v2598_v46 }
 0x3f3   :  { %3092 = vmatmul.mubr.bf16.gmra.mrb[92].mxu1 %v2597_v53  ;;  %v7480_v20 = vsel %vm2540_vm11, %v5180_v31, %v5260_v29  ;;  %v7487_v30 = vsel %vm2540_vm11, %v5181_v44, %v5261_v32  ;;  %v2542_v31 = vsel %vm2540_vm11, %v5091_v51, %v5231_v55  ;;  %v2568_v34 = vpack.c.bf16 %v5236_v37, %v5235_v63 }
 0x3f4   :  { %v7472_v45 = vpop.permute.xlu0 %5268  ;;  %4279 = vmatprep.mubr.msk.bf16.mxu1 %vm2931_vm10, %v2564_v54  ;;  %v2587_v52 = vpack.c.bf16 %v7487_v30, %v7480_v20  ;;  %v2563_v51 = vpack.c.bf16 %v2542_v31, %v2541_v36  ;;  %v2544_v8 = vsel %vm2540_vm11, %v5106_v60, %v5236_v37  ;;  %v2572_v55 = vpack.c.bf16 %v5241_v58, %v5240_v47  ;;  %v2654_v20 = vld [vmem:[%s7946_s4] sm:$0x3] }
 0x3f5   :  { %v5271_v9 = vunpack.i.h.bf16 %v7472_v45  ;;  %v5270_v53 = vunpack.i.l.bf16 %v7472_v45  ;;  %v5244_v22 = vpop.permute.xlu1 %5243  ;;  %v2588_v57 = vpack.c.bf16 %v5261_v32, %v5260_v29  ;;  %v5473_v32 = vld [vmem:[%s7948_s6 + $0x28] sm:$0xff]   ;;  %v5474_v29 = vld [vmem:[%s7948_s6 + $0x30] sm:$0xff]   ;;  %v5475_v45 = vld [vmem:[%s7948_s6 + $0x38] sm:$0xff]  }
 0x3f6   :  { %v5246_v12 = vunpack.i.h.bf16 %v5244_v22 }
 0x3f7   :  { %v7502_v44 = vsel %vm2540_vm11, %v5210_v2, %v5270_v53  ;;  %v7507_v56 = vsel %vm2540_vm11, %v5211_v11, %v5271_v9  ;;  %v2543_v11 = vsel %vm2540_vm11, %v5105_v28, %v5235_v63 }
 0x3f8   :  { %v2595_v42 = vpack.c.bf16 %v7507_v56, %v7502_v44  ;;  %v2567_v59 = vpack.c.bf16 %v2544_v8, %v2543_v11  ;;  %v2548_v0 = vsel %vm2540_vm11, %v5136_v19, %v5246_v12  ;;  %v7609_v56 = vrot.slane %v2654_v20, %v929_v6  ;;  %v5476_v8 = vld [vmem:[%s7948_s6 + $0x40] sm:$0xff]  }
 0x3f9   :  { %v5254_v17 = vpop.permute.xlu1 %5253 }
 0x3fa   :  { %v5255_v31 = vunpack.i.l.bf16 %v5254_v17 }
 0x3fb   :  { %3135 = vmatmul.mubr.bf16.vlgmr.msra.gmra.mrb[56].mxu1 %v2563_v51 }
 0x3fc   :  { %4280 = vmatprep.mubr.msk.bf16.mxu1 %vm2931_vm10, %v2568_v34  ;;  %v2551_v14 = vsel %vm2540_vm11, %v5165_v35, %v5255_v31  ;;  %v5471_v35 = vld [vmem:[%s7948_s6 + $0x18] sm:$0xff]  }
 0x3fd   :  { %v5264_v2 = vpop.permute.xlu1 %5263 }
 0x3fe   :  { %v5266_v33 = vunpack.i.h.bf16 %v5264_v2  ;;  %v5265_v39 = vunpack.i.l.bf16 %v5264_v2 }
 0x400   :  { %v2555_v18 = vsel %vm2540_vm11, %v5195_v3, %v5265_v39  ;;  %v2556_v48 = vsel %vm2540_vm11, %v5196_v1, %v5266_v33  ;;  %v5245_v3 = vunpack.i.l.bf16 %v5244_v22  ;;  %v2546_v1 = vsel %vm2540_vm11, %v5121_v21, %v5241_v58 }
 0x401   :  { %v5274_v43 = vpop.permute.xlu1 %5273  ;;  %v2591_v16 = vpack.c.bf16 %v2556_v48, %v2555_v18  ;;  %v2571_v61 = vpack.c.bf16 %v2546_v1, %v2545_v27  ;;  %v5256_v21 = vunpack.i.h.bf16 %v5254_v17 }
 0x402   :  { %v5276_v26 = vunpack.i.h.bf16 %v5274_v43  ;;  %v5275_v49 = vunpack.i.l.bf16 %v5274_v43  ;;  %v2576_v46 = vpack.c.bf16 %v5246_v12, %v5245_v3  ;;  %v2547_v54 = vsel %vm2540_vm11, %v5135_v4, %v5245_v3 }
 0x403   :  { %3145 = vmatmul.mubr.bf16.gmra.mrb[60].mxu1 %v2567_v59  ;;  %v2575_v10 = vpack.c.bf16 %v2548_v0, %v2547_v54  ;;  %v2584_v37 = vpack.c.bf16 %v5256_v21, %v5255_v31  ;;  %v2552_v19 = vsel %vm2540_vm11, %v5166_v23, %v5256_v21  ;;  %v5470_v23 = vld [vmem:[%s7948_s6 + $0x10] sm:$0xff]   ;;  %s5561_s6 = smov 112  }
 0x404   :  { %4281 = vmatprep.mubr.msk.bf16.mxu1 %vm2931_vm10, %v2572_v55  ;;  %v2559_v5 = vsel %vm2540_vm11, %v5225_v38, %v5275_v49  ;;  %v2560_v60 = vsel %vm2540_vm11, %v5226_v13, %v5276_v26  ;;  %v5251_v38 = vunpack.i.h.bf16 %v7462_v15  ;;  %v5250_v13 = vunpack.i.l.bf16 %v7462_v15  ;;  %3509 = vmatpush1.bf16.msra.mxu0 %v5470_v23 }
 0x405   :  { %v2599_v28 = vpack.c.bf16 %v2560_v60, %v2559_v5  ;;  %v2583_v63 = vpack.c.bf16 %v2552_v19, %v2551_v14  ;;  %v2600_v50 = vpack.c.bf16 %v5276_v26, %v5275_v49  ;;  %3510 = vmatprep.subr.bf16.mxu0 %v5555_v7 }
 0x406   :  { %v2580_v22 = vpack.c.bf16 %v5251_v38, %v5250_v13  ;;  %v2549_v36 = vsel %vm2540_vm11, %v5150_v25, %v5250_v13  ;;  %v2550_v15 = vsel %vm2540_vm11, %v5151_v40, %v5251_v38  ;;  %v2592_v40 = vpack.c.bf16 %v5266_v33, %v5265_v39 }
 0x407   :  { %v2579_v4 = vpack.c.bf16 %v2550_v15, %v2549_v36  ;;  %v2596_v25 = vpack.c.bf16 %v5271_v9, %v5270_v53 }
 0x408   :  { %3511 = vmatpush1.bf16.msra.mxu0 %v5471_v35 }
 0x409   :  { %3512 = vmatprep.subr.bf16.mxu0 %v5555_v7 }
 0x40b   :  { %3155 = vmatmul.mubr.bf16.gmra.mrb[64].mxu1 %v2571_v61 }
 0x40c   :  { %4282 = vmatprep.mubr.msk.bf16.mxu1 %vm2931_vm10, %v2576_v46  ;;  %3513 = vmatpush1.bf16.msra.mxu0 %v5472_v41 }
 0x40d   :  { %3514 = vmatprep.subr.bf16.mxu0 %v5555_v7 }
 0x410   :  { %3515 = vmatpush1.bf16.msra.mxu0 %v5473_v32 }
 0x411   :  { %3516 = vmatprep.subr.bf16.mxu0 %v5555_v7 }
 0x413   :  { %3165 = vmatmul.mubr.bf16.gmra.mrb[68].mxu1 %v2575_v10 }
 0x414   :  { %4283 = vmatprep.mubr.msk.bf16.mxu1 %vm2931_vm10, %v2580_v22  ;;  %3517 = vmatpush1.bf16.msra.mxu0 %v5474_v29 }
 0x415   :  { %3518 = vmatprep.subr.bf16.mxu0 %v5555_v7 }
 0x418   :  { %3519 = vmatpush1.bf16.msra.mxu0 %v5475_v45 }
 0x419   :  { %3520 = vmatprep.subr.bf16.mxu0 %v5555_v7 }
 0x41b   :  { %3175 = vmatmul.mubr.bf16.gmra.mrb[72].mxu1 %v2579_v4 }
 0x41c   :  { %4284 = vmatprep.mubr.msk.bf16.mxu1 %vm2931_vm10, %v2584_v37  ;;  %3521 = vmatpush1.bf16.msra.mxu0 %v5476_v8 }
 0x423   :  { %3185 = vmatmul.mubr.bf16.gmra.mrb[76].mxu1 %v2583_v63 }
 0x424   :  { %4285 = vmatprep.mubr.msk.bf16.mxu1 %vm2931_vm10, %v2588_v57 }
 0x42b   :  { %3195 = vmatmul.mubr.bf16.gmra.mrb[80].mxu1 %v2587_v52  ;;  %v7605_v52 = vrot.slane %v2654_v20, %v925_v24 }
 0x42c   :  { %4286 = vmatprep.mubr.msk.bf16.mxu1 %vm2931_vm10, %v2592_v40 }
 0x433   :  { %3205 = vmatmul.mubr.bf16.gmra.mrb[84].mxu1 %v2591_v16 }
 0x434   :  { %4287 = vmatprep.mubr.msk.bf16.mxu1 %vm2931_vm10, %v2596_v25 }
 0x43b   :  { %3215 = vmatmul.mubr.bf16.gmra.mrb[88].mxu1 %v2595_v42 }
 0x43c   :  { %4288 = vmatprep.mubr.msk.bf16.mxu1 %vm2931_vm10, %v2600_v50 }
 0x443   :  { %3225 = vmatmul.mubr.bf16.gmra.mrb[92].mxu1 %v2599_v28 }
 0x4ce   :  { %v3136_v30 = vpop.f32.mrb[56].mxu1 }
 0x4cf   :  { %v3138_v9 = vpop.f32.mrb[57].mxu1  ;;  %v4422_v42 = vadd.f32 %v3136_v30, %v7605_v52 }
 0x4d0   :  { %v3140_v53 = vpop.f32.mrb[58].mxu1  ;;  %v4423_v51 = vadd.f32 %v3138_v9, %v7609_v56 }
 0x4d1   :  { %v3142_v44 = vpop.f32.mrb[59].mxu1  ;;  %v4424_v34 = vadd.f32 %v3140_v53, %v7605_v52  ;;  %v3235_v39 = vmax.f32 %v4422_v42, 0.0 }
 0x4d2   :  { %v4425_v2 = vadd.f32 %v3142_v44, %v7609_v56  ;;  %v3236_v18 = vmax.f32 %v4423_v51, 0.0 }
 0x4d3   :  { %v3237_v59 = vmax.f32 %v4424_v34, 0.0 }
 0x4d4   :  { %v3238_v26 = vmax.f32 %v4425_v2, 0.0 }
 0x4d6   :  { %v3146_v17 = vpop.f32.mrb[60].mxu1 }
 0x4d7   :  { %v4426_v58 = vadd.f32 %v3146_v17, %v7605_v52  ;;  %v3148_v47 = vpop.f32.mrb[61].mxu1 }
 0x4d8   :  { %v4427_v24 = vadd.f32 %v3148_v47, %v7609_v56  ;;  %v3150_v33 = vpop.f32.mrb[62].mxu1 }
 0x4d9   :  { %v3239_v11 = vmax.f32 %v4426_v58, 0.0  ;;  %v4428_v62 = vadd.f32 %v3150_v33, %v7605_v52  ;;  %v3152_v6 = vpop.f32.mrb[63].mxu1 }
 0x4da   :  { %v3240_v48 = vmax.f32 %v4427_v24, 0.0  ;;  %v4429_v43 = vadd.f32 %v3152_v6, %v7609_v56 }
 0x4db   :  { %v7622_v16 = vmax.f32 %v3235_v39, %v3239_v11  ;;  %v3241_v55 = vmax.f32 %v4428_v62, 0.0 }
 0x4dc   :  { %v7624_v49 = vmax.f32 %v3236_v18, %v3240_v48  ;;  %v3242_v5 = vmax.f32 %v4429_v43, 0.0 }
 0x4dd   :  { %v7626_v60 = vmax.f32 %v3237_v59, %v3241_v55 }
 0x4de   :  { %v5277_v28 = vpack.i.bf16 %v7624_v49, %v7622_v16  ;;  %v7630_v12 = vmax.f32 %v3238_v26, %v3242_v5  ;;  %v3156_v3 = vpop.f32.mrb[64].mxu1 }
 0x4df   :  { %v3158_v27 = vpop.f32.mrb[65].mxu1  ;;  %v4430_v38 = vadd.f32 %v3156_v3, %v7605_v52 }
 0x4e0   :  { %v5282_v1 = vpack.i.bf16 %v7630_v12, %v7626_v60  ;;  %v3160_v61 = vpop.f32.mrb[66].mxu1  ;;  %5278 = vrot.lane.b32.xlu0 %v5277_v28, %s5561_s6  ;;  %v4431_v13 = vadd.f32 %v3158_v27, %v7609_v56 }
 0x4e1   :  { %v3162_v46 = vpop.f32.mrb[67].mxu1  ;;  %v4432_v0 = vadd.f32 %v3160_v61, %v7605_v52  ;;  %v3243_v15 = vmax.f32 %v4430_v38, 0.0 }
 0x4e2   :  { %5283 = vrot.lane.b32.xlu1 %v5282_v1, %s5561_s6  ;;  %v4433_v21 = vadd.f32 %v3162_v46, %v7609_v56  ;;  %v3244_v19 = vmax.f32 %v4431_v13, 0.0 }
 0x4e3   :  { %v3245_v40 = vmax.f32 %v4432_v0, 0.0 }
 0x4e4   :  { %v3246_v23 = vmax.f32 %v4433_v21, 0.0 }
 0x4e6   :  { %v3166_v54 = vpop.f32.mrb[68].mxu1 }
 0x4e7   :  { %v4434_v10 = vadd.f32 %v3166_v54, %v7605_v52  ;;  %v3168_v22 = vpop.f32.mrb[69].mxu1 }
 0x4e8   :  { %v4435_v31 = vadd.f32 %v3168_v22, %v7609_v56  ;;  %v3170_v36 = vpop.f32.mrb[70].mxu1 }
 0x4e9   :  { %v3247_v4 = vmax.f32 %v4434_v10, 0.0  ;;  %v4436_v37 = vadd.f32 %v3170_v36, %v7605_v52  ;;  %v3172_v14 = vpop.f32.mrb[71].mxu1 }
 0x4ea   :  { %v3248_v63 = vmax.f32 %v4435_v31, 0.0  ;;  %v4437_v57 = vadd.f32 %v3172_v14, %v7609_v56 }
 0x4eb   :  { %v7644_v25 = vmax.f32 %v3243_v15, %v3247_v4  ;;  %v3249_v50 = vmax.f32 %v4436_v37, 0.0 }
 0x4ec   :  { %v7646_v35 = vmax.f32 %v3244_v19, %v3248_v63  ;;  %v3250_v41 = vmax.f32 %v4437_v57, 0.0 }
 0x4ed   :  { %v7648_v32 = vmax.f32 %v3245_v40, %v3249_v50 }
 0x4ee   :  { %v5287_v29 = vpack.i.bf16 %v7646_v35, %v7644_v25  ;;  %v7652_v45 = vmax.f32 %v3246_v23, %v3250_v41  ;;  %v3176_v20 = vpop.f32.mrb[72].mxu1 }
 0x4ef   :  { %v3178_v30 = vpop.f32.mrb[73].mxu1  ;;  %v4438_v42 = vadd.f32 %v3176_v20, %v7605_v52 }
 0x4f0   :  { %v5292_v9 = vpack.i.bf16 %v7652_v45, %v7648_v32  ;;  %v3180_v53 = vpop.f32.mrb[74].mxu1  ;;  %5288 = vrot.lane.b32.xlu0 %v5287_v29, %s5561_s6  ;;  %v4439_v51 = vadd.f32 %v3178_v30, %v7609_v56 }
 0x4f1   :  { %v3182_v44 = vpop.f32.mrb[75].mxu1  ;;  %v4440_v34 = vadd.f32 %v3180_v53, %v7605_v52  ;;  %v3251_v39 = vmax.f32 %v4438_v42, 0.0 }
 0x4f2   :  { %5293 = vrot.lane.b32.xlu1 %v5292_v9, %s5561_s6  ;;  %v4441_v2 = vadd.f32 %v3182_v44, %v7609_v56  ;;  %v3252_v8 = vmax.f32 %v4439_v51, 0.0 }
 0x4f3   :  { %v3253_v43 = vmax.f32 %v4440_v34, 0.0 }
 0x4f4   :  { %v3254_v26 = vmax.f32 %v4441_v2, 0.0 }
 0x4f6   :  { %v3186_v17 = vpop.f32.mrb[76].mxu1 }
 0x4f7   :  { %v4442_v58 = vadd.f32 %v3186_v17, %v7605_v52  ;;  %v3188_v47 = vpop.f32.mrb[77].mxu1 }
 0x4f8   :  { %v4443_v24 = vadd.f32 %v3188_v47, %v7609_v56  ;;  %v3190_v33 = vpop.f32.mrb[78].mxu1 }
 0x4f9   :  { %v3255_v11 = vmax.f32 %v4442_v58, 0.0  ;;  %v4444_v62 = vadd.f32 %v3190_v33, %v7605_v52  ;;  %v3192_v6 = vpop.f32.mrb[79].mxu1 }
 0x4fa   :  { %v3256_v18 = vmax.f32 %v4443_v24, 0.0  ;;  %v4445_v48 = vadd.f32 %v3192_v6, %v7609_v56 }
 0x4fb   :  { %v7666_v59 = vmax.f32 %v3251_v39, %v3255_v11  ;;  %v3257_v55 = vmax.f32 %v4444_v62, 0.0 }
 0x4fc   :  { %v7668_v5 = vmax.f32 %v3252_v8, %v3256_v18  ;;  %v3258_v28 = vmax.f32 %v4445_v48, 0.0 }
 0x4fd   :  { %v7670_v3 = vmax.f32 %v3253_v43, %v3257_v55 }
 0x4fe   :  { %v5297_v27 = vpack.i.bf16 %v7668_v5, %v7666_v59  ;;  %v7674_v1 = vmax.f32 %v3254_v26, %v3258_v28  ;;  %v3196_v61 = vpop.f32.mrb[80].mxu1 }
 0x4ff   :  { %v3198_v46 = vpop.f32.mrb[81].mxu1  ;;  %v4446_v0 = vadd.f32 %v3196_v61, %v7605_v52 }
 0x500   :  { %v5302_v38 = vpack.i.bf16 %v7674_v1, %v7670_v3  ;;  %v3200_v13 = vpop.f32.mrb[82].mxu1  ;;  %5298 = vrot.lane.b32.xlu0 %v5297_v27, %s5561_s6  ;;  %v4447_v10 = vadd.f32 %v3198_v46, %v7609_v56 }
 0x501   :  { %v3202_v54 = vpop.f32.mrb[83].mxu1  ;;  %v4448_v21 = vadd.f32 %v3200_v13, %v7605_v52  ;;  %v3259_v14 = vmax.f32 %v4446_v0, 0.0 }
 0x502   :  { %5303 = vrot.lane.b32.xlu1 %v5302_v38, %s5561_s6  ;;  %v4449_v15 = vadd.f32 %v3202_v54, %v7609_v56  ;;  %v3260_v40 = vmax.f32 %v4447_v10, 0.0 }
 0x503   :  { %v3261_v41 = vmax.f32 %v4448_v21, 0.0 }
 0x504   :  { %v3262_v30 = vmax.f32 %v4449_v15, 0.0 }
 0x506   :  { %v3206_v22 = vpop.f32.mrb[84].mxu1 }
 0x507   :  { %v4450_v31 = vadd.f32 %v3206_v22, %v7605_v52  ;;  %v3208_v36 = vpop.f32.mrb[85].mxu1 }
 0x508   :  { %v4451_v4 = vadd.f32 %v3208_v36, %v7609_v56  ;;  %v3210_v37 = vpop.f32.mrb[86].mxu1 }
 0x509   :  { %v3263_v19 = vmax.f32 %v4450_v31, 0.0  ;;  %v4452_v63 = vadd.f32 %v3210_v37, %v7605_v52  ;;  %v3212_v57 = vpop.f32.mrb[87].mxu1 }
 0x50a   :  { %v3264_v50 = vmax.f32 %v4451_v4, 0.0  ;;  %v4453_v23 = vadd.f32 %v3212_v57, %v7609_v56 }
 0x50b   :  { %v7688_v29 = vmax.f32 %v3259_v14, %v3263_v19  ;;  %v3265_v20 = vmax.f32 %v4452_v63, 0.0 }
 0x50c   :  { %v7690_v9 = vmax.f32 %v3260_v40, %v3264_v50  ;;  %v3266_v53 = vmax.f32 %v4453_v23, 0.0 }
 0x50d   :  { %v7692_v44 = vmax.f32 %v3261_v41, %v3265_v20 }
 0x50e   :  { %v5307_v42 = vpack.i.bf16 %v7690_v9, %v7688_v29  ;;  %v7696_v51 = vmax.f32 %v3262_v30, %v3266_v53  ;;  %v3216_v17 = vpop.f32.mrb[88].mxu1 }
 0x50f   :  { %v3218_v34 = vpop.f32.mrb[89].mxu1  ;;  %v4454_v24 = vadd.f32 %v3216_v17, %v7605_v52 }
 0x510   :  { %v5312_v58 = vpack.i.bf16 %v7696_v51, %v7692_v44  ;;  %v3220_v47 = vpop.f32.mrb[90].mxu1  ;;  %5308 = vrot.lane.b32.xlu0 %v5307_v42, %s5561_s6  ;;  %v4455_v33 = vadd.f32 %v3218_v34, %v7609_v56 }
 0x511   :  { %v3222_v2 = vpop.f32.mrb[91].mxu1  ;;  %v4456_v11 = vadd.f32 %v3220_v47, %v7605_v52  ;;  %v3267_v43 = vmax.f32 %v4454_v24, 0.0 }
 0x512   :  { %5313 = vrot.lane.b32.xlu1 %v5312_v58, %s5561_s6  ;;  %v4457_v8 = vadd.f32 %v3222_v2, %v7609_v56  ;;  %v3268_v27 = vmax.f32 %v4455_v33, 0.0 }
 0x513   :  { %v3269_v38 = vmax.f32 %v4456_v11, 0.0 }
 0x514   :  { %v3270_v0 = vmax.f32 %v4457_v8, 0.0 }
 0x516   :  { %v3226_v39 = vpop.f32.mrb[92].mxu1 }
 0x517   :  { %v4458_v62 = vadd.f32 %v3226_v39, %v7605_v52  ;;  %v3228_v6 = vpop.f32.mrb[93].mxu1 }
 0x518   :  { %v4459_v18 = vadd.f32 %v3228_v6, %v7609_v56  ;;  %v3230_v48 = vpop.f32.mrb[94].mxu1 }
 0x519   :  { %v3271_v55 = vmax.f32 %v4458_v62, 0.0  ;;  %v4460_v26 = vadd.f32 %v3230_v48, %v7605_v52  ;;  %v3232_v28 = vpop.f32.mrb[95].mxu1 }
 0x51a   :  { %v3272_v61 = vmax.f32 %v4459_v18, 0.0  ;;  %v4461_v46 = vadd.f32 %v3232_v28, %v7609_v56 }
 0x51b   :  { %v7710_v13 = vmax.f32 %v3267_v43, %v3271_v55  ;;  %v3273_v54 = vmax.f32 %v4460_v26, 0.0 }
 0x51c   :  { %v7712_v10 = vmax.f32 %v3268_v27, %v3272_v61  ;;  %v3274_v22 = vmax.f32 %v4461_v46, 0.0 }
 0x51d   :  { %v7714_v21 = vmax.f32 %v3269_v38, %v3273_v54 }
 0x51e   :  { %v5317_v31 = vpack.i.bf16 %v7712_v10, %v7710_v13  ;;  %v7718_v36 = vmax.f32 %v3270_v0, %v3274_v22 }
 0x520   :  { %v5322_v52 = vpack.i.bf16 %v7718_v36, %v7714_v21  ;;  %5318 = vrot.lane.b32.xlu0 %v5317_v31, %s5561_s6 }
 0x522   :  { %5323 = vrot.lane.b32.xlu1 %v5322_v52, %s5561_s6 }
 0x552   :  { %v5279_v56 = vpop.permute.xlu0 %5278 }
 0x553   :  { %v5281_v15 = vunpack.i.h.bf16 %v5279_v56  ;;  %v5280_v4 = vunpack.i.l.bf16 %v5279_v56 }
 0x554   :  { %v5284_v37 = vpop.permute.xlu1 %5283 }
 0x555   :  { %v3356_v14 = vsel %vm3355_vm12, %v5280_v4, %v5281_v15  ;;  %v5286_v19 = vunpack.i.h.bf16 %v5284_v37  ;;  %v5285_v63 = vunpack.i.l.bf16 %v5284_v37  ;;  %v3387_v57 = vmax.f32 %v7624_v49, %v5281_v15 }
 0x556   :  { %v3386_v23 = vmax.f32 %v7622_v16, %v3356_v14 }
 0x557   :  { %v3389_v40 = vmax.f32 %v7630_v12, %v5286_v19  ;;  %v3357_v50 = vsel %vm3355_vm12, %v5285_v63, %v5286_v19 }
 0x558   :  { %v3388_v41 = vmax.f32 %v7626_v60, %v3357_v50 }
 0x559   :  { %v3407_v20 = vpack.c.bf16 %v3389_v40, %v3387_v57 }
 0x55a   :  { %v3406_v30 = vpack.c.bf16 %v3388_v41, %v3386_v23  ;;  %v5477_v41 = vld [vmem:[%s7949_s7 + $0x80] sm:$0xff]  }
 0x55b   :  { %4298 = vmatprep.mubr.msk.bf16.mxu0 %vm3488_vm13, %v3407_v20  ;;  %3873 = vmatpush1.bf16.msra.mxu1 %v5477_v41 }
 0x55c   :  { %3537 = vmatmul.mubr.bf16.vlgmr.msra.gmra.mrb[112].mxu0 %v3406_v30  ;;  %3874 = vmatprep.subr.bf16.mxu1 %v5555_v7 }
 0x562   :  { %v5289_v53 = vpop.permute.xlu0 %5288 }
 0x563   :  { %v5291_v42 = vunpack.i.h.bf16 %v5289_v53  ;;  %v5290_v17 = vunpack.i.l.bf16 %v5289_v53  ;;  %v5480_v53 = vld [vmem:[%s7949_s7 + $0x98] sm:$0xff]  }
 0x564   :  { %v5294_v34 = vpop.permute.xlu1 %5293 }
 0x565   :  { %v3358_v49 = vsel %vm3355_vm12, %v5290_v17, %v5291_v42  ;;  %v5296_v58 = vunpack.i.h.bf16 %v5294_v34  ;;  %v5295_v12 = vunpack.i.l.bf16 %v5294_v34  ;;  %v3391_v47 = vmax.f32 %v7646_v35, %v5291_v42  ;;  %v5481_v42 = vld [vmem:[%s7949_s7 + $0x40] sm:$0xff]   ;;  %v5484_v34 = vld [vmem:[%s7949_s7 + $0x48] sm:$0xff]  }
 0x566   :  { %v3390_v2 = vmax.f32 %v7644_v25, %v3358_v49  ;;  %v5482_v17 = vld [vmem:[%s7949_s7] sm:$0xff]   ;;  %4348 = vmatprep.subr.bf16.mxu0 %v5481_v42 }
 0x567   :  { %v3393_v16 = vmax.f32 %v7652_v45, %v5296_v58  ;;  %v3359_v60 = vsel %vm3355_vm12, %v5295_v12, %v5296_v58  ;;  %v5483_v49 = vld [vmem:[%s7949_s7 + $0xa0] sm:$0xff]   ;;  %4349 = vmatpush3.bf16.msra.mxu0 %v5482_v17  ;;  %v5485_v58 = vld [vmem:[%s7949_s7 + $0x8] sm:$0xff]   ;;  %v5486_v12 = vld [vmem:[%s7949_s7 + $0x50] sm:$0xff]  }
 0x568   :  { %v3392_v24 = vmax.f32 %v7648_v32, %v3359_v60  ;;  %4350 = vmatprep.subr.bf16.mxu0 %v5484_v34 }
 0x569   :  { %v3409_v33 = vpack.c.bf16 %v3393_v16, %v3391_v47 }
 0x56a   :  { %v3408_v39 = vpack.c.bf16 %v3392_v24, %v3390_v2  ;;  %v5487_v2 = vld [vmem:[%s7949_s7 + $0x10] sm:$0xff]  }
 0x56b   :  { %4299 = vmatprep.mubr.msk.bf16.mxu0 %vm3488_vm13, %v3409_v33  ;;  %4351 = vmatpush3.bf16.msra.mxu0 %v5485_v58  ;;  %v5504_v58 = vld [vmem:[%s7951_s9 + $0x10] sm:$0xff]  }
 0x56c   :  { %3545 = vmatmul.mubr.bf16.gmra.mrb[116].mxu0 %v3408_v39  ;;  %4352 = vmatprep.subr.bf16.mxu0 %v5486_v12  ;;  %v5488_v39 = vld [vmem:[%s7949_s7 + $0x58] sm:$0xff]  }
 0x56d   :  { %v5505_v12 = vld [vmem:[%s7951_s9 + $0x18] sm:$0xff]  }
 0x56f   :  { %4353 = vmatpush3.bf16.msra.mxu0 %v5487_v2  ;;  %v5509_v2 = vld [vmem:[%s7951_s9 + $0x38] ss:$0 sps:$4 sm:$0xff]  }
 0x570   :  { %4354 = vmatprep.subr.bf16.mxu0 %v5488_v39  ;;  %v5511_v39 = vld [vmem:[%s7953_s11 + $0x8] sm:$0xff]  }
 0x572   :  { %v5299_v11 = vpop.permute.xlu0 %5298 }
 0x573   :  { %v5301_v62 = vunpack.i.h.bf16 %v5299_v11  ;;  %v5300_v6 = vunpack.i.l.bf16 %v5299_v11  ;;  %v5489_v11 = vld [vmem:[%s7949_s7 + $0xa8] sm:$0xff]  }
 0x574   :  { %v5304_v8 = vpop.permute.xlu1 %5303 }
 0x575   :  { %v3360_v18 = vsel %vm3355_vm12, %v5300_v6, %v5301_v62  ;;  %v5306_v35 = vunpack.i.h.bf16 %v5304_v8  ;;  %v5305_v48 = vunpack.i.l.bf16 %v5304_v8  ;;  %v3395_v45 = vmax.f32 %v7668_v5, %v5301_v62  ;;  %v5490_v62 = vld [vmem:[%s7949_s7 + $0x18] sm:$0xff]   ;;  %v5491_v6 = vld [vmem:[%s7949_s7 + $0x60] sm:$0xff]   ;;  %v5495_v8 = vld [vmem:[%s7949_s7 + $0xb0] sm:$0xff]  }
 0x576   :  { %v3394_v32 = vmax.f32 %v7666_v59, %v3360_v18  ;;  %4355 = vmatpush3.bf16.msra.mxu0 %v5490_v62  ;;  %v5492_v18 = vld [vmem:[%s7949_s7 + $0x20] sm:$0xff]   ;;  %v5513_v62 = vld [vmem:[%s7953_s11 + $0x18] sm:$0xff]  }
 0x577   :  { %v3397_v43 = vmax.f32 %v7674_v1, %v5306_v35  ;;  %v3361_v25 = vsel %vm3355_vm12, %v5305_v48, %v5306_v35  ;;  %4356 = vmatprep.subr.bf16.mxu0 %v5491_v6  ;;  %v5493_v35 = vld [vmem:[%s7949_s7 + $0x68] sm:$0xff]  }
 0x578   :  { %v3396_v55 = vmax.f32 %v7670_v3, %v3361_v25 }
 0x579   :  { %v3411_v26 = vpack.c.bf16 %v3397_v43, %v3395_v45  ;;  %v5494_v43 = vld [vmem:[%s7949_s7 + $0x28] sm:$0xff]  }
 0x57a   :  { %v3410_v28 = vpack.c.bf16 %v3396_v55, %v3394_v32  ;;  %4357 = vmatpush3.bf16.msra.mxu0 %v5492_v18  ;;  %v5496_v32 = vld [vmem:[%s7949_s7 + $0x70] sm:$0xff]  }
 0x57b   :  { %4300 = vmatprep.mubr.msk.bf16.mxu0 %vm3488_vm13, %v3411_v26  ;;  %4358 = vmatprep.subr.bf16.mxu0 %v5493_v35 }
 0x57c   :  { %3553 = vmatmul.mubr.bf16.gmra.mrb[120].mxu0 %v3410_v28  ;;  %v5497_v28 = vld [vmem:[%s7949_s7 + $0x30] sm:$0xff]  }
 0x57e   :  { %4359 = vmatpush3.bf16.msra.mxu0 %v5494_v43  ;;  %v4303_v43 = vld [vmem:[%s7950_s8] ss:$0 sm:$0xff] }
 0x57f   :  { %4360 = vmatprep.subr.bf16.mxu0 %v5496_v32 }
 0x582   :  { %v5309_v27 = vpop.permute.xlu0 %5308  ;;  %4361 = vmatpush3.bf16.msra.mxu0 %v5497_v28 }
 0x583   :  { %v5311_v61 = vunpack.i.h.bf16 %v5309_v27  ;;  %v5310_v46 = vunpack.i.l.bf16 %v5309_v27  ;;  %v5498_v27 = vld [vmem:[%s7949_s7 + $0x78] sm:$0xff]  }
 0x584   :  { %v5314_v38 = vpop.permute.xlu1 %5313  ;;  %4362 = vmatprep.subr.bf16.mxu0 %v5498_v27 }
 0x585   :  { %v3362_v54 = vsel %vm3355_vm12, %v5310_v46, %v5311_v61  ;;  %v5316_v5 = vunpack.i.h.bf16 %v5314_v38  ;;  %v5315_v0 = vunpack.i.l.bf16 %v5314_v38  ;;  %v3399_v1 = vmax.f32 %v7690_v9, %v5311_v61  ;;  %v5500_v61 = vld [vmem:[%s7949_s7 + $0xb8] sm:$0xff]   ;;  %v5501_v38 = vld [vmem:[%s7949_s7 + $0xc0] sm:$0xff]  }
 0x586   :  { %v3398_v3 = vmax.f32 %v7688_v29, %v3362_v54  ;;  %v5499_v46 = vld [vmem:[%s7949_s7 + $0x38] sm:$0xff]  }
 0x587   :  { %v3401_v22 = vmax.f32 %v7696_v51, %v5316_v5  ;;  %v3363_v59 = vsel %vm3355_vm12, %v5315_v0, %v5316_v5  ;;  %4363 = vmatpush3.bf16.msra.mxu0 %v5499_v46 }
 0x588   :  { %v3400_v31 = vmax.f32 %v7692_v44, %v3363_v59  ;;  %v5562_v59 = vmov 0.0  }
 0x589   :  { %v3413_v52 = vpack.c.bf16 %v3401_v22, %v3399_v1  ;;  %4386 = vmatprep.subr.bf16.mxu0 %v5562_v59 }
 0x58a   :  { %v3412_v56 = vpack.c.bf16 %v3400_v31, %v3398_v3 }
 0x58b   :  { %4301 = vmatprep.mubr.msk.bf16.mxu0 %vm3488_vm13, %v3413_v52 }
 0x58c   :  { %3561 = vmatmul.mubr.bf16.gmra.mrb[124].mxu0 %v3412_v56 }
 0x592   :  { %v5319_v15 = vpop.permute.xlu0 %5318 }
 0x593   :  { %v5321_v4 = vunpack.i.h.bf16 %v5319_v15  ;;  %v5320_v37 = vunpack.i.l.bf16 %v5319_v15 }
 0x594   :  { %v5324_v14 = vpop.permute.xlu1 %5323 }
 0x595   :  { %v3364_v19 = vsel %vm3355_vm12, %v5320_v37, %v5321_v4  ;;  %v5326_v9 = vunpack.i.h.bf16 %v5324_v14  ;;  %v5325_v63 = vunpack.i.l.bf16 %v5324_v14  ;;  %v3403_v51 = vmax.f32 %v7712_v10, %v5321_v4  ;;  %v5478_v10 = vld [vmem:[%s7949_s7 + $0x88] sm:$0xff]  }
 0x596   :  { %v3402_v44 = vmax.f32 %v7710_v13, %v3364_v19  ;;  %3875 = vmatpush1.bf16.msra.mxu1 %v5478_v10  ;;  %v5479_v13 = vld [vmem:[%s7949_s7 + $0x90] sm:$0xff]  }
 0x597   :  { %v3405_v57 = vmax.f32 %v7718_v36, %v5326_v9  ;;  %v3365_v29 = vsel %vm3355_vm12, %v5325_v63, %v5326_v9  ;;  %3876 = vmatprep.subr.bf16.mxu1 %v5555_v7 }
 0x598   :  { %v3404_v40 = vmax.f32 %v7714_v21, %v3365_v29 }
 0x599   :  { %v3415_v50 = vpack.c.bf16 %v3405_v57, %v3403_v51 }
 0x59a   :  { %v3414_v23 = vpack.c.bf16 %v3404_v40, %v3402_v44  ;;  %3877 = vmatpush1.bf16.msra.mxu1 %v5479_v13 }
 0x59b   :  { %4302 = vmatprep.mubr.msk.bf16.mxu0 %vm3488_vm13, %v3415_v50  ;;  %3878 = vmatprep.subr.bf16.mxu1 %v5555_v7 }
 0x59c   :  { %3569 = vmatmul.mubr.bf16.gmra.mrb[128].mxu0 %v3414_v23 }
 0x59e   :  { %3879 = vmatpush1.bf16.msra.mxu1 %v5480_v53 }
 0x59f   :  { %3880 = vmatprep.subr.bf16.mxu1 %v5555_v7 }
 0x5a2   :  { %3881 = vmatpush1.bf16.msra.mxu1 %v5483_v49 }
 0x5a3   :  { %3882 = vmatprep.subr.bf16.mxu1 %v5555_v7 }
 0x5a6   :  { %3883 = vmatpush1.bf16.msra.mxu1 %v5489_v11  ;;  %v5512_v11 = vld [vmem:[%s7953_s11 + $0x10] sm:$0xff]  }
 0x5a7   :  { %3884 = vmatprep.subr.bf16.mxu1 %v5555_v7 }
 0x5aa   :  { %3885 = vmatpush1.bf16.msra.mxu1 %v5495_v8 }
 0x5ab   :  { %3886 = vmatprep.subr.bf16.mxu1 %v5555_v7 }
 0x5ae   :  { %3887 = vmatpush1.bf16.msra.mxu1 %v5500_v61 }
 0x5af   :  { %3888 = vmatprep.subr.bf16.mxu1 %v5555_v7 }
 0x5b2   :  { %3889 = vmatpush1.bf16.msra.mxu1 %v5501_v38 }
 0x5b3   :  { %4406 = vmatprep.subr.bf16.mxu1 %v5562_v59 }
 0x62f   :  { %v7771_v21 = vpop.f32.mrb[112].mxu0 }
 0x630   :  { %v3540_v36 = vpop.f32.mrb[113].mxu0 }
 0x631   :  { %v7773_v20 = vpop.f32.mrb[114].mxu0  ;;  %v5503_v36 = vld [vmem:[%s7951_s9 + $0x8] sm:$0xff]  }
 0x632   :  { %v3543_v30 = vpop.f32.mrb[115].mxu0 }
 0x63f   :  { %v3546_v47 = vpop.f32.mrb[116].mxu0 }
 0x640   :  { %v3548_v16 = vpop.f32.mrb[117].mxu0 }
 0x641   :  { %v3549_v60 = vpop.f32.mrb[118].mxu0  ;;  %v5507_v16 = vld [vmem:[%s7951_s9 + $0x28] sm:$0xff]  }
 0x642   :  { %v5327_v24 = vpack.i.bf16 %v3549_v60, %v3546_v47  ;;  %v3551_v33 = vpop.f32.mrb[119].mxu0  ;;  %v5506_v47 = vld [vmem:[%s7951_s9 + $0x20] sm:$0xff]   ;;  %v5508_v60 = vld [vmem:[%s7951_s9 + $0x30] sm:$0xff]  }
 0x643   :  { %v5510_v33 = vld [vmem:[%s7953_s11] sm:$0xff]  }
 0x644   :  { %5328 = vrot.lane.b32.xlu0 %v5327_v24, %s5560_s16  ;;  %v3989_v24 = vsel %vm3987_vm14, %v5509_v2, 0 }
 0x64f   :  { %v3554_v48 = vpop.f32.mrb[120].mxu0 }
 0x650   :  { %v3556_v45 = vpop.f32.mrb[121].mxu0 }
 0x651   :  { %v3557_v25 = vpop.f32.mrb[122].mxu0 }
 0x652   :  { %v5332_v55 = vpack.i.bf16 %v3557_v25, %v3554_v48  ;;  %v3559_v26 = vpop.f32.mrb[123].mxu0 }
 0x654   :  { %5333 = vrot.lane.b32.xlu1 %v5332_v55, %s5552_s20 }
 0x65f   :  { %v3562_v54 = vpop.f32.mrb[124].mxu0 }
 0x660   :  { %v3564_v5 = vpop.f32.mrb[125].mxu0 }
 0x661   :  { %v3565_v0 = vpop.f32.mrb[126].mxu0 }
 0x662   :  { %v5337_v1 = vpack.i.bf16 %v3565_v0, %v3562_v54  ;;  %v3567_v22 = vpop.f32.mrb[127].mxu0  ;;  %v5514_v0 = vld [vmem:[%s7953_s11 + $0x20] sm:$0xff]  }
 0x664   :  { %5338 = vrot.lane.b32.xlu0 %v5337_v1, %s5561_s6  ;;  %v5515_v1 = vld [vmem:[%s7953_s11 + $0x28] ss:$0 sps:$4 sm:$0x33]  }
 0x665   :  { %v4090_v22 = vsel %vm2962_vm9, %v5515_v1, 0 }
 0x66f   :  { %v3570_v3 = vpop.f32.mrb[128].mxu0 }
 0x670   :  { %v3572_v7 = vpop.f32.mrb[129].mxu0 }
 0x671   :  { %v3573_v31 = vpop.f32.mrb[130].mxu0 }
 0x672   :  { %v5342_v52 = vpack.i.bf16 %v3573_v31, %v3570_v3  ;;  %v3575_v56 = vpop.f32.mrb[131].mxu0  ;;  %v4330_v3 = vld [vmem:[%s7952_s10] ss:$0 sm:$0xff]  ;;  %s5528_s10 = scalar_lea.vmem %s4141_s24, 256 }
 0x673   :  { %p5529_p0 = scmp.ne.s32.totalorder %s4141_s24, %s5528_s10  ;;  %p5534_p2 = scmp.lt.s32.totalorder %s5528_s10, %s5528_s10 }
 0x674   :  { %5343 = vrot.lane.b32.xlu1 %v5342_v52, %s5554_s26 }
 0x675   :  { %p5535_p3 = por %p5534_p2, %p5533_p1 }
 0x677   :  { %p5536_p4 = pnand %p5535_p3, %p5529_p0 }
 0x6b6   :  { %v5329_v15 = vpop.permute.xlu0 %5328 }
 0x6b7   :  { %v5331_v4 = vunpack.i.h.bf16 %v5329_v15  ;;  %v5330_v37 = vunpack.i.l.bf16 %v5329_v15 }
 0x6b9   :  { %v3610_v14 = vsel %vm2540_vm11, %v7773_v20, %v5331_v4  ;;  %v3609_v19 = vsel %vm2540_vm11, %v7771_v21, %v5330_v37  ;;  %v5502_v21 = vld [vmem:[%s7951_s9] sm:$0xff]  }
 0x6ba   :  { %v3617_v9 = vpack.c.bf16 %v3610_v14, %v3609_v19  ;;  %v4340_v19 = vld [vmem:[%s7954_s12] ss:$0 sm:$0xff] }
 0x6c6   :  { %v5334_v63 = vpop.permute.xlu1 %5333 }
 0x6c7   :  { %v5336_v51 = vunpack.i.h.bf16 %v5334_v63  ;;  %v5335_v57 = vunpack.i.l.bf16 %v5334_v63 }
 0x6c9   :  { %v3612_v50 = vsel %vm674_vm0, %v5331_v4, %v5336_v51  ;;  %v3611_v23 = vsel %vm674_vm0, %v5330_v37, %v5335_v57  ;;  %vm3983_vm0 = vcmask 982016  }
 0x6d6   :  { %v5339_v29 = vpop.permute.xlu0 %5338 }
 0x6d7   :  { %v5341_v44 = vunpack.i.h.bf16 %v5339_v29  ;;  %v5340_v40 = vunpack.i.l.bf16 %v5339_v29 }
 0x6d9   :  { %v3613_v41 = vsel %vm3355_vm12, %v3611_v23, %v5340_v40  ;;  %v3614_v10 = vsel %vm3355_vm12, %v3612_v50, %v5341_v44 }
 0x6da   :  { %v3618_v13 = vpack.c.bf16 %v3614_v10, %v3613_v41 }
 0x6dc   :  { %3863 = vmatprep.mubr.bf16.mxu0 %v3618_v13 }
 0x6dd   :  { %3864 = vmatmul.mubr.bf16.vlgmr.msra.gmra.mrb[132].mxu0 %v3617_v9 }
 0x6de   :  { %4387 = vmatpush3.bf16.msra.mxu0 %v5502_v21  ;;  %4402 = vmatprep.mubr.msk.bf16.mxu0 %vm5563_vm15, %v5562_v59 }
 0x6df   :  { %4388 = vmatprep.subr.bf16.mxu0 %v5562_v59 }
 0x6e2   :  { %4389 = vmatpush3.bf16.msra.mxu0 %v5503_v36 }
 0x6e3   :  { %4390 = vmatprep.subr.bf16.mxu0 %v5562_v59 }
 0x6e6   :  { %v5344_v20 = vpop.permute.xlu1 %5343  ;;  %4391 = vmatpush3.bf16.msra.mxu0 %v5504_v58 }
 0x6e7   :  { %v5346_v30 = vunpack.i.h.bf16 %v5344_v20  ;;  %v5345_v53 = vunpack.i.l.bf16 %v5344_v20  ;;  %4392 = vmatprep.subr.bf16.mxu0 %v5562_v59 }
 0x6e9   :  { %v3616_v42 = vsel %vm731_vm1, %v5341_v44, %v5346_v30  ;;  %v3615_v17 = vsel %vm731_vm1, %v5340_v40, %v5345_v53  ;;  %v3620_v34 = vpack.c.bf16 %v5346_v30, %v5345_v53 }
 0x6ea   :  { %v3619_v49 = vpack.c.bf16 %v3616_v42, %v3615_v17  ;;  %4393 = vmatpush3.bf16.msra.mxu0 %v5505_v12 }
 0x6eb   :  { %4329 = vmatprep.mubr.msk.bf16.mxu1 %vm3488_vm13, %v3620_v34  ;;  %4394 = vmatprep.subr.bf16.mxu0 %v5562_v59 }
 0x6ec   :  { %3905 = vmatmul.mubr.bf16.vlgmr.msra.gmra.mrb[96].mxu1 %v3619_v49 }
 0x6ed   :  { %4418 = vmatprep.mubr.msk.bf16.mxu1 %vm5563_vm15, %v5562_v59  ;;  %4407 = vmatpush3.bf16.msra.mxu1 %v5510_v33 }
 0x6ee   :  { %4395 = vmatpush3.bf16.msra.mxu0 %v5506_v47  ;;  %4408 = vmatprep.subr.bf16.mxu1 %v5562_v59 }
 0x6ef   :  { %4396 = vmatprep.subr.bf16.mxu0 %v5562_v59 }
 0x6f1   :  { %4409 = vmatpush3.bf16.msra.mxu1 %v5511_v39 }
 0x6f2   :  { %4397 = vmatpush3.bf16.msra.mxu0 %v5507_v16  ;;  %4410 = vmatprep.subr.bf16.mxu1 %v5562_v59 }
 0x6f3   :  { %4398 = vmatprep.subr.bf16.mxu0 %v5562_v59 }
 0x6f5   :  { %4411 = vmatpush3.bf16.msra.mxu1 %v5512_v11 }
 0x6f6   :  { %4399 = vmatpush3.bf16.msra.mxu0 %v5508_v60  ;;  %4412 = vmatprep.subr.bf16.mxu1 %v5562_v59 }
 0x6f7   :  { %4400 = vmatprep.subr.bf16.mxu0 %v5562_v59 }
 0x6f9   :  { %4413 = vmatpush3.bf16.msra.mxu1 %v5513_v62 }
 0x6fa   :  { %4401 = vmatpush3.bf16.msra.mxu0 %v3989_v24  ;;  %4414 = vmatprep.subr.bf16.mxu1 %v5562_v59 }
 0x6fd   :  { %4415 = vmatpush3.bf16.msra.mxu1 %v5514_v0 }
 0x6fe   :  { %4416 = vmatprep.subr.bf16.mxu1 %v5562_v59 }
 0x701   :  { %4417 = vmatpush3.bf16.msra.mxu1 %v4090_v22 }
 0x7b0   :  { %v4364_v6 = vpop.f32.mrb[132].mxu0 }
 0x7b1   :  { %v4365_v8 = vpop.f32.mrb[133].mxu0 }
 0x7b2   :  { %v4366_v18 = vadd.f32 %v4365_v8, %v4364_v6  ;;  %v4367_v35 = vpop.f32.mrb[134].mxu0 }
 0x7b3   :  { %v4368_v48 = vpop.f32.mrb[135].mxu0 }
 0x7b4   :  { %v4369_v45 = vadd.f32 %v4368_v48, %v4367_v35  ;;  %v3866_v25 = vadd.f32 %v4366_v18, %v4303_v43 }
 0x7b6   :  { %v3869_v28 = vadd.f32 %v4369_v45, %v4303_v43 }
 0x7bf   :  { %v3906_v32 = vpop.f32.mrb[96].mxu1 }
 0x7c0   :  { %v3907_v55 = vadd.f32 %v3906_v32, %v3866_v25  ;;  %v3908_v26 = vpop.f32.mrb[97].mxu1 }
 0x7c1   :  { %v3909_v27 = vpop.f32.mrb[98].mxu1 }
 0x7c2   :  { %v3910_v61 = vadd.f32 %v3909_v27, %v3869_v28  ;;  %v3911_v46 = vpop.f32.mrb[99].mxu1  ;;  %v3913_v38 = vmax.f32 %v3907_v55, 0.0 }
 0x7c4   :  { %v3914_v54 = vmax.f32 %v3910_v61, 0.0 }
 0x7c6   :  { %v3915_v5 = vpack.c.bf16 %v3914_v54, %v3913_v38 }
 0x7c8   :  { %4403 = vmatmul.mubr.msk.bf16.vlgmr.msra.gmra.mrb[136].mxu0 %vm3983_vm0, %v3915_v5 }
 0x89b   :  { %v4025_v7 = vpop.f32.mrb[136].mxu0 }
 0x89c   :  { %v4026_v31 = vadd.f32 %v4330_v3, %v4025_v7  ;;  %v4404_v52 = vpop.f32.mrb[137].mxu0 }
 0x89d   :  { %v4028_v56 = vpop.f32.mrb[138].mxu0 }
 0x89e   :  { %v4029_v15 = vadd.f32 %v4330_v3, %v4028_v56  ;;  %v4405_v4 = vpop.f32.mrb[139].mxu0  ;;  %v4032_v37 = vmax.f32 %v4026_v31, 0.0 }
 0x8a0   :  { %v4033_v14 = vmax.f32 %v4029_v15, 0.0 }
 0x8a2   :  { %v4034_v59 = vpack.c.bf16 %v4033_v14, %v4032_v37 }
 0x8a4   :  { %4419 = vmatmul.mubr.msk.bf16.vlgmr.msra.gmra.mrb[100].mxu1 %vm2477_vm6, %v4034_v59 }
 0x977   :  { %v4126_v9 = vpop.f32.mrb[100].mxu1 }
 0x978   :  { %v4127_v63 = vadd.f32 %v4340_v19, %v4126_v9  ;;  %v4420_v51 = vpop.f32.mrb[101].mxu1 }
 0x979   :  { %v4129_v57 = vpop.f32.mrb[102].mxu1 }
 0x97a   :  { %4133 = vst [vmem:[#allocation2] sm:$0xff] %v4127_v63  ;;  %v4130_v29 = vadd.f32 %v4340_v19, %v4129_v57  ;;  %v4421_v44 = vpop.f32.mrb[103].mxu1 }
 0x97c   :  { %4134 = vst [vmem:[#allocation2 + $0x8] sm:$0xff] %v4130_v29 }
 0x97d   :  { %5539 = shalt.err (!%p5536_p4)
}
 0x97e   :  { %s5540_s25 = scalar_lea.hbm %s7955_s13, 256 }
 0x97f   :  { %p5541_p5 = scmp.ne.s32.totalorder %s7955_s13, %s5540_s25  ;;  %p5544_p6 = scmp.lt.u32.totalorder %s5540_s25, %s7955_s13 }
 0x981   :  { %p5546_p7 = pnand %p5544_p6, %p5541_p5 }
 0x983   :  { %5549 = shalt.err (!%p5546_p7)
}
 0x984   :  { %s5565_s4 = smov 128   ;;  %s5566_s30 = smov 8  }
 0x985   :  { %4146 = dma.vmem_to_hbm [thread:$0]  %s4141_s24, 256, %s7955_s13, [#allocation3], %s5565_s4, %s5565_s4, %s5566_s30  }
 0x986   :  { %5550 = dma.done.wait [#allocation3], 256  }
 0x987   :  { %5551 = vsyncadd [#allocation3], 4294967040 }
 0x988   :  { %4150 = vsyncpa [#allocation3], 1 }

</bundles_post_ra>
